<compile_context>
chip_gen: v5e
topology: v5e:2x2
jax: 0.10.0
libtpu: 0.0.40
codegen_flags: <defaults>
</compile_context>

<pallas_src>
import functools

import numpy as np
import jax
import jax.numpy as jnp
from jax import lax
from jax.experimental import pallas as pl
from jax.experimental.pallas import tpu as pltpu


# ----------------------------- Pallas kernel ------------------------------- #
#
# In-kernel activation layout (per layer l, per program / batch block B):
#   two "row parity" planes rbuf[p], p in {0,1}, each a 2-D block
#       rows  : a*B + b      <->  zero-padded row  r = 2a + p   of sample b
#       lanes : X*C + c      <->  zero-padded col  X, channel c
#   With this layout the 3x3 / stride-2 tap (ky, kx) for output (oy, ox) is
#       rbuf[ky % 2][ (ky//2 + oy)*B + b,  (2*ox + kx)*C + c ]
#   i.e. a contiguous row range x contiguous 3*C lane range -> plain ref reads.

def _make_encoder_kernel(geom, bblk, emit):
    n_l = len(geom)

    def kernel(*refs):
        in0_ref = refs[0]
        w_refs = [refs[1 + 2 * l] for l in range(n_l)]
        b_refs = [refs[2 + 2 * l] for l in range(n_l)]
        n_out = sum(emit)
        out_refs = list(refs[1 + 2 * n_l: 1 + 2 * n_l + n_out])
        scratch = refs[1 + 2 * n_l + n_out:]
        rbufs = list(scratch[:n_l - 1])          # padded inputs of layers 1..L-1
        pats = list(scratch[n_l - 1:])           # im2col patches per layer

        B = bblk

        # Zero the padded intermediate buffers every grid step (border must be
        # zero; scratch is per-core and persists, so no cross-step init games).
        for rb in rbufs:
            rb[...] = jnp.zeros(rb.shape, rb.dtype)

        oi = 0
        for l, g in enumerate(geom):
            ho, wo, c_in, c_out = g["ho"], g["wo"], g["cin"], g["cout"]
            hob = ho * B
            pat = pats[l]

            # ---- build im2col patches: 3*Wo contiguous VMEM copies ----------
            for ky in range(3):
                ro, rp = divmod(ky, 2)           # (0,0), (0,1), (1,0)
                for ox in range(wo):
                    if l == 0:
                        blk = in0_ref[rp, 0,
                                      ro * B:(ro + ho) * B,
                                      2 * ox * c_in:(2 * ox + 3) * c_in]
                    else:
                        blk = rbufs[l - 1][rp,
                                           ro * B:(ro + ho) * B,
                                           2 * ox * c_in:(2 * ox + 3) * c_in]
                    pat[ox * hob:(ox + 1) * hob,
                        ky * 3 * c_in:(ky + 1) * 3 * c_in] = blk

            # ---- one fused MXU matmul per layer (K = 9*Cin), f32 accumulate --
            out = jnp.dot(pat[...], w_refs[l][...],
                          preferred_element_type=jnp.float32)
            out = out + b_refs[l][...]           # folded-BN shift (scale in w)
            out_bf = out.astype(jnp.bfloat16)

            # ---- HBM writeback (bf16) ---------------------------------------
            if emit[l]:
                out_refs[oi][0] = out_bf
                oi += 1

            # ---- scatter into the next layer's padded, parity-split buffer ---
            if l + 1 < n_l:
                nrb = rbufs[l]
                for oy in range(ho):
                    a_n, p_n = divmod(oy + 1, 2)
                    for ox in range(wo):
                        m0 = (ox * ho + oy) * B
                        nrb[p_n,
                            a_n * B:(a_n + 1) * B,
                            (ox + 1) * c_out:(ox + 2) * c_out] = \
                            out_bf[m0:m0 + B, :]

    return kernel


def encoder_pallas(in0, prep, emit):
    """in0: (2, G, (H/2+1)*B, (W+2)*C0p) bf16 parity-split padded layer-0 input."""
    geom, layers, B = prep["geom"], prep["layers"], prep["bblk"]
    n_l = len(geom)
    grid_n = in0.shape[1]

    in_specs = [pl.BlockSpec((2, 1) + in0.shape[2:], lambda i: (0, i, 0, 0))]
    args = [in0]
    for lyr in layers:
        in_specs.append(pl.BlockSpec(lyr["w"].shape, lambda i: (0, 0)))
        in_specs.append(pl.BlockSpec(lyr["b"].shape, lambda i: (0, 0)))
        args += [lyr["w"], lyr["b"]]

    out_shapes, out_specs = [], []
    for l, g in enumerate(geom):
        if not emit[l]:
            continue
        m = B * g["ho"] * g["wo"]
        out_shapes.append(
            jax.ShapeDtypeStruct((grid_n, m, g["cout"]), jnp.bfloat16))
        out_specs.append(pl.BlockSpec((1, m, g["cout"]), lambda i: (i, 0, 0)))

    scratch = []
    for l in range(1, n_l):
        g = geom[l]
        scratch.append(pltpu.VMEM(
            (2, (g["hi"] // 2 + 1) * B, (g["wi"] + 2) * g["cin"]),
            jnp.bfloat16))
    for g in geom:
        scratch.append(pltpu.VMEM(
            (B * g["ho"] * g["wo"], 9 * g["cin"]), jnp.bfloat16))

    return pl.pallas_call(
        _make_encoder_kernel(geom, B, emit),
        grid=(grid_n,),
        in_specs=in_specs,
        out_specs=out_specs,
        out_shape=out_shapes,
        scratch_shapes=scratch,
        compiler_params=pltpu.CompilerParams(
            dimension_semantics=("parallel",),      # >=2 blocks -> both v7x TCs
            vmem_limit_bytes=16 * 1024 * 1024,      # >> ~0.5 MiB working set
        ),
    )(*args)


# ----------------------- host-side parameter prep -------------------------- #

def prepare_encoder(params, height, width, batch_block, eps=1e-5):
    """Packs BN-folded, tap-major (9*Cin, Cout) weights and layer geometry."""
    geom, packed = [], []
    hi, wi = height, width
    for l, p in enumerate(params):
        w = np.asarray(p["w"], np.float32)              # (Cout, Cin, 3, 3)
        c_out, c_in = w.shape[0], w.shape[1]
        c_pad = 16 if l == 0 else c_in                  # pad ragged 11 -> 16
        assert hi % 2 == 0 and wi % 2 == 0
        ho, wo = hi // 2, wi // 2
        scale = (np.asarray(p["gamma"], np.float32)
                 / np.sqrt(np.asarray(p["var"], np.float32) + eps))
        shift = (np.asarray(p["beta"], np.float32)
                 - np.asarray(p["mean"], np.float32) * scale)
        w_t = np.transpose(w, (2, 3, 1, 0)) * scale[None, None, None, :]
        w_pad = np.zeros((3, 3, c_pad, c_out), np.float32)
        w_pad[:, :, :c_in, :] = w_t                     # zero rows for pad chans
        packed.append(dict(
            w=jnp.asarray(w_pad.reshape(9 * c_pad, c_out), jnp.bfloat16),
            b=jnp.asarray(shift.reshape(1, c_out), jnp.float32)))
        geom.append(dict(hi=hi, wi=wi, ho=ho, wo=wo, cin=c_pad, cout=c_out))
        hi, wi = ho, wo
    return dict(geom=geom, layers=packed, bblk=batch_block)


# ------------------------------ JAX glue ----------------------------------- #

def pixel_grid(bs, height, width, dtype=jnp.float32):
    xs = jnp.linspace(-1.0, 1.0, width, dtype=dtype)
    ys = jnp.linspace(-1.0, 1.0, height, dtype=dtype)
    px_x = jnp.broadcast_to(xs[None, None, None, :], (bs, 1, height, width))
    px_y = jnp.broadcast_to(ys[None, None, :, None], (bs, 1, height, width))
    return px_x, px_y


def _build_input(images, pose_deltas):
    bs, pose_dim = pose_deltas.shape
    h, w = images.shape[2:]
    px_x, px_y = pixel_grid(bs, h, w, images.dtype)
    pose = jnp.broadcast_to(pose_deltas[:, :, None, None], (bs, pose_dim, h, w))
    return jnp.concatenate((images, px_x, px_y, pose), axis=1)   # (N, 11, H, W)


def init_encoder_params(key, num_convs, img_channels=3, pose_dim=6):
    params = []
    assert img_channels + 2 + pose_dim == 11
    for i in range(num_convs):
        c_in = 11 if i == 0 else 2 ** (i + 4)
        c_out = 2 ** (i + 5)
        key, kw, kg, kb, km, kv = jax.random.split(key, 6)
        w = jax.random.normal(kw, (c_out, c_in, 3, 3), jnp.float32) * 0.05
        gamma = 1.0 + 0.1 * jax.random.normal(kg, (c_out,), jnp.float32)
        beta = 0.1 * jax.random.normal(kb, (c_out,), jnp.float32)
        run_mean = 0.1 * jax.random.normal(km, (c_out,), jnp.float32)
        run_var = 1.0 + 0.1 * jax.random.uniform(kv, (c_out,), jnp.float32)
        params.append(dict(w=w, gamma=gamma, beta=beta,
                           mean=run_mean, var=run_var))
    return params


def encoder_forward(prep, images, pose_deltas, emit_all=True):
    """images: (N, 3, H, W); pose_deltas: (N, 6).  Returns (final_feat, feats)."""
    geom, B = prep["geom"], prep["bblk"]
    n = images.shape[0]
    h, w = images.shape[2:]
    assert n % B == 0
    grid_n = n // B
    n_l = len(geom)
    emit = [emit_all or (l == n_l - 1) for l in range(n_l)]

    # Build (N, 11, H, W) input, then the parity-split padded bf16 layout the
    # kernel consumes (zero-pad channels 11->16 and spatial by 1).
    feat = _build_input(images, pose_deltas)
    c0, c0p = feat.shape[1], geom[0]["cin"]
    x = jnp.transpose(feat, (0, 2, 3, 1))                         # NHWC
    x = jnp.pad(x, ((0, 0), (1, 1), (1, 1), (0, c0p - c0)))
    hp, wp = h + 2, w + 2
    x = x.reshape(grid_n, B, hp // 2, 2, wp * c0p)
    x = jnp.transpose(x, (3, 0, 2, 1, 4))                         # (p,G,a,b,L)
    in0 = x.reshape(2, grid_n, (hp // 2) * B, wp * c0p).astype(jnp.bfloat16)

    outs = encoder_pallas(in0, prep, emit)

    feats, oi = [], 0
    for l, g in enumerate(geom):
        if not emit[l]:
            feats.append(None)
            continue
        o = outs[oi]
        oi += 1
        ho, wo, c = g["ho"], g["wo"], g["cout"]
        # kernel row order is (ox, oy, b_local); grid blocks are contiguous in N
        o = o.reshape(grid_n, wo, ho, B, c)
        o = jnp.transpose(o, (0, 3, 4, 2, 1)).reshape(n, c, ho, wo)
        feats.append(o.astype(jnp.float32))
    return feats[-1], feats


# --------------------------- pure-JAX reference ----------------------------- #

def encoder_reference(params, images, pose_deltas, eps=1e-5):
    feat = _build_input(images, pose_deltas)
    features = []
    for p in params:
        out = lax.conv_general_dilated(
            feat, p["w"], window_strides=(2, 2), padding=((1, 1), (1, 1)),
            dimension_numbers=("NCHW", "OIHW", "NCHW"))
        scale = p["gamma"] / jnp.sqrt(p["var"] + eps)
        shift = p["beta"] - p["mean"] * scale
        out = out * scale[None, :, None, None] + shift[None, :, None, None]
        features.append(out)
        feat = out
    return feat, features


# ------------------------------- main --------------------------------------- #

if __name__ == "__main__":
    num_convs = 3
    batch, img_ch, H, W, pose_dim = 8, 3, 16, 16, 6
    batch_block = 4                                   # grid = 2 (both v7x TCs)

    assert H % (2 ** num_convs) == 0 and W % (2 ** num_convs) == 0

    key = jax.random.PRNGKey(0)
    k_params, k_img, k_pose = jax.random.split(key, 3)

    params = init_encoder_params(k_params, num_convs,
                                 img_channels=img_ch, pose_dim=pose_dim)
    images = jax.random.normal(k_img, (batch, img_ch, H, W), jnp.float32)
    pose_deltas = jax.random.normal(k_pose, (batch, pose_dim), jnp.float32)

    prep = prepare_encoder(params, H, W, batch_block)
    fwd = jax.jit(functools.partial(encoder_forward, prep, emit_all=True))
    final_feat, feats = fwd(images, pose_deltas)
    jax.block_until_ready(final_feat)

    # shape sanity: 16 -> 8 -> 4 -> 2 spatial, channels 32 -> 64 -> 128
    assert final_feat.shape == (batch, 2 ** (num_convs + 4),
                                H // 2 ** num_convs, W // 2 ** num_convs)

    # correctness vs a pure-JAX conv+BN reference (bf16 activations/weights)
    ref_final, ref_feats = encoder_reference(params, images, pose_deltas)
    for a, b in zip(feats, ref_feats):
        np.testing.assert_allclose(np.asarray(a), np.asarray(b),
                                   rtol=6e-2, atol=6e-2)

    print("KERNEL_OK")
</pallas_src>

<mosaic_0001>
module attributes {stable_mosaic.version = 11 : i64} {
  func.func @kernel(%arg0: i32, %arg1: memref<2x1x36x288xbf16, #tpu.memory_space<vmem>>, %arg2: memref<144x32xbf16, #tpu.memory_space<vmem>>, %arg3: memref<1x32xf32, #tpu.memory_space<vmem>>, %arg4: memref<288x64xbf16, #tpu.memory_space<vmem>>, %arg5: memref<1x64xf32, #tpu.memory_space<vmem>>, %arg6: memref<576x128xbf16, #tpu.memory_space<vmem>>, %arg7: memref<1x128xf32, #tpu.memory_space<vmem>>, %arg8: memref<1x256x32xbf16, #tpu.memory_space<vmem>>, %arg9: memref<1x64x64xbf16, #tpu.memory_space<vmem>>, %arg10: memref<1x16x128xbf16, #tpu.memory_space<vmem>>, %arg11: memref<2x20x320xbf16, #tpu.memory_space<vmem>>, %arg12: memref<2x12x384xbf16, #tpu.memory_space<vmem>>, %arg13: memref<256x144xbf16, #tpu.memory_space<vmem>>, %arg14: memref<64x288xbf16, #tpu.memory_space<vmem>>, %arg15: memref<16x576xbf16, #tpu.memory_space<vmem>>) attributes {dimension_semantics = [#tpu.dimension_semantics<parallel>], iteration_bounds = array<i64: 2>, scalar_prefetch = 0 : i64, scratch_operands = 5 : i64, tpu.core_type = #tpu.core_type<tc>, window_params = [{transform_indices = @transform_0, window_bounds = array<i64: 2, 1, 36, 288>}, {pipeline_mode = #tpu.pipeline_mode<synchronous>, transform_indices = @transform_1, window_bounds = array<i64: 144, 32>}, {pipeline_mode = #tpu.pipeline_mode<synchronous>, transform_indices = @transform_2, window_bounds = array<i64: 1, 32>}, {pipeline_mode = #tpu.pipeline_mode<synchronous>, transform_indices = @transform_3, window_bounds = array<i64: 288, 64>}, {pipeline_mode = #tpu.pipeline_mode<synchronous>, transform_indices = @transform_4, window_bounds = array<i64: 1, 64>}, {pipeline_mode = #tpu.pipeline_mode<synchronous>, transform_indices = @transform_5, window_bounds = array<i64: 576, 128>}, {pipeline_mode = #tpu.pipeline_mode<synchronous>, transform_indices = @transform_6, window_bounds = array<i64: 1, 128>}, {transform_indices = @transform_7, window_bounds = array<i64: 1, 256, 32>}, {transform_indices = @transform_8, window_bounds = array<i64: 1, 64, 64>}, {transform_indices = @transform_9, window_bounds = array<i64: 1, 16, 128>}]} {
    %cst = arith.constant 0.000000e+00 : bf16
    %0 = vector.broadcast %cst : bf16 to vector<2x20x320xbf16>
    %c0 = arith.constant 0 : index
    %c0_0 = arith.constant 0 : index
    %c0_1 = arith.constant 0 : index
    %1 = vector.load %arg11[%c0, %c0_0, %c0_1] : memref<2x20x320xbf16, #tpu.memory_space<vmem>>, vector<2x20x320xbf16>
    tpu.vector_store %arg11[%c0, %c0_0, %c0_1], %0 {strides = array<i32>} : memref<2x20x320xbf16, #tpu.memory_space<vmem>>, vector<2x20x320xbf16>,
    %cst_2 = arith.constant 0.000000e+00 : bf16
    %2 = vector.broadcast %cst_2 : bf16 to vector<2x12x384xbf16>
    %c0_3 = arith.constant 0 : index
    %c0_4 = arith.constant 0 : index
    %c0_5 = arith.constant 0 : index
    %3 = vector.load %arg12[%c0_3, %c0_4, %c0_5] : memref<2x12x384xbf16, #tpu.memory_space<vmem>>, vector<2x12x384xbf16>
    tpu.vector_store %arg12[%c0_3, %c0_4, %c0_5], %2 {strides = array<i32>} : memref<2x12x384xbf16, #tpu.memory_space<vmem>>, vector<2x12x384xbf16>,
    %c0_6 = arith.constant 0 : index
    %c0_7 = arith.constant 0 : index
    %c0_8 = arith.constant 0 : index
    %c0_9 = arith.constant 0 : index
    %4 = vector.load %arg1[%c0_6, %c0_7, %c0_8, %c0_9] : memref<2x1x36x288xbf16, #tpu.memory_space<vmem>>, vector<1x1x32x48xbf16>
    %5 = vector.shape_cast %4 : vector<1x1x32x48xbf16> to vector<32x48xbf16>
    %c0_10 = arith.constant 0 : index
    %c0_11 = arith.constant 0 : index
    %6 = vector.load %arg13[%c0_10, %c0_11] : memref<256x144xbf16, #tpu.memory_space<vmem>>, vector<32x48xbf16>
    tpu.vector_store %arg13[%c0_10, %c0_11], %5 {strides = array<i32>} : memref<256x144xbf16, #tpu.memory_space<vmem>>, vector<32x48xbf16>,
    %c0_12 = arith.constant 0 : index
    %c0_13 = arith.constant 0 : index
    %c0_14 = arith.constant 0 : index
    %c32 = arith.constant 32 : index
    %7 = vector.load %arg1[%c0_12, %c0_13, %c0_14, %c32] : memref<2x1x36x288xbf16, #tpu.memory_space<vmem>>, vector<1x1x32x48xbf16>
    %8 = vector.shape_cast %7 : vector<1x1x32x48xbf16> to vector<32x48xbf16>
    %c32_15 = arith.constant 32 : index
    %c0_16 = arith.constant 0 : index
    %9 = vector.load %arg13[%c32_15, %c0_16] : memref<256x144xbf16, #tpu.memory_space<vmem>>, vector<32x48xbf16>
    tpu.vector_store %arg13[%c32_15, %c0_16], %8 {strides = array<i32>} : memref<256x144xbf16, #tpu.memory_space<vmem>>, vector<32x48xbf16>,
    %c0_17 = arith.constant 0 : index
    %c0_18 = arith.constant 0 : index
    %c0_19 = arith.constant 0 : index
    %c64 = arith.constant 64 : index
    %10 = vector.load %arg1[%c0_17, %c0_18, %c0_19, %c64] : memref<2x1x36x288xbf16, #tpu.memory_space<vmem>>, vector<1x1x32x48xbf16>
    %11 = vector.shape_cast %10 : vector<1x1x32x48xbf16> to vector<32x48xbf16>
    %c64_20 = arith.constant 64 : index
    %c0_21 = arith.constant 0 : index
    %12 = vector.load %arg13[%c64_20, %c0_21] : memref<256x144xbf16, #tpu.memory_space<vmem>>, vector<32x48xbf16>
    tpu.vector_store %arg13[%c64_20, %c0_21], %11 {strides = array<i32>} : memref<256x144xbf16, #tpu.memory_space<vmem>>, vector<32x48xbf16>,
    %c0_22 = arith.constant 0 : index
    %c0_23 = arith.constant 0 : index
    %c0_24 = arith.constant 0 : index
    %c96 = arith.constant 96 : index
    %13 = vector.load %arg1[%c0_22, %c0_23, %c0_24, %c96] : memref<2x1x36x288xbf16, #tpu.memory_space<vmem>>, vector<1x1x32x48xbf16>
    %14 = vector.shape_cast %13 : vector<1x1x32x48xbf16> to vector<32x48xbf16>
    %c96_25 = arith.constant 96 : index
    %c0_26 = arith.constant 0 : index
    %15 = vector.load %arg13[%c96_25, %c0_26] : memref<256x144xbf16, #tpu.memory_space<vmem>>, vector<32x48xbf16>
    tpu.vector_store %arg13[%c96_25, %c0_26], %14 {strides = array<i32>} : memref<256x144xbf16, #tpu.memory_space<vmem>>, vector<32x48xbf16>,
    %c0_27 = arith.constant 0 : index
    %c0_28 = arith.constant 0 : index
    %c0_29 = arith.constant 0 : index
    %c128 = arith.constant 128 : index
    %16 = vector.load %arg1[%c0_27, %c0_28, %c0_29, %c128] : memref<2x1x36x288xbf16, #tpu.memory_space<vmem>>, vector<1x1x32x48xbf16>
    %17 = vector.shape_cast %16 : vector<1x1x32x48xbf16> to vector<32x48xbf16>
    %c128_30 = arith.constant 128 : index
    %c0_31 = arith.constant 0 : index
    %18 = vector.load %arg13[%c128_30, %c0_31] : memref<256x144xbf16, #tpu.memory_space<vmem>>, vector<32x48xbf16>
    tpu.vector_store %arg13[%c128_30, %c0_31], %17 {strides = array<i32>} : memref<256x144xbf16, #tpu.memory_space<vmem>>, vector<32x48xbf16>,
    %c0_32 = arith.constant 0 : index
    %c0_33 = arith.constant 0 : index
    %c0_34 = arith.constant 0 : index
    %c160 = arith.constant 160 : index
    %19 = vector.load %arg1[%c0_32, %c0_33, %c0_34, %c160] : memref<2x1x36x288xbf16, #tpu.memory_space<vmem>>, vector<1x1x32x48xbf16>
    %20 = vector.shape_cast %19 : vector<1x1x32x48xbf16> to vector<32x48xbf16>
    %c160_35 = arith.constant 160 : index
    %c0_36 = arith.constant 0 : index
    %21 = vector.load %arg13[%c160_35, %c0_36] : memref<256x144xbf16, #tpu.memory_space<vmem>>, vector<32x48xbf16>
    tpu.vector_store %arg13[%c160_35, %c0_36], %20 {strides = array<i32>} : memref<256x144xbf16, #tpu.memory_space<vmem>>, vector<32x48xbf16>,
    %c0_37 = arith.constant 0 : index
    %c0_38 = arith.constant 0 : index
    %c0_39 = arith.constant 0 : index
    %c192 = arith.constant 192 : index
    %22 = vector.load %arg1[%c0_37, %c0_38, %c0_39, %c192] : memref<2x1x36x288xbf16, #tpu.memory_space<vmem>>, vector<1x1x32x48xbf16>
    %23 = vector.shape_cast %22 : vector<1x1x32x48xbf16> to vector<32x48xbf16>
    %c192_40 = arith.constant 192 : index
    %c0_41 = arith.constant 0 : index
    %24 = vector.load %arg13[%c192_40, %c0_41] : memref<256x144xbf16, #tpu.memory_space<vmem>>, vector<32x48xbf16>
    tpu.vector_store %arg13[%c192_40, %c0_41], %23 {strides = array<i32>} : memref<256x144xbf16, #tpu.memory_space<vmem>>, vector<32x48xbf16>,
    %c0_42 = arith.constant 0 : index
    %c0_43 = arith.constant 0 : index
    %c0_44 = arith.constant 0 : index
    %c224 = arith.constant 224 : index
    %25 = vector.load %arg1[%c0_42, %c0_43, %c0_44, %c224] : memref<2x1x36x288xbf16, #tpu.memory_space<vmem>>, vector<1x1x32x48xbf16>
    %26 = vector.shape_cast %25 : vector<1x1x32x48xbf16> to vector<32x48xbf16>
    %c224_45 = arith.constant 224 : index
    %c0_46 = arith.constant 0 : index
    %27 = vector.load %arg13[%c224_45, %c0_46] : memref<256x144xbf16, #tpu.memory_space<vmem>>, vector<32x48xbf16>
    tpu.vector_store %arg13[%c224_45, %c0_46], %26 {strides = array<i32>} : memref<256x144xbf16, #tpu.memory_space<vmem>>, vector<32x48xbf16>,
    %c1 = arith.constant 1 : index
    %c0_47 = arith.constant 0 : index
    %c0_48 = arith.constant 0 : index
    %c0_49 = arith.constant 0 : index
    %28 = vector.load %arg1[%c1, %c0_47, %c0_48, %c0_49] : memref<2x1x36x288xbf16, #tpu.memory_space<vmem>>, vector<1x1x32x48xbf16>
    %29 = vector.shape_cast %28 : vector<1x1x32x48xbf16> to vector<32x48xbf16>
    %c0_50 = arith.constant 0 : index
    %c48 = arith.constant 48 : index
    %30 = vector.load %arg13[%c0_50, %c48] : memref<256x144xbf16, #tpu.memory_space<vmem>>, vector<32x48xbf16>
    tpu.vector_store %arg13[%c0_50, %c48], %29 {strides = array<i32>} : memref<256x144xbf16, #tpu.memory_space<vmem>>, vector<32x48xbf16>,
    %c1_51 = arith.constant 1 : index
    %c0_52 = arith.constant 0 : index
    %c0_53 = arith.constant 0 : index
    %c32_54 = arith.constant 32 : index
    %31 = vector.load %arg1[%c1_51, %c0_52, %c0_53, %c32_54] : memref<2x1x36x288xbf16, #tpu.memory_space<vmem>>, vector<1x1x32x48xbf16>
    %32 = vector.shape_cast %31 : vector<1x1x32x48xbf16> to vector<32x48xbf16>
    %c32_55 = arith.constant 32 : index
    %c48_56 = arith.constant 48 : index
    %33 = vector.load %arg13[%c32_55, %c48_56] : memref<256x144xbf16, #tpu.memory_space<vmem>>, vector<32x48xbf16>
    tpu.vector_store %arg13[%c32_55, %c48_56], %32 {strides = array<i32>} : memref<256x144xbf16, #tpu.memory_space<vmem>>, vector<32x48xbf16>,
    %c1_57 = arith.constant 1 : index
    %c0_58 = arith.constant 0 : index
    %c0_59 = arith.constant 0 : index
    %c64_60 = arith.constant 64 : index
    %34 = vector.load %arg1[%c1_57, %c0_58, %c0_59, %c64_60] : memref<2x1x36x288xbf16, #tpu.memory_space<vmem>>, vector<1x1x32x48xbf16>
    %35 = vector.shape_cast %34 : vector<1x1x32x48xbf16> to vector<32x48xbf16>
    %c64_61 = arith.constant 64 : index
    %c48_62 = arith.constant 48 : index
    %36 = vector.load %arg13[%c64_61, %c48_62] : memref<256x144xbf16, #tpu.memory_space<vmem>>, vector<32x48xbf16>
    tpu.vector_store %arg13[%c64_61, %c48_62], %35 {strides = array<i32>} : memref<256x144xbf16, #tpu.memory_space<vmem>>, vector<32x48xbf16>,
    %c1_63 = arith.constant 1 : index
    %c0_64 = arith.constant 0 : index
    %c0_65 = arith.constant 0 : index
    %c96_66 = arith.constant 96 : index
    %37 = vector.load %arg1[%c1_63, %c0_64, %c0_65, %c96_66] : memref<2x1x36x288xbf16, #tpu.memory_space<vmem>>, vector<1x1x32x48xbf16>
    %38 = vector.shape_cast %37 : vector<1x1x32x48xbf16> to vector<32x48xbf16>
    %c96_67 = arith.constant 96 : index
    %c48_68 = arith.constant 48 : index
    %39 = vector.load %arg13[%c96_67, %c48_68] : memref<256x144xbf16, #tpu.memory_space<vmem>>, vector<32x48xbf16>
    tpu.vector_store %arg13[%c96_67, %c48_68], %38 {strides = array<i32>} : memref<256x144xbf16, #tpu.memory_space<vmem>>, vector<32x48xbf16>,
    %c1_69 = arith.constant 1 : index
    %c0_70 = arith.constant 0 : index
    %c0_71 = arith.constant 0 : index
    %c128_72 = arith.constant 128 : index
    %40 = vector.load %arg1[%c1_69, %c0_70, %c0_71, %c128_72] : memref<2x1x36x288xbf16, #tpu.memory_space<vmem>>, vector<1x1x32x48xbf16>
    %41 = vector.shape_cast %40 : vector<1x1x32x48xbf16> to vector<32x48xbf16>
    %c128_73 = arith.constant 128 : index
    %c48_74 = arith.constant 48 : index
    %42 = vector.load %arg13[%c128_73, %c48_74] : memref<256x144xbf16, #tpu.memory_space<vmem>>, vector<32x48xbf16>
    tpu.vector_store %arg13[%c128_73, %c48_74], %41 {strides = array<i32>} : memref<256x144xbf16, #tpu.memory_space<vmem>>, vector<32x48xbf16>,
    %c1_75 = arith.constant 1 : index
    %c0_76 = arith.constant 0 : index
    %c0_77 = arith.constant 0 : index
    %c160_78 = arith.constant 160 : index
    %43 = vector.load %arg1[%c1_75, %c0_76, %c0_77, %c160_78] : memref<2x1x36x288xbf16, #tpu.memory_space<vmem>>, vector<1x1x32x48xbf16>
    %44 = vector.shape_cast %43 : vector<1x1x32x48xbf16> to vector<32x48xbf16>
    %c160_79 = arith.constant 160 : index
    %c48_80 = arith.constant 48 : index
    %45 = vector.load %arg13[%c160_79, %c48_80] : memref<256x144xbf16, #tpu.memory_space<vmem>>, vector<32x48xbf16>
    tpu.vector_store %arg13[%c160_79, %c48_80], %44 {strides = array<i32>} : memref<256x144xbf16, #tpu.memory_space<vmem>>, vector<32x48xbf16>,
    %c1_81 = arith.constant 1 : index
    %c0_82 = arith.constant 0 : index
    %c0_83 = arith.constant 0 : index
    %c192_84 = arith.constant 192 : index
    %46 = vector.load %arg1[%c1_81, %c0_82, %c0_83, %c192_84] : memref<2x1x36x288xbf16, #tpu.memory_space<vmem>>, vector<1x1x32x48xbf16>
    %47 = vector.shape_cast %46 : vector<1x1x32x48xbf16> to vector<32x48xbf16>
    %c192_85 = arith.constant 192 : index
    %c48_86 = arith.constant 48 : index
    %48 = vector.load %arg13[%c192_85, %c48_86] : memref<256x144xbf16, #tpu.memory_space<vmem>>, vector<32x48xbf16>
    tpu.vector_store %arg13[%c192_85, %c48_86], %47 {strides = array<i32>} : memref<256x144xbf16, #tpu.memory_space<vmem>>, vector<32x48xbf16>,
    %c1_87 = arith.constant 1 : index
    %c0_88 = arith.constant 0 : index
    %c0_89 = arith.constant 0 : index
    %c224_90 = arith.constant 224 : index
    %49 = vector.load %arg1[%c1_87, %c0_88, %c0_89, %c224_90] : memref<2x1x36x288xbf16, #tpu.memory_space<vmem>>, vector<1x1x32x48xbf16>
    %50 = vector.shape_cast %49 : vector<1x1x32x48xbf16> to vector<32x48xbf16>
    %c224_91 = arith.constant 224 : index
    %c48_92 = arith.constant 48 : index
    %51 = vector.load %arg13[%c224_91, %c48_92] : memref<256x144xbf16, #tpu.memory_space<vmem>>, vector<32x48xbf16>
    tpu.vector_store %arg13[%c224_91, %c48_92], %50 {strides = array<i32>} : memref<256x144xbf16, #tpu.memory_space<vmem>>, vector<32x48xbf16>,
    %c0_93 = arith.constant 0 : index
    %c0_94 = arith.constant 0 : index
    %c4 = arith.constant 4 : index
    %c0_95 = arith.constant 0 : index
    %52 = vector.load %arg1[%c0_93, %c0_94, %c4, %c0_95] : memref<2x1x36x288xbf16, #tpu.memory_space<vmem>>, vector<1x1x32x48xbf16>
    %53 = vector.shape_cast %52 : vector<1x1x32x48xbf16> to vector<32x48xbf16>
    %c0_96 = arith.constant 0 : index
    %c96_97 = arith.constant 96 : index
    %54 = vector.load %arg13[%c0_96, %c96_97] : memref<256x144xbf16, #tpu.memory_space<vmem>>, vector<32x48xbf16>
    tpu.vector_store %arg13[%c0_96, %c96_97], %53 {strides = array<i32>} : memref<256x144xbf16, #tpu.memory_space<vmem>>, vector<32x48xbf16>,
    %c0_98 = arith.constant 0 : index
    %c0_99 = arith.constant 0 : index
    %c4_100 = arith.constant 4 : index
    %c32_101 = arith.constant 32 : index
    %55 = vector.load %arg1[%c0_98, %c0_99, %c4_100, %c32_101] : memref<2x1x36x288xbf16, #tpu.memory_space<vmem>>, vector<1x1x32x48xbf16>
    %56 = vector.shape_cast %55 : vector<1x1x32x48xbf16> to vector<32x48xbf16>
    %c32_102 = arith.constant 32 : index
    %c96_103 = arith.constant 96 : index
    %57 = vector.load %arg13[%c32_102, %c96_103] : memref<256x144xbf16, #tpu.memory_space<vmem>>, vector<32x48xbf16>
    tpu.vector_store %arg13[%c32_102, %c96_103], %56 {strides = array<i32>} : memref<256x144xbf16, #tpu.memory_space<vmem>>, vector<32x48xbf16>,
    %c0_104 = arith.constant 0 : index
    %c0_105 = arith.constant 0 : index
    %c4_106 = arith.constant 4 : index
    %c64_107 = arith.constant 64 : index
    %58 = vector.load %arg1[%c0_104, %c0_105, %c4_106, %c64_107] : memref<2x1x36x288xbf16, #tpu.memory_space<vmem>>, vector<1x1x32x48xbf16>
    %59 = vector.shape_cast %58 : vector<1x1x32x48xbf16> to vector<32x48xbf16>
    %c64_108 = arith.constant 64 : index
    %c96_109 = arith.constant 96 : index
    %60 = vector.load %arg13[%c64_108, %c96_109] : memref<256x144xbf16, #tpu.memory_space<vmem>>, vector<32x48xbf16>
    tpu.vector_store %arg13[%c64_108, %c96_109], %59 {strides = array<i32>} : memref<256x144xbf16, #tpu.memory_space<vmem>>, vector<32x48xbf16>,
    %c0_110 = arith.constant 0 : index
    %c0_111 = arith.constant 0 : index
    %c4_112 = arith.constant 4 : index
    %c96_113 = arith.constant 96 : index
    %61 = vector.load %arg1[%c0_110, %c0_111, %c4_112, %c96_113] : memref<2x1x36x288xbf16, #tpu.memory_space<vmem>>, vector<1x1x32x48xbf16>
    %62 = vector.shape_cast %61 : vector<1x1x32x48xbf16> to vector<32x48xbf16>
    %c96_114 = arith.constant 96 : index
    %c96_115 = arith.constant 96 : index
    %63 = vector.load %arg13[%c96_114, %c96_115] : memref<256x144xbf16, #tpu.memory_space<vmem>>, vector<32x48xbf16>
    tpu.vector_store %arg13[%c96_114, %c96_115], %62 {strides = array<i32>} : memref<256x144xbf16, #tpu.memory_space<vmem>>, vector<32x48xbf16>,
    %c0_116 = arith.constant 0 : index
    %c0_117 = arith.constant 0 : index
    %c4_118 = arith.constant 4 : index
    %c128_119 = arith.constant 128 : index
    %64 = vector.load %arg1[%c0_116, %c0_117, %c4_118, %c128_119] : memref<2x1x36x288xbf16, #tpu.memory_space<vmem>>, vector<1x1x32x48xbf16>
    %65 = vector.shape_cast %64 : vector<1x1x32x48xbf16> to vector<32x48xbf16>
    %c128_120 = arith.constant 128 : index
    %c96_121 = arith.constant 96 : index
    %66 = vector.load %arg13[%c128_120, %c96_121] : memref<256x144xbf16, #tpu.memory_space<vmem>>, vector<32x48xbf16>
    tpu.vector_store %arg13[%c128_120, %c96_121], %65 {strides = array<i32>} : memref<256x144xbf16, #tpu.memory_space<vmem>>, vector<32x48xbf16>,
    %c0_122 = arith.constant 0 : index
    %c0_123 = arith.constant 0 : index
    %c4_124 = arith.constant 4 : index
    %c160_125 = arith.constant 160 : index
    %67 = vector.load %arg1[%c0_122, %c0_123, %c4_124, %c160_125] : memref<2x1x36x288xbf16, #tpu.memory_space<vmem>>, vector<1x1x32x48xbf16>
    %68 = vector.shape_cast %67 : vector<1x1x32x48xbf16> to vector<32x48xbf16>
    %c160_126 = arith.constant 160 : index
    %c96_127 = arith.constant 96 : index
    %69 = vector.load %arg13[%c160_126, %c96_127] : memref<256x144xbf16, #tpu.memory_space<vmem>>, vector<32x48xbf16>
    tpu.vector_store %arg13[%c160_126, %c96_127], %68 {strides = array<i32>} : memref<256x144xbf16, #tpu.memory_space<vmem>>, vector<32x48xbf16>,
    %c0_128 = arith.constant 0 : index
    %c0_129 = arith.constant 0 : index
    %c4_130 = arith.constant 4 : index
    %c192_131 = arith.constant 192 : index
    %70 = vector.load %arg1[%c0_128, %c0_129, %c4_130, %c192_131] : memref<2x1x36x288xbf16, #tpu.memory_space<vmem>>, vector<1x1x32x48xbf16>
    %71 = vector.shape_cast %70 : vector<1x1x32x48xbf16> to vector<32x48xbf16>
    %c192_132 = arith.constant 192 : index
    %c96_133 = arith.constant 96 : index
    %72 = vector.load %arg13[%c192_132, %c96_133] : memref<256x144xbf16, #tpu.memory_space<vmem>>, vector<32x48xbf16>
    tpu.vector_store %arg13[%c192_132, %c96_133], %71 {strides = array<i32>} : memref<256x144xbf16, #tpu.memory_space<vmem>>, vector<32x48xbf16>,
    %c0_134 = arith.constant 0 : index
    %c0_135 = arith.constant 0 : index
    %c4_136 = arith.constant 4 : index
    %c224_137 = arith.constant 224 : index
    %73 = vector.load %arg1[%c0_134, %c0_135, %c4_136, %c224_137] : memref<2x1x36x288xbf16, #tpu.memory_space<vmem>>, vector<1x1x32x48xbf16>
    %74 = vector.shape_cast %73 : vector<1x1x32x48xbf16> to vector<32x48xbf16>
    %c224_138 = arith.constant 224 : index
    %c96_139 = arith.constant 96 : index
    %75 = vector.load %arg13[%c224_138, %c96_139] : memref<256x144xbf16, #tpu.memory_space<vmem>>, vector<32x48xbf16>
    tpu.vector_store %arg13[%c224_138, %c96_139], %74 {strides = array<i32>} : memref<256x144xbf16, #tpu.memory_space<vmem>>, vector<32x48xbf16>,
    %c0_140 = arith.constant 0 : index
    %c0_141 = arith.constant 0 : index
    %76 = vector.load %arg13[%c0_140, %c0_141] : memref<256x144xbf16, #tpu.memory_space<vmem>>, vector<256x144xbf16>
    %c0_142 = arith.constant 0 : index
    %c0_143 = arith.constant 0 : index
    %77 = vector.load %arg2[%c0_142, %c0_143] : memref<144x32xbf16, #tpu.memory_space<vmem>>, vector<144x32xbf16>
    %cst_144 = arith.constant dense<0.000000e+00> : vector<256x32xf32>
    %78 = tpu.matmul %76, %77, %cst_144 {dimension_numbers = #tpu.dot_dimension_numbers<[1], [0], [0], [1], [0, 0, 1, 1], [], []>} : vector<256x144xbf16>, vector<144x32xbf16>, vector<256x32xf32> -> vector<256x32xf32>
    %c0_145 = arith.constant 0 : index
    %c0_146 = arith.constant 0 : index
    %79 = vector.load %arg3[%c0_145, %c0_146] : memref<1x32xf32, #tpu.memory_space<vmem>>, vector<1x32xf32>
    %80 = vector.broadcast %79 : vector<1x32xf32> to vector<256x32xf32>
    %81 = arith.addf %78, %80 : vector<256x32xf32>
    %82 = arith.truncf %81 : vector<256x32xf32> to vector<256x32xbf16>
    %c0_147 = arith.constant 0 : index
    %c0_148 = arith.constant 0 : index
    %c0_149 = arith.constant 0 : index
    %83 = vector.load %arg8[%c0_147, %c0_148, %c0_149] : memref<1x256x32xbf16, #tpu.memory_space<vmem>>, vector<1x256x32xbf16>
    %84 = vector.shape_cast %83 : vector<1x256x32xbf16> to vector<256x32xbf16>
    %85 = vector.shape_cast %82 : vector<256x32xbf16> to vector<1x256x32xbf16>
    tpu.vector_store %arg8[%c0_147, %c0_148, %c0_149], %85 {strides = array<i32>} : memref<1x256x32xbf16, #tpu.memory_space<vmem>>, vector<1x256x32xbf16>,
    %86 = vector.extract_strided_slice %82 {offsets = [0, 0], sizes = [4, 32], strides = [1, 1]} : vector<256x32xbf16> to vector<4x32xbf16>
    %c1_150 = arith.constant 1 : index
    %c0_151 = arith.constant 0 : index
    %c32_152 = arith.constant 32 : index
    %87 = vector.load %arg11[%c1_150, %c0_151, %c32_152] : memref<2x20x320xbf16, #tpu.memory_space<vmem>>, vector<1x4x32xbf16>
    %88 = vector.shape_cast %87 : vector<1x4x32xbf16> to vector<4x32xbf16>
    %89 = vector.shape_cast %86 : vector<4x32xbf16> to vector<1x4x32xbf16>
    tpu.vector_store %arg11[%c1_150, %c0_151, %c32_152], %89 {strides = array<i32>} : memref<2x20x320xbf16, #tpu.memory_space<vmem>>, vector<1x4x32xbf16>,
    %90 = vector.extract_strided_slice %82 {offsets = [32, 0], sizes = [4, 32], strides = [1, 1]} : vector<256x32xbf16> to vector<4x32xbf16>
    %c1_153 = arith.constant 1 : index
    %c0_154 = arith.constant 0 : index
    %c64_155 = arith.constant 64 : index
    %91 = vector.load %arg11[%c1_153, %c0_154, %c64_155] : memref<2x20x320xbf16, #tpu.memory_space<vmem>>, vector<1x4x32xbf16>
    %92 = vector.shape_cast %91 : vector<1x4x32xbf16> to vector<4x32xbf16>
    %93 = vector.shape_cast %90 : vector<4x32xbf16> to vector<1x4x32xbf16>
    tpu.vector_store %arg11[%c1_153, %c0_154, %c64_155], %93 {strides = array<i32>} : memref<2x20x320xbf16, #tpu.memory_space<vmem>>, vector<1x4x32xbf16>,
    %94 = vector.extract_strided_slice %82 {offsets = [64, 0], sizes = [4, 32], strides = [1, 1]} : vector<256x32xbf16> to vector<4x32xbf16>
    %c1_156 = arith.constant 1 : index
    %c0_157 = arith.constant 0 : index
    %c96_158 = arith.constant 96 : index
    %95 = vector.load %arg11[%c1_156, %c0_157, %c96_158] : memref<2x20x320xbf16, #tpu.memory_space<vmem>>, vector<1x4x32xbf16>
    %96 = vector.shape_cast %95 : vector<1x4x32xbf16> to vector<4x32xbf16>
    %97 = vector.shape_cast %94 : vector<4x32xbf16> to vector<1x4x32xbf16>
    tpu.vector_store %arg11[%c1_156, %c0_157, %c96_158], %97 {strides = array<i32>} : memref<2x20x320xbf16, #tpu.memory_space<vmem>>, vector<1x4x32xbf16>,
    %98 = vector.extract_strided_slice %82 {offsets = [96, 0], sizes = [4, 32], strides = [1, 1]} : vector<256x32xbf16> to vector<4x32xbf16>
    %c1_159 = arith.constant 1 : index
    %c0_160 = arith.constant 0 : index
    %c128_161 = arith.constant 128 : index
    %99 = vector.load %arg11[%c1_159, %c0_160, %c128_161] : memref<2x20x320xbf16, #tpu.memory_space<vmem>>, vector<1x4x32xbf16>
    %100 = vector.shape_cast %99 : vector<1x4x32xbf16> to vector<4x32xbf16>
    %101 = vector.shape_cast %98 : vector<4x32xbf16> to vector<1x4x32xbf16>
    tpu.vector_store %arg11[%c1_159, %c0_160, %c128_161], %101 {strides = array<i32>} : memref<2x20x320xbf16, #tpu.memory_space<vmem>>, vector<1x4x32xbf16>,
    %102 = vector.extract_strided_slice %82 {offsets = [128, 0], sizes = [4, 32], strides = [1, 1]} : vector<256x32xbf16> to vector<4x32xbf16>
    %c1_162 = arith.constant 1 : index
    %c0_163 = arith.constant 0 : index
    %c160_164 = arith.constant 160 : index
    %103 = vector.load %arg11[%c1_162, %c0_163, %c160_164] : memref<2x20x320xbf16, #tpu.memory_space<vmem>>, vector<1x4x32xbf16>
    %104 = vector.shape_cast %103 : vector<1x4x32xbf16> to vector<4x32xbf16>
    %105 = vector.shape_cast %102 : vector<4x32xbf16> to vector<1x4x32xbf16>
    tpu.vector_store %arg11[%c1_162, %c0_163, %c160_164], %105 {strides = array<i32>} : memref<2x20x320xbf16, #tpu.memory_space<vmem>>, vector<1x4x32xbf16>,
    %106 = vector.extract_strided_slice %82 {offsets = [160, 0], sizes = [4, 32], strides = [1, 1]} : vector<256x32xbf16> to vector<4x32xbf16>
    %c1_165 = arith.constant 1 : index
    %c0_166 = arith.constant 0 : index
    %c192_167 = arith.constant 192 : index
    %107 = vector.load %arg11[%c1_165, %c0_166, %c192_167] : memref<2x20x320xbf16, #tpu.memory_space<vmem>>, vector<1x4x32xbf16>
    %108 = vector.shape_cast %107 : vector<1x4x32xbf16> to vector<4x32xbf16>
    %109 = vector.shape_cast %106 : vector<4x32xbf16> to vector<1x4x32xbf16>
    tpu.vector_store %arg11[%c1_165, %c0_166, %c192_167], %109 {strides = array<i32>} : memref<2x20x320xbf16, #tpu.memory_space<vmem>>, vector<1x4x32xbf16>,
    %110 = vector.extract_strided_slice %82 {offsets = [192, 0], sizes = [4, 32], strides = [1, 1]} : vector<256x32xbf16> to vector<4x32xbf16>
    %c1_168 = arith.constant 1 : index
    %c0_169 = arith.constant 0 : index
    %c224_170 = arith.constant 224 : index
    %111 = vector.load %arg11[%c1_168, %c0_169, %c224_170] : memref<2x20x320xbf16, #tpu.memory_space<vmem>>, vector<1x4x32xbf16>
    %112 = vector.shape_cast %111 : vector<1x4x32xbf16> to vector<4x32xbf16>
    %113 = vector.shape_cast %110 : vector<4x32xbf16> to vector<1x4x32xbf16>
    tpu.vector_store %arg11[%c1_168, %c0_169, %c224_170], %113 {strides = array<i32>} : memref<2x20x320xbf16, #tpu.memory_space<vmem>>, vector<1x4x32xbf16>,
    %114 = vector.extract_strided_slice %82 {offsets = [224, 0], sizes = [4, 32], strides = [1, 1]} : vector<256x32xbf16> to vector<4x32xbf16>
    %c1_171 = arith.constant 1 : index
    %c0_172 = arith.constant 0 : index
    %c256 = arith.constant 256 : index
    %115 = vector.load %arg11[%c1_171, %c0_172, %c256] : memref<2x20x320xbf16, #tpu.memory_space<vmem>>, vector<1x4x32xbf16>
    %116 = vector.shape_cast %115 : vector<1x4x32xbf16> to vector<4x32xbf16>
    %117 = vector.shape_cast %114 : vector<4x32xbf16> to vector<1x4x32xbf16>
    tpu.vector_store %arg11[%c1_171, %c0_172, %c256], %117 {strides = array<i32>} : memref<2x20x320xbf16, #tpu.memory_space<vmem>>, vector<1x4x32xbf16>,
    %118 = vector.extract_strided_slice %82 {offsets = [4, 0], sizes = [4, 32], strides = [1, 1]} : vector<256x32xbf16> to vector<4x32xbf16>
    %c0_173 = arith.constant 0 : index
    %c4_174 = arith.constant 4 : index
    %c32_175 = arith.constant 32 : index
    %119 = vector.load %arg11[%c0_173, %c4_174, %c32_175] : memref<2x20x320xbf16, #tpu.memory_space<vmem>>, vector<1x4x32xbf16>
    %120 = vector.shape_cast %119 : vector<1x4x32xbf16> to vector<4x32xbf16>
    %121 = vector.shape_cast %118 : vector<4x32xbf16> to vector<1x4x32xbf16>
    tpu.vector_store %arg11[%c0_173, %c4_174, %c32_175], %121 {strides = array<i32>} : memref<2x20x320xbf16, #tpu.memory_space<vmem>>, vector<1x4x32xbf16>,
    %122 = vector.extract_strided_slice %82 {offsets = [36, 0], sizes = [4, 32], strides = [1, 1]} : vector<256x32xbf16> to vector<4x32xbf16>
    %c0_176 = arith.constant 0 : index
    %c4_177 = arith.constant 4 : index
    %c64_178 = arith.constant 64 : index
    %123 = vector.load %arg11[%c0_176, %c4_177, %c64_178] : memref<2x20x320xbf16, #tpu.memory_space<vmem>>, vector<1x4x32xbf16>
    %124 = vector.shape_cast %123 : vector<1x4x32xbf16> to vector<4x32xbf16>
    %125 = vector.shape_cast %122 : vector<4x32xbf16> to vector<1x4x32xbf16>
    tpu.vector_store %arg11[%c0_176, %c4_177, %c64_178], %125 {strides = array<i32>} : memref<2x20x320xbf16, #tpu.memory_space<vmem>>, vector<1x4x32xbf16>,
    %126 = vector.extract_strided_slice %82 {offsets = [68, 0], sizes = [4, 32], strides = [1, 1]} : vector<256x32xbf16> to vector<4x32xbf16>
    %c0_179 = arith.constant 0 : index
    %c4_180 = arith.constant 4 : index
    %c96_181 = arith.constant 96 : index
    %127 = vector.load %arg11[%c0_179, %c4_180, %c96_181] : memref<2x20x320xbf16, #tpu.memory_space<vmem>>, vector<1x4x32xbf16>
    %128 = vector.shape_cast %127 : vector<1x4x32xbf16> to vector<4x32xbf16>
    %129 = vector.shape_cast %126 : vector<4x32xbf16> to vector<1x4x32xbf16>
    tpu.vector_store %arg11[%c0_179, %c4_180, %c96_181], %129 {strides = array<i32>} : memref<2x20x320xbf16, #tpu.memory_space<vmem>>, vector<1x4x32xbf16>,
    %130 = vector.extract_strided_slice %82 {offsets = [100, 0], sizes = [4, 32], strides = [1, 1]} : vector<256x32xbf16> to vector<4x32xbf16>
    %c0_182 = arith.constant 0 : index
    %c4_183 = arith.constant 4 : index
    %c128_184 = arith.constant 128 : index
    %131 = vector.load %arg11[%c0_182, %c4_183, %c128_184] : memref<2x20x320xbf16, #tpu.memory_space<vmem>>, vector<1x4x32xbf16>
    %132 = vector.shape_cast %131 : vector<1x4x32xbf16> to vector<4x32xbf16>
    %133 = vector.shape_cast %130 : vector<4x32xbf16> to vector<1x4x32xbf16>
    tpu.vector_store %arg11[%c0_182, %c4_183, %c128_184], %133 {strides = array<i32>} : memref<2x20x320xbf16, #tpu.memory_space<vmem>>, vector<1x4x32xbf16>,
    %134 = vector.extract_strided_slice %82 {offsets = [132, 0], sizes = [4, 32], strides = [1, 1]} : vector<256x32xbf16> to vector<4x32xbf16>
    %c0_185 = arith.constant 0 : index
    %c4_186 = arith.constant 4 : index
    %c160_187 = arith.constant 160 : index
    %135 = vector.load %arg11[%c0_185, %c4_186, %c160_187] : memref<2x20x320xbf16, #tpu.memory_space<vmem>>, vector<1x4x32xbf16>
    %136 = vector.shape_cast %135 : vector<1x4x32xbf16> to vector<4x32xbf16>
    %137 = vector.shape_cast %134 : vector<4x32xbf16> to vector<1x4x32xbf16>
    tpu.vector_store %arg11[%c0_185, %c4_186, %c160_187], %137 {strides = array<i32>} : memref<2x20x320xbf16, #tpu.memory_space<vmem>>, vector<1x4x32xbf16>,
    %138 = vector.extract_strided_slice %82 {offsets = [164, 0], sizes = [4, 32], strides = [1, 1]} : vector<256x32xbf16> to vector<4x32xbf16>
    %c0_188 = arith.constant 0 : index
    %c4_189 = arith.constant 4 : index
    %c192_190 = arith.constant 192 : index
    %139 = vector.load %arg11[%c0_188, %c4_189, %c192_190] : memref<2x20x320xbf16, #tpu.memory_space<vmem>>, vector<1x4x32xbf16>
    %140 = vector.shape_cast %139 : vector<1x4x32xbf16> to vector<4x32xbf16>
    %141 = vector.shape_cast %138 : vector<4x32xbf16> to vector<1x4x32xbf16>
    tpu.vector_store %arg11[%c0_188, %c4_189, %c192_190], %141 {strides = array<i32>} : memref<2x20x320xbf16, #tpu.memory_space<vmem>>, vector<1x4x32xbf16>,
    %142 = vector.extract_strided_slice %82 {offsets = [196, 0], sizes = [4, 32], strides = [1, 1]} : vector<256x32xbf16> to vector<4x32xbf16>
    %c0_191 = arith.constant 0 : index
    %c4_192 = arith.constant 4 : index
    %c224_193 = arith.constant 224 : index
    %143 = vector.load %arg11[%c0_191, %c4_192, %c224_193] : memref<2x20x320xbf16, #tpu.memory_space<vmem>>, vector<1x4x32xbf16>
    %144 = vector.shape_cast %143 : vector<1x4x32xbf16> to vector<4x32xbf16>
    %145 = vector.shape_cast %142 : vector<4x32xbf16> to vector<1x4x32xbf16>
    tpu.vector_store %arg11[%c0_191, %c4_192, %c224_193], %145 {strides = array<i32>} : memref<2x20x320xbf16, #tpu.memory_space<vmem>>, vector<1x4x32xbf16>,
    %146 = vector.extract_strided_slice %82 {offsets = [228, 0], sizes = [4, 32], strides = [1, 1]} : vector<256x32xbf16> to vector<4x32xbf16>
    %c0_194 = arith.constant 0 : index
    %c4_195 = arith.constant 4 : index
    %c256_196 = arith.constant 256 : index
    %147 = vector.load %arg11[%c0_194, %c4_195, %c256_196] : memref<2x20x320xbf16, #tpu.memory_space<vmem>>, vector<1x4x32xbf16>
    %148 = vector.shape_cast %147 : vector<1x4x32xbf16> to vector<4x32xbf16>
    %149 = vector.shape_cast %146 : vector<4x32xbf16> to vector<1x4x32xbf16>
    tpu.vector_store %arg11[%c0_194, %c4_195, %c256_196], %149 {strides = array<i32>} : memref<2x20x320xbf16, #tpu.memory_space<vmem>>, vector<1x4x32xbf16>,
    %150 = vector.extract_strided_slice %82 {offsets = [8, 0], sizes = [4, 32], strides = [1, 1]} : vector<256x32xbf16> to vector<4x32xbf16>
    %c1_197 = arith.constant 1 : index
    %c4_198 = arith.constant 4 : index
    %c32_199 = arith.constant 32 : index
    %151 = vector.load %arg11[%c1_197, %c4_198, %c32_199] : memref<2x20x320xbf16, #tpu.memory_space<vmem>>, vector<1x4x32xbf16>
    %152 = vector.shape_cast %151 : vector<1x4x32xbf16> to vector<4x32xbf16>
    %153 = vector.shape_cast %150 : vector<4x32xbf16> to vector<1x4x32xbf16>
    tpu.vector_store %arg11[%c1_197, %c4_198, %c32_199], %153 {strides = array<i32>} : memref<2x20x320xbf16, #tpu.memory_space<vmem>>, vector<1x4x32xbf16>,
    %154 = vector.extract_strided_slice %82 {offsets = [40, 0], sizes = [4, 32], strides = [1, 1]} : vector<256x32xbf16> to vector<4x32xbf16>
    %c1_200 = arith.constant 1 : index
    %c4_201 = arith.constant 4 : index
    %c64_202 = arith.constant 64 : index
    %155 = vector.load %arg11[%c1_200, %c4_201, %c64_202] : memref<2x20x320xbf16, #tpu.memory_space<vmem>>, vector<1x4x32xbf16>
    %156 = vector.shape_cast %155 : vector<1x4x32xbf16> to vector<4x32xbf16>
    %157 = vector.shape_cast %154 : vector<4x32xbf16> to vector<1x4x32xbf16>
    tpu.vector_store %arg11[%c1_200, %c4_201, %c64_202], %157 {strides = array<i32>} : memref<2x20x320xbf16, #tpu.memory_space<vmem>>, vector<1x4x32xbf16>,
    %158 = vector.extract_strided_slice %82 {offsets = [72, 0], sizes = [4, 32], strides = [1, 1]} : vector<256x32xbf16> to vector<4x32xbf16>
    %c1_203 = arith.constant 1 : index
    %c4_204 = arith.constant 4 : index
    %c96_205 = arith.constant 96 : index
    %159 = vector.load %arg11[%c1_203, %c4_204, %c96_205] : memref<2x20x320xbf16, #tpu.memory_space<vmem>>, vector<1x4x32xbf16>
    %160 = vector.shape_cast %159 : vector<1x4x32xbf16> to vector<4x32xbf16>
    %161 = vector.shape_cast %158 : vector<4x32xbf16> to vector<1x4x32xbf16>
    tpu.vector_store %arg11[%c1_203, %c4_204, %c96_205], %161 {strides = array<i32>} : memref<2x20x320xbf16, #tpu.memory_space<vmem>>, vector<1x4x32xbf16>,
    %162 = vector.extract_strided_slice %82 {offsets = [104, 0], sizes = [4, 32], strides = [1, 1]} : vector<256x32xbf16> to vector<4x32xbf16>
    %c1_206 = arith.constant 1 : index
    %c4_207 = arith.constant 4 : index
    %c128_208 = arith.constant 128 : index
    %163 = vector.load %arg11[%c1_206, %c4_207, %c128_208] : memref<2x20x320xbf16, #tpu.memory_space<vmem>>, vector<1x4x32xbf16>
    %164 = vector.shape_cast %163 : vector<1x4x32xbf16> to vector<4x32xbf16>
    %165 = vector.shape_cast %162 : vector<4x32xbf16> to vector<1x4x32xbf16>
    tpu.vector_store %arg11[%c1_206, %c4_207, %c128_208], %165 {strides = array<i32>} : memref<2x20x320xbf16, #tpu.memory_space<vmem>>, vector<1x4x32xbf16>,
    %166 = vector.extract_strided_slice %82 {offsets = [136, 0], sizes = [4, 32], strides = [1, 1]} : vector<256x32xbf16> to vector<4x32xbf16>
    %c1_209 = arith.constant 1 : index
    %c4_210 = arith.constant 4 : index
    %c160_211 = arith.constant 160 : index
    %167 = vector.load %arg11[%c1_209, %c4_210, %c160_211] : memref<2x20x320xbf16, #tpu.memory_space<vmem>>, vector<1x4x32xbf16>
    %168 = vector.shape_cast %167 : vector<1x4x32xbf16> to vector<4x32xbf16>
    %169 = vector.shape_cast %166 : vector<4x32xbf16> to vector<1x4x32xbf16>
    tpu.vector_store %arg11[%c1_209, %c4_210, %c160_211], %169 {strides = array<i32>} : memref<2x20x320xbf16, #tpu.memory_space<vmem>>, vector<1x4x32xbf16>,
    %170 = vector.extract_strided_slice %82 {offsets = [168, 0], sizes = [4, 32], strides = [1, 1]} : vector<256x32xbf16> to vector<4x32xbf16>
    %c1_212 = arith.constant 1 : index
    %c4_213 = arith.constant 4 : index
    %c192_214 = arith.constant 192 : index
    %171 = vector.load %arg11[%c1_212, %c4_213, %c192_214] : memref<2x20x320xbf16, #tpu.memory_space<vmem>>, vector<1x4x32xbf16>
    %172 = vector.shape_cast %171 : vector<1x4x32xbf16> to vector<4x32xbf16>
    %173 = vector.shape_cast %170 : vector<4x32xbf16> to vector<1x4x32xbf16>
    tpu.vector_store %arg11[%c1_212, %c4_213, %c192_214], %173 {strides = array<i32>} : memref<2x20x320xbf16, #tpu.memory_space<vmem>>, vector<1x4x32xbf16>,
    %174 = vector.extract_strided_slice %82 {offsets = [200, 0], sizes = [4, 32], strides = [1, 1]} : vector<256x32xbf16> to vector<4x32xbf16>
    %c1_215 = arith.constant 1 : index
    %c4_216 = arith.constant 4 : index
    %c224_217 = arith.constant 224 : index
    %175 = vector.load %arg11[%c1_215, %c4_216, %c224_217] : memref<2x20x320xbf16, #tpu.memory_space<vmem>>, vector<1x4x32xbf16>
    %176 = vector.shape_cast %175 : vector<1x4x32xbf16> to vector<4x32xbf16>
    %177 = vector.shape_cast %174 : vector<4x32xbf16> to vector<1x4x32xbf16>
    tpu.vector_store %arg11[%c1_215, %c4_216, %c224_217], %177 {strides = array<i32>} : memref<2x20x320xbf16, #tpu.memory_space<vmem>>, vector<1x4x32xbf16>,
    %178 = vector.extract_strided_slice %82 {offsets = [232, 0], sizes = [4, 32], strides = [1, 1]} : vector<256x32xbf16> to vector<4x32xbf16>
    %c1_218 = arith.constant 1 : index
    %c4_219 = arith.constant 4 : index
    %c256_220 = arith.constant 256 : index
    %179 = vector.load %arg11[%c1_218, %c4_219, %c256_220] : memref<2x20x320xbf16, #tpu.memory_space<vmem>>, vector<1x4x32xbf16>
    %180 = vector.shape_cast %179 : vector<1x4x32xbf16> to vector<4x32xbf16>
    %181 = vector.shape_cast %178 : vector<4x32xbf16> to vector<1x4x32xbf16>
    tpu.vector_store %arg11[%c1_218, %c4_219, %c256_220], %181 {strides = array<i32>} : memref<2x20x320xbf16, #tpu.memory_space<vmem>>, vector<1x4x32xbf16>,
    %182 = vector.extract_strided_slice %82 {offsets = [12, 0], sizes = [4, 32], strides = [1, 1]} : vector<256x32xbf16> to vector<4x32xbf16>
    %c0_221 = arith.constant 0 : index
    %c8 = arith.constant 8 : index
    %c32_222 = arith.constant 32 : index
    %183 = vector.load %arg11[%c0_221, %c8, %c32_222] : memref<2x20x320xbf16, #tpu.memory_space<vmem>>, vector<1x4x32xbf16>
    %184 = vector.shape_cast %183 : vector<1x4x32xbf16> to vector<4x32xbf16>
    %185 = vector.shape_cast %182 : vector<4x32xbf16> to vector<1x4x32xbf16>
    tpu.vector_store %arg11[%c0_221, %c8, %c32_222], %185 {strides = array<i32>} : memref<2x20x320xbf16, #tpu.memory_space<vmem>>, vector<1x4x32xbf16>,
    %186 = vector.extract_strided_slice %82 {offsets = [44, 0], sizes = [4, 32], strides = [1, 1]} : vector<256x32xbf16> to vector<4x32xbf16>
    %c0_223 = arith.constant 0 : index
    %c8_224 = arith.constant 8 : index
    %c64_225 = arith.constant 64 : index
    %187 = vector.load %arg11[%c0_223, %c8_224, %c64_225] : memref<2x20x320xbf16, #tpu.memory_space<vmem>>, vector<1x4x32xbf16>
    %188 = vector.shape_cast %187 : vector<1x4x32xbf16> to vector<4x32xbf16>
    %189 = vector.shape_cast %186 : vector<4x32xbf16> to vector<1x4x32xbf16>
    tpu.vector_store %arg11[%c0_223, %c8_224, %c64_225], %189 {strides = array<i32>} : memref<2x20x320xbf16, #tpu.memory_space<vmem>>, vector<1x4x32xbf16>,
    %190 = vector.extract_strided_slice %82 {offsets = [76, 0], sizes = [4, 32], strides = [1, 1]} : vector<256x32xbf16> to vector<4x32xbf16>
    %c0_226 = arith.constant 0 : index
    %c8_227 = arith.constant 8 : index
    %c96_228 = arith.constant 96 : index
    %191 = vector.load %arg11[%c0_226, %c8_227, %c96_228] : memref<2x20x320xbf16, #tpu.memory_space<vmem>>, vector<1x4x32xbf16>
    %192 = vector.shape_cast %191 : vector<1x4x32xbf16> to vector<4x32xbf16>
    %193 = vector.shape_cast %190 : vector<4x32xbf16> to vector<1x4x32xbf16>
    tpu.vector_store %arg11[%c0_226, %c8_227, %c96_228], %193 {strides = array<i32>} : memref<2x20x320xbf16, #tpu.memory_space<vmem>>, vector<1x4x32xbf16>,
    %194 = vector.extract_strided_slice %82 {offsets = [108, 0], sizes = [4, 32], strides = [1, 1]} : vector<256x32xbf16> to vector<4x32xbf16>
    %c0_229 = arith.constant 0 : index
    %c8_230 = arith.constant 8 : index
    %c128_231 = arith.constant 128 : index
    %195 = vector.load %arg11[%c0_229, %c8_230, %c128_231] : memref<2x20x320xbf16, #tpu.memory_space<vmem>>, vector<1x4x32xbf16>
    %196 = vector.shape_cast %195 : vector<1x4x32xbf16> to vector<4x32xbf16>
    %197 = vector.shape_cast %194 : vector<4x32xbf16> to vector<1x4x32xbf16>
    tpu.vector_store %arg11[%c0_229, %c8_230, %c128_231], %197 {strides = array<i32>} : memref<2x20x320xbf16, #tpu.memory_space<vmem>>, vector<1x4x32xbf16>,
    %198 = vector.extract_strided_slice %82 {offsets = [140, 0], sizes = [4, 32], strides = [1, 1]} : vector<256x32xbf16> to vector<4x32xbf16>
    %c0_232 = arith.constant 0 : index
    %c8_233 = arith.constant 8 : index
    %c160_234 = arith.constant 160 : index
    %199 = vector.load %arg11[%c0_232, %c8_233, %c160_234] : memref<2x20x320xbf16, #tpu.memory_space<vmem>>, vector<1x4x32xbf16>
    %200 = vector.shape_cast %199 : vector<1x4x32xbf16> to vector<4x32xbf16>
    %201 = vector.shape_cast %198 : vector<4x32xbf16> to vector<1x4x32xbf16>
    tpu.vector_store %arg11[%c0_232, %c8_233, %c160_234], %201 {strides = array<i32>} : memref<2x20x320xbf16, #tpu.memory_space<vmem>>, vector<1x4x32xbf16>,
    %202 = vector.extract_strided_slice %82 {offsets = [172, 0], sizes = [4, 32], strides = [1, 1]} : vector<256x32xbf16> to vector<4x32xbf16>
    %c0_235 = arith.constant 0 : index
    %c8_236 = arith.constant 8 : index
    %c192_237 = arith.constant 192 : index
    %203 = vector.load %arg11[%c0_235, %c8_236, %c192_237] : memref<2x20x320xbf16, #tpu.memory_space<vmem>>, vector<1x4x32xbf16>
    %204 = vector.shape_cast %203 : vector<1x4x32xbf16> to vector<4x32xbf16>
    %205 = vector.shape_cast %202 : vector<4x32xbf16> to vector<1x4x32xbf16>
    tpu.vector_store %arg11[%c0_235, %c8_236, %c192_237], %205 {strides = array<i32>} : memref<2x20x320xbf16, #tpu.memory_space<vmem>>, vector<1x4x32xbf16>,
    %206 = vector.extract_strided_slice %82 {offsets = [204, 0], sizes = [4, 32], strides = [1, 1]} : vector<256x32xbf16> to vector<4x32xbf16>
    %c0_238 = arith.constant 0 : index
    %c8_239 = arith.constant 8 : index
    %c224_240 = arith.constant 224 : index
    %207 = vector.load %arg11[%c0_238, %c8_239, %c224_240] : memref<2x20x320xbf16, #tpu.memory_space<vmem>>, vector<1x4x32xbf16>
    %208 = vector.shape_cast %207 : vector<1x4x32xbf16> to vector<4x32xbf16>
    %209 = vector.shape_cast %206 : vector<4x32xbf16> to vector<1x4x32xbf16>
    tpu.vector_store %arg11[%c0_238, %c8_239, %c224_240], %209 {strides = array<i32>} : memref<2x20x320xbf16, #tpu.memory_space<vmem>>, vector<1x4x32xbf16>,
    %210 = vector.extract_strided_slice %82 {offsets = [236, 0], sizes = [4, 32], strides = [1, 1]} : vector<256x32xbf16> to vector<4x32xbf16>
    %c0_241 = arith.constant 0 : index
    %c8_242 = arith.constant 8 : index
    %c256_243 = arith.constant 256 : index
    %211 = vector.load %arg11[%c0_241, %c8_242, %c256_243] : memref<2x20x320xbf16, #tpu.memory_space<vmem>>, vector<1x4x32xbf16>
    %212 = vector.shape_cast %211 : vector<1x4x32xbf16> to vector<4x32xbf16>
    %213 = vector.shape_cast %210 : vector<4x32xbf16> to vector<1x4x32xbf16>
    tpu.vector_store %arg11[%c0_241, %c8_242, %c256_243], %213 {strides = array<i32>} : memref<2x20x320xbf16, #tpu.memory_space<vmem>>, vector<1x4x32xbf16>,
    %214 = vector.extract_strided_slice %82 {offsets = [16, 0], sizes = [4, 32], strides = [1, 1]} : vector<256x32xbf16> to vector<4x32xbf16>
    %c1_244 = arith.constant 1 : index
    %c8_245 = arith.constant 8 : index
    %c32_246 = arith.constant 32 : index
    %215 = vector.load %arg11[%c1_244, %c8_245, %c32_246] : memref<2x20x320xbf16, #tpu.memory_space<vmem>>, vector<1x4x32xbf16>
    %216 = vector.shape_cast %215 : vector<1x4x32xbf16> to vector<4x32xbf16>
    %217 = vector.shape_cast %214 : vector<4x32xbf16> to vector<1x4x32xbf16>
    tpu.vector_store %arg11[%c1_244, %c8_245, %c32_246], %217 {strides = array<i32>} : memref<2x20x320xbf16, #tpu.memory_space<vmem>>, vector<1x4x32xbf16>,
    %218 = vector.extract_strided_slice %82 {offsets = [48, 0], sizes = [4, 32], strides = [1, 1]} : vector<256x32xbf16> to vector<4x32xbf16>
    %c1_247 = arith.constant 1 : index
    %c8_248 = arith.constant 8 : index
    %c64_249 = arith.constant 64 : index
    %219 = vector.load %arg11[%c1_247, %c8_248, %c64_249] : memref<2x20x320xbf16, #tpu.memory_space<vmem>>, vector<1x4x32xbf16>
    %220 = vector.shape_cast %219 : vector<1x4x32xbf16> to vector<4x32xbf16>
    %221 = vector.shape_cast %218 : vector<4x32xbf16> to vector<1x4x32xbf16>
    tpu.vector_store %arg11[%c1_247, %c8_248, %c64_249], %221 {strides = array<i32>} : memref<2x20x320xbf16, #tpu.memory_space<vmem>>, vector<1x4x32xbf16>,
    %222 = vector.extract_strided_slice %82 {offsets = [80, 0], sizes = [4, 32], strides = [1, 1]} : vector<256x32xbf16> to vector<4x32xbf16>
    %c1_250 = arith.constant 1 : index
    %c8_251 = arith.constant 8 : index
    %c96_252 = arith.constant 96 : index
    %223 = vector.load %arg11[%c1_250, %c8_251, %c96_252] : memref<2x20x320xbf16, #tpu.memory_space<vmem>>, vector<1x4x32xbf16>
    %224 = vector.shape_cast %223 : vector<1x4x32xbf16> to vector<4x32xbf16>
    %225 = vector.shape_cast %222 : vector<4x32xbf16> to vector<1x4x32xbf16>
    tpu.vector_store %arg11[%c1_250, %c8_251, %c96_252], %225 {strides = array<i32>} : memref<2x20x320xbf16, #tpu.memory_space<vmem>>, vector<1x4x32xbf16>,
    %226 = vector.extract_strided_slice %82 {offsets = [112, 0], sizes = [4, 32], strides = [1, 1]} : vector<256x32xbf16> to vector<4x32xbf16>
    %c1_253 = arith.constant 1 : index
    %c8_254 = arith.constant 8 : index
    %c128_255 = arith.constant 128 : index
    %227 = vector.load %arg11[%c1_253, %c8_254, %c128_255] : memref<2x20x320xbf16, #tpu.memory_space<vmem>>, vector<1x4x32xbf16>
    %228 = vector.shape_cast %227 : vector<1x4x32xbf16> to vector<4x32xbf16>
    %229 = vector.shape_cast %226 : vector<4x32xbf16> to vector<1x4x32xbf16>
    tpu.vector_store %arg11[%c1_253, %c8_254, %c128_255], %229 {strides = array<i32>} : memref<2x20x320xbf16, #tpu.memory_space<vmem>>, vector<1x4x32xbf16>,
    %230 = vector.extract_strided_slice %82 {offsets = [144, 0], sizes = [4, 32], strides = [1, 1]} : vector<256x32xbf16> to vector<4x32xbf16>
    %c1_256 = arith.constant 1 : index
    %c8_257 = arith.constant 8 : index
    %c160_258 = arith.constant 160 : index
    %231 = vector.load %arg11[%c1_256, %c8_257, %c160_258] : memref<2x20x320xbf16, #tpu.memory_space<vmem>>, vector<1x4x32xbf16>
    %232 = vector.shape_cast %231 : vector<1x4x32xbf16> to vector<4x32xbf16>
    %233 = vector.shape_cast %230 : vector<4x32xbf16> to vector<1x4x32xbf16>
    tpu.vector_store %arg11[%c1_256, %c8_257, %c160_258], %233 {strides = array<i32>} : memref<2x20x320xbf16, #tpu.memory_space<vmem>>, vector<1x4x32xbf16>,
    %234 = vector.extract_strided_slice %82 {offsets = [176, 0], sizes = [4, 32], strides = [1, 1]} : vector<256x32xbf16> to vector<4x32xbf16>
    %c1_259 = arith.constant 1 : index
    %c8_260 = arith.constant 8 : index
    %c192_261 = arith.constant 192 : index
    %235 = vector.load %arg11[%c1_259, %c8_260, %c192_261] : memref<2x20x320xbf16, #tpu.memory_space<vmem>>, vector<1x4x32xbf16>
    %236 = vector.shape_cast %235 : vector<1x4x32xbf16> to vector<4x32xbf16>
    %237 = vector.shape_cast %234 : vector<4x32xbf16> to vector<1x4x32xbf16>
    tpu.vector_store %arg11[%c1_259, %c8_260, %c192_261], %237 {strides = array<i32>} : memref<2x20x320xbf16, #tpu.memory_space<vmem>>, vector<1x4x32xbf16>,
    %238 = vector.extract_strided_slice %82 {offsets = [208, 0], sizes = [4, 32], strides = [1, 1]} : vector<256x32xbf16> to vector<4x32xbf16>
    %c1_262 = arith.constant 1 : index
    %c8_263 = arith.constant 8 : index
    %c224_264 = arith.constant 224 : index
    %239 = vector.load %arg11[%c1_262, %c8_263, %c224_264] : memref<2x20x320xbf16, #tpu.memory_space<vmem>>, vector<1x4x32xbf16>
    %240 = vector.shape_cast %239 : vector<1x4x32xbf16> to vector<4x32xbf16>
    %241 = vector.shape_cast %238 : vector<4x32xbf16> to vector<1x4x32xbf16>
    tpu.vector_store %arg11[%c1_262, %c8_263, %c224_264], %241 {strides = array<i32>} : memref<2x20x320xbf16, #tpu.memory_space<vmem>>, vector<1x4x32xbf16>,
    %242 = vector.extract_strided_slice %82 {offsets = [240, 0], sizes = [4, 32], strides = [1, 1]} : vector<256x32xbf16> to vector<4x32xbf16>
    %c1_265 = arith.constant 1 : index
    %c8_266 = arith.constant 8 : index
    %c256_267 = arith.constant 256 : index
    %243 = vector.load %arg11[%c1_265, %c8_266, %c256_267] : memref<2x20x320xbf16, #tpu.memory_space<vmem>>, vector<1x4x32xbf16>
    %244 = vector.shape_cast %243 : vector<1x4x32xbf16> to vector<4x32xbf16>
    %245 = vector.shape_cast %242 : vector<4x32xbf16> to vector<1x4x32xbf16>
    tpu.vector_store %arg11[%c1_265, %c8_266, %c256_267], %245 {strides = array<i32>} : memref<2x20x320xbf16, #tpu.memory_space<vmem>>, vector<1x4x32xbf16>,
    %246 = vector.extract_strided_slice %82 {offsets = [20, 0], sizes = [4, 32], strides = [1, 1]} : vector<256x32xbf16> to vector<4x32xbf16>
    %c0_268 = arith.constant 0 : index
    %c12 = arith.constant 12 : index
    %c32_269 = arith.constant 32 : index
    %247 = vector.load %arg11[%c0_268, %c12, %c32_269] : memref<2x20x320xbf16, #tpu.memory_space<vmem>>, vector<1x4x32xbf16>
    %248 = vector.shape_cast %247 : vector<1x4x32xbf16> to vector<4x32xbf16>
    %249 = vector.shape_cast %246 : vector<4x32xbf16> to vector<1x4x32xbf16>
    tpu.vector_store %arg11[%c0_268, %c12, %c32_269], %249 {strides = array<i32>} : memref<2x20x320xbf16, #tpu.memory_space<vmem>>, vector<1x4x32xbf16>,
    %250 = vector.extract_strided_slice %82 {offsets = [52, 0], sizes = [4, 32], strides = [1, 1]} : vector<256x32xbf16> to vector<4x32xbf16>
    %c0_270 = arith.constant 0 : index
    %c12_271 = arith.constant 12 : index
    %c64_272 = arith.constant 64 : index
    %251 = vector.load %arg11[%c0_270, %c12_271, %c64_272] : memref<2x20x320xbf16, #tpu.memory_space<vmem>>, vector<1x4x32xbf16>
    %252 = vector.shape_cast %251 : vector<1x4x32xbf16> to vector<4x32xbf16>
    %253 = vector.shape_cast %250 : vector<4x32xbf16> to vector<1x4x32xbf16>
    tpu.vector_store %arg11[%c0_270, %c12_271, %c64_272], %253 {strides = array<i32>} : memref<2x20x320xbf16, #tpu.memory_space<vmem>>, vector<1x4x32xbf16>,
    %254 = vector.extract_strided_slice %82 {offsets = [84, 0], sizes = [4, 32], strides = [1, 1]} : vector<256x32xbf16> to vector<4x32xbf16>
    %c0_273 = arith.constant 0 : index
    %c12_274 = arith.constant 12 : index
    %c96_275 = arith.constant 96 : index
    %255 = vector.load %arg11[%c0_273, %c12_274, %c96_275] : memref<2x20x320xbf16, #tpu.memory_space<vmem>>, vector<1x4x32xbf16>
    %256 = vector.shape_cast %255 : vector<1x4x32xbf16> to vector<4x32xbf16>
    %257 = vector.shape_cast %254 : vector<4x32xbf16> to vector<1x4x32xbf16>
    tpu.vector_store %arg11[%c0_273, %c12_274, %c96_275], %257 {strides = array<i32>} : memref<2x20x320xbf16, #tpu.memory_space<vmem>>, vector<1x4x32xbf16>,
    %258 = vector.extract_strided_slice %82 {offsets = [116, 0], sizes = [4, 32], strides = [1, 1]} : vector<256x32xbf16> to vector<4x32xbf16>
    %c0_276 = arith.constant 0 : index
    %c12_277 = arith.constant 12 : index
    %c128_278 = arith.constant 128 : index
    %259 = vector.load %arg11[%c0_276, %c12_277, %c128_278] : memref<2x20x320xbf16, #tpu.memory_space<vmem>>, vector<1x4x32xbf16>
    %260 = vector.shape_cast %259 : vector<1x4x32xbf16> to vector<4x32xbf16>
    %261 = vector.shape_cast %258 : vector<4x32xbf16> to vector<1x4x32xbf16>
    tpu.vector_store %arg11[%c0_276, %c12_277, %c128_278], %261 {strides = array<i32>} : memref<2x20x320xbf16, #tpu.memory_space<vmem>>, vector<1x4x32xbf16>,
    %262 = vector.extract_strided_slice %82 {offsets = [148, 0], sizes = [4, 32], strides = [1, 1]} : vector<256x32xbf16> to vector<4x32xbf16>
    %c0_279 = arith.constant 0 : index
    %c12_280 = arith.constant 12 : index
    %c160_281 = arith.constant 160 : index
    %263 = vector.load %arg11[%c0_279, %c12_280, %c160_281] : memref<2x20x320xbf16, #tpu.memory_space<vmem>>, vector<1x4x32xbf16>
    %264 = vector.shape_cast %263 : vector<1x4x32xbf16> to vector<4x32xbf16>
    %265 = vector.shape_cast %262 : vector<4x32xbf16> to vector<1x4x32xbf16>
    tpu.vector_store %arg11[%c0_279, %c12_280, %c160_281], %265 {strides = array<i32>} : memref<2x20x320xbf16, #tpu.memory_space<vmem>>, vector<1x4x32xbf16>,
    %266 = vector.extract_strided_slice %82 {offsets = [180, 0], sizes = [4, 32], strides = [1, 1]} : vector<256x32xbf16> to vector<4x32xbf16>
    %c0_282 = arith.constant 0 : index
    %c12_283 = arith.constant 12 : index
    %c192_284 = arith.constant 192 : index
    %267 = vector.load %arg11[%c0_282, %c12_283, %c192_284] : memref<2x20x320xbf16, #tpu.memory_space<vmem>>, vector<1x4x32xbf16>
    %268 = vector.shape_cast %267 : vector<1x4x32xbf16> to vector<4x32xbf16>
    %269 = vector.shape_cast %266 : vector<4x32xbf16> to vector<1x4x32xbf16>
    tpu.vector_store %arg11[%c0_282, %c12_283, %c192_284], %269 {strides = array<i32>} : memref<2x20x320xbf16, #tpu.memory_space<vmem>>, vector<1x4x32xbf16>,
    %270 = vector.extract_strided_slice %82 {offsets = [212, 0], sizes = [4, 32], strides = [1, 1]} : vector<256x32xbf16> to vector<4x32xbf16>
    %c0_285 = arith.constant 0 : index
    %c12_286 = arith.constant 12 : index
    %c224_287 = arith.constant 224 : index
    %271 = vector.load %arg11[%c0_285, %c12_286, %c224_287] : memref<2x20x320xbf16, #tpu.memory_space<vmem>>, vector<1x4x32xbf16>
    %272 = vector.shape_cast %271 : vector<1x4x32xbf16> to vector<4x32xbf16>
    %273 = vector.shape_cast %270 : vector<4x32xbf16> to vector<1x4x32xbf16>
    tpu.vector_store %arg11[%c0_285, %c12_286, %c224_287], %273 {strides = array<i32>} : memref<2x20x320xbf16, #tpu.memory_space<vmem>>, vector<1x4x32xbf16>,
    %274 = vector.extract_strided_slice %82 {offsets = [244, 0], sizes = [4, 32], strides = [1, 1]} : vector<256x32xbf16> to vector<4x32xbf16>
    %c0_288 = arith.constant 0 : index
    %c12_289 = arith.constant 12 : index
    %c256_290 = arith.constant 256 : index
    %275 = vector.load %arg11[%c0_288, %c12_289, %c256_290] : memref<2x20x320xbf16, #tpu.memory_space<vmem>>, vector<1x4x32xbf16>
    %276 = vector.shape_cast %275 : vector<1x4x32xbf16> to vector<4x32xbf16>
    %277 = vector.shape_cast %274 : vector<4x32xbf16> to vector<1x4x32xbf16>
    tpu.vector_store %arg11[%c0_288, %c12_289, %c256_290], %277 {strides = array<i32>} : memref<2x20x320xbf16, #tpu.memory_space<vmem>>, vector<1x4x32xbf16>,
    %278 = vector.extract_strided_slice %82 {offsets = [24, 0], sizes = [4, 32], strides = [1, 1]} : vector<256x32xbf16> to vector<4x32xbf16>
    %c1_291 = arith.constant 1 : index
    %c12_292 = arith.constant 12 : index
    %c32_293 = arith.constant 32 : index
    %279 = vector.load %arg11[%c1_291, %c12_292, %c32_293] : memref<2x20x320xbf16, #tpu.memory_space<vmem>>, vector<1x4x32xbf16>
    %280 = vector.shape_cast %279 : vector<1x4x32xbf16> to vector<4x32xbf16>
    %281 = vector.shape_cast %278 : vector<4x32xbf16> to vector<1x4x32xbf16>
    tpu.vector_store %arg11[%c1_291, %c12_292, %c32_293], %281 {strides = array<i32>} : memref<2x20x320xbf16, #tpu.memory_space<vmem>>, vector<1x4x32xbf16>,
    %282 = vector.extract_strided_slice %82 {offsets = [56, 0], sizes = [4, 32], strides = [1, 1]} : vector<256x32xbf16> to vector<4x32xbf16>
    %c1_294 = arith.constant 1 : index
    %c12_295 = arith.constant 12 : index
    %c64_296 = arith.constant 64 : index
    %283 = vector.load %arg11[%c1_294, %c12_295, %c64_296] : memref<2x20x320xbf16, #tpu.memory_space<vmem>>, vector<1x4x32xbf16>
    %284 = vector.shape_cast %283 : vector<1x4x32xbf16> to vector<4x32xbf16>
    %285 = vector.shape_cast %282 : vector<4x32xbf16> to vector<1x4x32xbf16>
    tpu.vector_store %arg11[%c1_294, %c12_295, %c64_296], %285 {strides = array<i32>} : memref<2x20x320xbf16, #tpu.memory_space<vmem>>, vector<1x4x32xbf16>,
    %286 = vector.extract_strided_slice %82 {offsets = [88, 0], sizes = [4, 32], strides = [1, 1]} : vector<256x32xbf16> to vector<4x32xbf16>
    %c1_297 = arith.constant 1 : index
    %c12_298 = arith.constant 12 : index
    %c96_299 = arith.constant 96 : index
    %287 = vector.load %arg11[%c1_297, %c12_298, %c96_299] : memref<2x20x320xbf16, #tpu.memory_space<vmem>>, vector<1x4x32xbf16>
    %288 = vector.shape_cast %287 : vector<1x4x32xbf16> to vector<4x32xbf16>
    %289 = vector.shape_cast %286 : vector<4x32xbf16> to vector<1x4x32xbf16>
    tpu.vector_store %arg11[%c1_297, %c12_298, %c96_299], %289 {strides = array<i32>} : memref<2x20x320xbf16, #tpu.memory_space<vmem>>, vector<1x4x32xbf16>,
    %290 = vector.extract_strided_slice %82 {offsets = [120, 0], sizes = [4, 32], strides = [1, 1]} : vector<256x32xbf16> to vector<4x32xbf16>
    %c1_300 = arith.constant 1 : index
    %c12_301 = arith.constant 12 : index
    %c128_302 = arith.constant 128 : index
    %291 = vector.load %arg11[%c1_300, %c12_301, %c128_302] : memref<2x20x320xbf16, #tpu.memory_space<vmem>>, vector<1x4x32xbf16>
    %292 = vector.shape_cast %291 : vector<1x4x32xbf16> to vector<4x32xbf16>
    %293 = vector.shape_cast %290 : vector<4x32xbf16> to vector<1x4x32xbf16>
    tpu.vector_store %arg11[%c1_300, %c12_301, %c128_302], %293 {strides = array<i32>} : memref<2x20x320xbf16, #tpu.memory_space<vmem>>, vector<1x4x32xbf16>,
    %294 = vector.extract_strided_slice %82 {offsets = [152, 0], sizes = [4, 32], strides = [1, 1]} : vector<256x32xbf16> to vector<4x32xbf16>
    %c1_303 = arith.constant 1 : index
    %c12_304 = arith.constant 12 : index
    %c160_305 = arith.constant 160 : index
    %295 = vector.load %arg11[%c1_303, %c12_304, %c160_305] : memref<2x20x320xbf16, #tpu.memory_space<vmem>>, vector<1x4x32xbf16>
    %296 = vector.shape_cast %295 : vector<1x4x32xbf16> to vector<4x32xbf16>
    %297 = vector.shape_cast %294 : vector<4x32xbf16> to vector<1x4x32xbf16>
    tpu.vector_store %arg11[%c1_303, %c12_304, %c160_305], %297 {strides = array<i32>} : memref<2x20x320xbf16, #tpu.memory_space<vmem>>, vector<1x4x32xbf16>,
    %298 = vector.extract_strided_slice %82 {offsets = [184, 0], sizes = [4, 32], strides = [1, 1]} : vector<256x32xbf16> to vector<4x32xbf16>
    %c1_306 = arith.constant 1 : index
    %c12_307 = arith.constant 12 : index
    %c192_308 = arith.constant 192 : index
    %299 = vector.load %arg11[%c1_306, %c12_307, %c192_308] : memref<2x20x320xbf16, #tpu.memory_space<vmem>>, vector<1x4x32xbf16>
    %300 = vector.shape_cast %299 : vector<1x4x32xbf16> to vector<4x32xbf16>
    %301 = vector.shape_cast %298 : vector<4x32xbf16> to vector<1x4x32xbf16>
    tpu.vector_store %arg11[%c1_306, %c12_307, %c192_308], %301 {strides = array<i32>} : memref<2x20x320xbf16, #tpu.memory_space<vmem>>, vector<1x4x32xbf16>,
    %302 = vector.extract_strided_slice %82 {offsets = [216, 0], sizes = [4, 32], strides = [1, 1]} : vector<256x32xbf16> to vector<4x32xbf16>
    %c1_309 = arith.constant 1 : index
    %c12_310 = arith.constant 12 : index
    %c224_311 = arith.constant 224 : index
    %303 = vector.load %arg11[%c1_309, %c12_310, %c224_311] : memref<2x20x320xbf16, #tpu.memory_space<vmem>>, vector<1x4x32xbf16>
    %304 = vector.shape_cast %303 : vector<1x4x32xbf16> to vector<4x32xbf16>
    %305 = vector.shape_cast %302 : vector<4x32xbf16> to vector<1x4x32xbf16>
    tpu.vector_store %arg11[%c1_309, %c12_310, %c224_311], %305 {strides = array<i32>} : memref<2x20x320xbf16, #tpu.memory_space<vmem>>, vector<1x4x32xbf16>,
    %306 = vector.extract_strided_slice %82 {offsets = [248, 0], sizes = [4, 32], strides = [1, 1]} : vector<256x32xbf16> to vector<4x32xbf16>
    %c1_312 = arith.constant 1 : index
    %c12_313 = arith.constant 12 : index
    %c256_314 = arith.constant 256 : index
    %307 = vector.load %arg11[%c1_312, %c12_313, %c256_314] : memref<2x20x320xbf16, #tpu.memory_space<vmem>>, vector<1x4x32xbf16>
    %308 = vector.shape_cast %307 : vector<1x4x32xbf16> to vector<4x32xbf16>
    %309 = vector.shape_cast %306 : vector<4x32xbf16> to vector<1x4x32xbf16>
    tpu.vector_store %arg11[%c1_312, %c12_313, %c256_314], %309 {strides = array<i32>} : memref<2x20x320xbf16, #tpu.memory_space<vmem>>, vector<1x4x32xbf16>,
    %310 = vector.extract_strided_slice %82 {offsets = [28, 0], sizes = [4, 32], strides = [1, 1]} : vector<256x32xbf16> to vector<4x32xbf16>
    %c0_315 = arith.constant 0 : index
    %c16 = arith.constant 16 : index
    %c32_316 = arith.constant 32 : index
    %311 = vector.load %arg11[%c0_315, %c16, %c32_316] : memref<2x20x320xbf16, #tpu.memory_space<vmem>>, vector<1x4x32xbf16>
    %312 = vector.shape_cast %311 : vector<1x4x32xbf16> to vector<4x32xbf16>
    %313 = vector.shape_cast %310 : vector<4x32xbf16> to vector<1x4x32xbf16>
    tpu.vector_store %arg11[%c0_315, %c16, %c32_316], %313 {strides = array<i32>} : memref<2x20x320xbf16, #tpu.memory_space<vmem>>, vector<1x4x32xbf16>,
    %314 = vector.extract_strided_slice %82 {offsets = [60, 0], sizes = [4, 32], strides = [1, 1]} : vector<256x32xbf16> to vector<4x32xbf16>
    %c0_317 = arith.constant 0 : index
    %c16_318 = arith.constant 16 : index
    %c64_319 = arith.constant 64 : index
    %315 = vector.load %arg11[%c0_317, %c16_318, %c64_319] : memref<2x20x320xbf16, #tpu.memory_space<vmem>>, vector<1x4x32xbf16>
    %316 = vector.shape_cast %315 : vector<1x4x32xbf16> to vector<4x32xbf16>
    %317 = vector.shape_cast %314 : vector<4x32xbf16> to vector<1x4x32xbf16>
    tpu.vector_store %arg11[%c0_317, %c16_318, %c64_319], %317 {strides = array<i32>} : memref<2x20x320xbf16, #tpu.memory_space<vmem>>, vector<1x4x32xbf16>,
    %318 = vector.extract_strided_slice %82 {offsets = [92, 0], sizes = [4, 32], strides = [1, 1]} : vector<256x32xbf16> to vector<4x32xbf16>
    %c0_320 = arith.constant 0 : index
    %c16_321 = arith.constant 16 : index
    %c96_322 = arith.constant 96 : index
    %319 = vector.load %arg11[%c0_320, %c16_321, %c96_322] : memref<2x20x320xbf16, #tpu.memory_space<vmem>>, vector<1x4x32xbf16>
    %320 = vector.shape_cast %319 : vector<1x4x32xbf16> to vector<4x32xbf16>
    %321 = vector.shape_cast %318 : vector<4x32xbf16> to vector<1x4x32xbf16>
    tpu.vector_store %arg11[%c0_320, %c16_321, %c96_322], %321 {strides = array<i32>} : memref<2x20x320xbf16, #tpu.memory_space<vmem>>, vector<1x4x32xbf16>,
    %322 = vector.extract_strided_slice %82 {offsets = [124, 0], sizes = [4, 32], strides = [1, 1]} : vector<256x32xbf16> to vector<4x32xbf16>
    %c0_323 = arith.constant 0 : index
    %c16_324 = arith.constant 16 : index
    %c128_325 = arith.constant 128 : index
    %323 = vector.load %arg11[%c0_323, %c16_324, %c128_325] : memref<2x20x320xbf16, #tpu.memory_space<vmem>>, vector<1x4x32xbf16>
    %324 = vector.shape_cast %323 : vector<1x4x32xbf16> to vector<4x32xbf16>
    %325 = vector.shape_cast %322 : vector<4x32xbf16> to vector<1x4x32xbf16>
    tpu.vector_store %arg11[%c0_323, %c16_324, %c128_325], %325 {strides = array<i32>} : memref<2x20x320xbf16, #tpu.memory_space<vmem>>, vector<1x4x32xbf16>,
    %326 = vector.extract_strided_slice %82 {offsets = [156, 0], sizes = [4, 32], strides = [1, 1]} : vector<256x32xbf16> to vector<4x32xbf16>
    %c0_326 = arith.constant 0 : index
    %c16_327 = arith.constant 16 : index
    %c160_328 = arith.constant 160 : index
    %327 = vector.load %arg11[%c0_326, %c16_327, %c160_328] : memref<2x20x320xbf16, #tpu.memory_space<vmem>>, vector<1x4x32xbf16>
    %328 = vector.shape_cast %327 : vector<1x4x32xbf16> to vector<4x32xbf16>
    %329 = vector.shape_cast %326 : vector<4x32xbf16> to vector<1x4x32xbf16>
    tpu.vector_store %arg11[%c0_326, %c16_327, %c160_328], %329 {strides = array<i32>} : memref<2x20x320xbf16, #tpu.memory_space<vmem>>, vector<1x4x32xbf16>,
    %330 = vector.extract_strided_slice %82 {offsets = [188, 0], sizes = [4, 32], strides = [1, 1]} : vector<256x32xbf16> to vector<4x32xbf16>
    %c0_329 = arith.constant 0 : index
    %c16_330 = arith.constant 16 : index
    %c192_331 = arith.constant 192 : index
    %331 = vector.load %arg11[%c0_329, %c16_330, %c192_331] : memref<2x20x320xbf16, #tpu.memory_space<vmem>>, vector<1x4x32xbf16>
    %332 = vector.shape_cast %331 : vector<1x4x32xbf16> to vector<4x32xbf16>
    %333 = vector.shape_cast %330 : vector<4x32xbf16> to vector<1x4x32xbf16>
    tpu.vector_store %arg11[%c0_329, %c16_330, %c192_331], %333 {strides = array<i32>} : memref<2x20x320xbf16, #tpu.memory_space<vmem>>, vector<1x4x32xbf16>,
    %334 = vector.extract_strided_slice %82 {offsets = [220, 0], sizes = [4, 32], strides = [1, 1]} : vector<256x32xbf16> to vector<4x32xbf16>
    %c0_332 = arith.constant 0 : index
    %c16_333 = arith.constant 16 : index
    %c224_334 = arith.constant 224 : index
    %335 = vector.load %arg11[%c0_332, %c16_333, %c224_334] : memref<2x20x320xbf16, #tpu.memory_space<vmem>>, vector<1x4x32xbf16>
    %336 = vector.shape_cast %335 : vector<1x4x32xbf16> to vector<4x32xbf16>
    %337 = vector.shape_cast %334 : vector<4x32xbf16> to vector<1x4x32xbf16>
    tpu.vector_store %arg11[%c0_332, %c16_333, %c224_334], %337 {strides = array<i32>} : memref<2x20x320xbf16, #tpu.memory_space<vmem>>, vector<1x4x32xbf16>,
    %338 = vector.extract_strided_slice %82 {offsets = [252, 0], sizes = [4, 32], strides = [1, 1]} : vector<256x32xbf16> to vector<4x32xbf16>
    %c0_335 = arith.constant 0 : index
    %c16_336 = arith.constant 16 : index
    %c256_337 = arith.constant 256 : index
    %339 = vector.load %arg11[%c0_335, %c16_336, %c256_337] : memref<2x20x320xbf16, #tpu.memory_space<vmem>>, vector<1x4x32xbf16>
    %340 = vector.shape_cast %339 : vector<1x4x32xbf16> to vector<4x32xbf16>
    %341 = vector.shape_cast %338 : vector<4x32xbf16> to vector<1x4x32xbf16>
    tpu.vector_store %arg11[%c0_335, %c16_336, %c256_337], %341 {strides = array<i32>} : memref<2x20x320xbf16, #tpu.memory_space<vmem>>, vector<1x4x32xbf16>,
    %c0_338 = arith.constant 0 : index
    %c0_339 = arith.constant 0 : index
    %c0_340 = arith.constant 0 : index
    %342 = vector.load %arg11[%c0_338, %c0_339, %c0_340] : memref<2x20x320xbf16, #tpu.memory_space<vmem>>, vector<1x16x96xbf16>
    %343 = vector.shape_cast %342 : vector<1x16x96xbf16> to vector<16x96xbf16>
    %c0_341 = arith.constant 0 : index
    %c0_342 = arith.constant 0 : index
    %344 = vector.load %arg14[%c0_341, %c0_342] : memref<64x288xbf16, #tpu.memory_space<vmem>>, vector<16x96xbf16>
    tpu.vector_store %arg14[%c0_341, %c0_342], %343 {strides = array<i32>} : memref<64x288xbf16, #tpu.memory_space<vmem>>, vector<16x96xbf16>,
    %c0_343 = arith.constant 0 : index
    %c0_344 = arith.constant 0 : index
    %c64_345 = arith.constant 64 : index
    %345 = vector.load %arg11[%c0_343, %c0_344, %c64_345] : memref<2x20x320xbf16, #tpu.memory_space<vmem>>, vector<1x16x96xbf16>
    %346 = vector.shape_cast %345 : vector<1x16x96xbf16> to vector<16x96xbf16>
    %c16_346 = arith.constant 16 : index
    %c0_347 = arith.constant 0 : index
    %347 = vector.load %arg14[%c16_346, %c0_347] : memref<64x288xbf16, #tpu.memory_space<vmem>>, vector<16x96xbf16>
    tpu.vector_store %arg14[%c16_346, %c0_347], %346 {strides = array<i32>} : memref<64x288xbf16, #tpu.memory_space<vmem>>, vector<16x96xbf16>,
    %c0_348 = arith.constant 0 : index
    %c0_349 = arith.constant 0 : index
    %c128_350 = arith.constant 128 : index
    %348 = vector.load %arg11[%c0_348, %c0_349, %c128_350] : memref<2x20x320xbf16, #tpu.memory_space<vmem>>, vector<1x16x96xbf16>
    %349 = vector.shape_cast %348 : vector<1x16x96xbf16> to vector<16x96xbf16>
    %c32_351 = arith.constant 32 : index
    %c0_352 = arith.constant 0 : index
    %350 = vector.load %arg14[%c32_351, %c0_352] : memref<64x288xbf16, #tpu.memory_space<vmem>>, vector<16x96xbf16>
    tpu.vector_store %arg14[%c32_351, %c0_352], %349 {strides = array<i32>} : memref<64x288xbf16, #tpu.memory_space<vmem>>, vector<16x96xbf16>,
    %c0_353 = arith.constant 0 : index
    %c0_354 = arith.constant 0 : index
    %c192_355 = arith.constant 192 : index
    %351 = vector.load %arg11[%c0_353, %c0_354, %c192_355] : memref<2x20x320xbf16, #tpu.memory_space<vmem>>, vector<1x16x96xbf16>
    %352 = vector.shape_cast %351 : vector<1x16x96xbf16> to vector<16x96xbf16>
    %c48_356 = arith.constant 48 : index
    %c0_357 = arith.constant 0 : index
    %353 = vector.load %arg14[%c48_356, %c0_357] : memref<64x288xbf16, #tpu.memory_space<vmem>>, vector<16x96xbf16>
    tpu.vector_store %arg14[%c48_356, %c0_357], %352 {strides = array<i32>} : memref<64x288xbf16, #tpu.memory_space<vmem>>, vector<16x96xbf16>,
    %c1_358 = arith.constant 1 : index
    %c0_359 = arith.constant 0 : index
    %c0_360 = arith.constant 0 : index
    %354 = vector.load %arg11[%c1_358, %c0_359, %c0_360] : memref<2x20x320xbf16, #tpu.memory_space<vmem>>, vector<1x16x96xbf16>
    %355 = vector.shape_cast %354 : vector<1x16x96xbf16> to vector<16x96xbf16>
    %c0_361 = arith.constant 0 : index
    %c96_362 = arith.constant 96 : index
    %356 = vector.load %arg14[%c0_361, %c96_362] : memref<64x288xbf16, #tpu.memory_space<vmem>>, vector<16x96xbf16>
    tpu.vector_store %arg14[%c0_361, %c96_362], %355 {strides = array<i32>} : memref<64x288xbf16, #tpu.memory_space<vmem>>, vector<16x96xbf16>,
    %c1_363 = arith.constant 1 : index
    %c0_364 = arith.constant 0 : index
    %c64_365 = arith.constant 64 : index
    %357 = vector.load %arg11[%c1_363, %c0_364, %c64_365] : memref<2x20x320xbf16, #tpu.memory_space<vmem>>, vector<1x16x96xbf16>
    %358 = vector.shape_cast %357 : vector<1x16x96xbf16> to vector<16x96xbf16>
    %c16_366 = arith.constant 16 : index
    %c96_367 = arith.constant 96 : index
    %359 = vector.load %arg14[%c16_366, %c96_367] : memref<64x288xbf16, #tpu.memory_space<vmem>>, vector<16x96xbf16>
    tpu.vector_store %arg14[%c16_366, %c96_367], %358 {strides = array<i32>} : memref<64x288xbf16, #tpu.memory_space<vmem>>, vector<16x96xbf16>,
    %c1_368 = arith.constant 1 : index
    %c0_369 = arith.constant 0 : index
    %c128_370 = arith.constant 128 : index
    %360 = vector.load %arg11[%c1_368, %c0_369, %c128_370] : memref<2x20x320xbf16, #tpu.memory_space<vmem>>, vector<1x16x96xbf16>
    %361 = vector.shape_cast %360 : vector<1x16x96xbf16> to vector<16x96xbf16>
    %c32_371 = arith.constant 32 : index
    %c96_372 = arith.constant 96 : index
    %362 = vector.load %arg14[%c32_371, %c96_372] : memref<64x288xbf16, #tpu.memory_space<vmem>>, vector<16x96xbf16>
    tpu.vector_store %arg14[%c32_371, %c96_372], %361 {strides = array<i32>} : memref<64x288xbf16, #tpu.memory_space<vmem>>, vector<16x96xbf16>,
    %c1_373 = arith.constant 1 : index
    %c0_374 = arith.constant 0 : index
    %c192_375 = arith.constant 192 : index
    %363 = vector.load %arg11[%c1_373, %c0_374, %c192_375] : memref<2x20x320xbf16, #tpu.memory_space<vmem>>, vector<1x16x96xbf16>
    %364 = vector.shape_cast %363 : vector<1x16x96xbf16> to vector<16x96xbf16>
    %c48_376 = arith.constant 48 : index
    %c96_377 = arith.constant 96 : index
    %365 = vector.load %arg14[%c48_376, %c96_377] : memref<64x288xbf16, #tpu.memory_space<vmem>>, vector<16x96xbf16>
    tpu.vector_store %arg14[%c48_376, %c96_377], %364 {strides = array<i32>} : memref<64x288xbf16, #tpu.memory_space<vmem>>, vector<16x96xbf16>,
    %c0_378 = arith.constant 0 : index
    %c4_379 = arith.constant 4 : index
    %c0_380 = arith.constant 0 : index
    %366 = vector.load %arg11[%c0_378, %c4_379, %c0_380] : memref<2x20x320xbf16, #tpu.memory_space<vmem>>, vector<1x16x96xbf16>
    %367 = vector.shape_cast %366 : vector<1x16x96xbf16> to vector<16x96xbf16>
    %c0_381 = arith.constant 0 : index
    %c192_382 = arith.constant 192 : index
    %368 = vector.load %arg14[%c0_381, %c192_382] : memref<64x288xbf16, #tpu.memory_space<vmem>>, vector<16x96xbf16>
    tpu.vector_store %arg14[%c0_381, %c192_382], %367 {strides = array<i32>} : memref<64x288xbf16, #tpu.memory_space<vmem>>, vector<16x96xbf16>,
    %c0_383 = arith.constant 0 : index
    %c4_384 = arith.constant 4 : index
    %c64_385 = arith.constant 64 : index
    %369 = vector.load %arg11[%c0_383, %c4_384, %c64_385] : memref<2x20x320xbf16, #tpu.memory_space<vmem>>, vector<1x16x96xbf16>
    %370 = vector.shape_cast %369 : vector<1x16x96xbf16> to vector<16x96xbf16>
    %c16_386 = arith.constant 16 : index
    %c192_387 = arith.constant 192 : index
    %371 = vector.load %arg14[%c16_386, %c192_387] : memref<64x288xbf16, #tpu.memory_space<vmem>>, vector<16x96xbf16>
    tpu.vector_store %arg14[%c16_386, %c192_387], %370 {strides = array<i32>} : memref<64x288xbf16, #tpu.memory_space<vmem>>, vector<16x96xbf16>,
    %c0_388 = arith.constant 0 : index
    %c4_389 = arith.constant 4 : index
    %c128_390 = arith.constant 128 : index
    %372 = vector.load %arg11[%c0_388, %c4_389, %c128_390] : memref<2x20x320xbf16, #tpu.memory_space<vmem>>, vector<1x16x96xbf16>
    %373 = vector.shape_cast %372 : vector<1x16x96xbf16> to vector<16x96xbf16>
    %c32_391 = arith.constant 32 : index
    %c192_392 = arith.constant 192 : index
    %374 = vector.load %arg14[%c32_391, %c192_392] : memref<64x288xbf16, #tpu.memory_space<vmem>>, vector<16x96xbf16>
    tpu.vector_store %arg14[%c32_391, %c192_392], %373 {strides = array<i32>} : memref<64x288xbf16, #tpu.memory_space<vmem>>, vector<16x96xbf16>,
    %c0_393 = arith.constant 0 : index
    %c4_394 = arith.constant 4 : index
    %c192_395 = arith.constant 192 : index
    %375 = vector.load %arg11[%c0_393, %c4_394, %c192_395] : memref<2x20x320xbf16, #tpu.memory_space<vmem>>, vector<1x16x96xbf16>
    %376 = vector.shape_cast %375 : vector<1x16x96xbf16> to vector<16x96xbf16>
    %c48_396 = arith.constant 48 : index
    %c192_397 = arith.constant 192 : index
    %377 = vector.load %arg14[%c48_396, %c192_397] : memref<64x288xbf16, #tpu.memory_space<vmem>>, vector<16x96xbf16>
    tpu.vector_store %arg14[%c48_396, %c192_397], %376 {strides = array<i32>} : memref<64x288xbf16, #tpu.memory_space<vmem>>, vector<16x96xbf16>,
    %c0_398 = arith.constant 0 : index
    %c0_399 = arith.constant 0 : index
    %378 = vector.load %arg14[%c0_398, %c0_399] : memref<64x288xbf16, #tpu.memory_space<vmem>>, vector<64x288xbf16>
    %c0_400 = arith.constant 0 : index
    %c0_401 = arith.constant 0 : index
    %379 = vector.load %arg4[%c0_400, %c0_401] : memref<288x64xbf16, #tpu.memory_space<vmem>>, vector<288x64xbf16>
    %cst_402 = arith.constant dense<0.000000e+00> : vector<64x64xf32>
    %380 = tpu.matmul %378, %379, %cst_402 {dimension_numbers = #tpu.dot_dimension_numbers<[1], [0], [0], [1], [0, 0, 1, 1], [], []>} : vector<64x288xbf16>, vector<288x64xbf16>, vector<64x64xf32> -> vector<64x64xf32>
    %c0_403 = arith.constant 0 : index
    %c0_404 = arith.constant 0 : index
    %381 = vector.load %arg5[%c0_403, %c0_404] : memref<1x64xf32, #tpu.memory_space<vmem>>, vector<1x64xf32>
    %382 = vector.broadcast %381 : vector<1x64xf32> to vector<64x64xf32>
    %383 = arith.addf %380, %382 : vector<64x64xf32>
    %384 = arith.truncf %383 : vector<64x64xf32> to vector<64x64xbf16>
    %c0_405 = arith.constant 0 : index
    %c0_406 = arith.constant 0 : index
    %c0_407 = arith.constant 0 : index
    %385 = vector.load %arg9[%c0_405, %c0_406, %c0_407] : memref<1x64x64xbf16, #tpu.memory_space<vmem>>, vector<1x64x64xbf16>
    %386 = vector.shape_cast %385 : vector<1x64x64xbf16> to vector<64x64xbf16>
    %387 = vector.shape_cast %384 : vector<64x64xbf16> to vector<1x64x64xbf16>
    tpu.vector_store %arg9[%c0_405, %c0_406, %c0_407], %387 {strides = array<i32>} : memref<1x64x64xbf16, #tpu.memory_space<vmem>>, vector<1x64x64xbf16>,
    %388 = vector.extract_strided_slice %384 {offsets = [0, 0], sizes = [4, 64], strides = [1, 1]} : vector<64x64xbf16> to vector<4x64xbf16>
    %c1_408 = arith.constant 1 : index
    %c0_409 = arith.constant 0 : index
    %c64_410 = arith.constant 64 : index
    %389 = vector.load %arg12[%c1_408, %c0_409, %c64_410] : memref<2x12x384xbf16, #tpu.memory_space<vmem>>, vector<1x4x64xbf16>
    %390 = vector.shape_cast %389 : vector<1x4x64xbf16> to vector<4x64xbf16>
    %391 = vector.shape_cast %388 : vector<4x64xbf16> to vector<1x4x64xbf16>
    tpu.vector_store %arg12[%c1_408, %c0_409, %c64_410], %391 {strides = array<i32>} : memref<2x12x384xbf16, #tpu.memory_space<vmem>>, vector<1x4x64xbf16>,
    %392 = vector.extract_strided_slice %384 {offsets = [16, 0], sizes = [4, 64], strides = [1, 1]} : vector<64x64xbf16> to vector<4x64xbf16>
    %c1_411 = arith.constant 1 : index
    %c0_412 = arith.constant 0 : index
    %c128_413 = arith.constant 128 : index
    %393 = vector.load %arg12[%c1_411, %c0_412, %c128_413] : memref<2x12x384xbf16, #tpu.memory_space<vmem>>, vector<1x4x64xbf16>
    %394 = vector.shape_cast %393 : vector<1x4x64xbf16> to vector<4x64xbf16>
    %395 = vector.shape_cast %392 : vector<4x64xbf16> to vector<1x4x64xbf16>
    tpu.vector_store %arg12[%c1_411, %c0_412, %c128_413], %395 {strides = array<i32>} : memref<2x12x384xbf16, #tpu.memory_space<vmem>>, vector<1x4x64xbf16>,
    %396 = vector.extract_strided_slice %384 {offsets = [32, 0], sizes = [4, 64], strides = [1, 1]} : vector<64x64xbf16> to vector<4x64xbf16>
    %c1_414 = arith.constant 1 : index
    %c0_415 = arith.constant 0 : index
    %c192_416 = arith.constant 192 : index
    %397 = vector.load %arg12[%c1_414, %c0_415, %c192_416] : memref<2x12x384xbf16, #tpu.memory_space<vmem>>, vector<1x4x64xbf16>
    %398 = vector.shape_cast %397 : vector<1x4x64xbf16> to vector<4x64xbf16>
    %399 = vector.shape_cast %396 : vector<4x64xbf16> to vector<1x4x64xbf16>
    tpu.vector_store %arg12[%c1_414, %c0_415, %c192_416], %399 {strides = array<i32>} : memref<2x12x384xbf16, #tpu.memory_space<vmem>>, vector<1x4x64xbf16>,
    %400 = vector.extract_strided_slice %384 {offsets = [48, 0], sizes = [4, 64], strides = [1, 1]} : vector<64x64xbf16> to vector<4x64xbf16>
    %c1_417 = arith.constant 1 : index
    %c0_418 = arith.constant 0 : index
    %c256_419 = arith.constant 256 : index
    %401 = vector.load %arg12[%c1_417, %c0_418, %c256_419] : memref<2x12x384xbf16, #tpu.memory_space<vmem>>, vector<1x4x64xbf16>
    %402 = vector.shape_cast %401 : vector<1x4x64xbf16> to vector<4x64xbf16>
    %403 = vector.shape_cast %400 : vector<4x64xbf16> to vector<1x4x64xbf16>
    tpu.vector_store %arg12[%c1_417, %c0_418, %c256_419], %403 {strides = array<i32>} : memref<2x12x384xbf16, #tpu.memory_space<vmem>>, vector<1x4x64xbf16>,
    %404 = vector.extract_strided_slice %384 {offsets = [4, 0], sizes = [4, 64], strides = [1, 1]} : vector<64x64xbf16> to vector<4x64xbf16>
    %c0_420 = arith.constant 0 : index
    %c4_421 = arith.constant 4 : index
    %c64_422 = arith.constant 64 : index
    %405 = vector.load %arg12[%c0_420, %c4_421, %c64_422] : memref<2x12x384xbf16, #tpu.memory_space<vmem>>, vector<1x4x64xbf16>
    %406 = vector.shape_cast %405 : vector<1x4x64xbf16> to vector<4x64xbf16>
    %407 = vector.shape_cast %404 : vector<4x64xbf16> to vector<1x4x64xbf16>
    tpu.vector_store %arg12[%c0_420, %c4_421, %c64_422], %407 {strides = array<i32>} : memref<2x12x384xbf16, #tpu.memory_space<vmem>>, vector<1x4x64xbf16>,
    %408 = vector.extract_strided_slice %384 {offsets = [20, 0], sizes = [4, 64], strides = [1, 1]} : vector<64x64xbf16> to vector<4x64xbf16>
    %c0_423 = arith.constant 0 : index
    %c4_424 = arith.constant 4 : index
    %c128_425 = arith.constant 128 : index
    %409 = vector.load %arg12[%c0_423, %c4_424, %c128_425] : memref<2x12x384xbf16, #tpu.memory_space<vmem>>, vector<1x4x64xbf16>
    %410 = vector.shape_cast %409 : vector<1x4x64xbf16> to vector<4x64xbf16>
    %411 = vector.shape_cast %408 : vector<4x64xbf16> to vector<1x4x64xbf16>
    tpu.vector_store %arg12[%c0_423, %c4_424, %c128_425], %411 {strides = array<i32>} : memref<2x12x384xbf16, #tpu.memory_space<vmem>>, vector<1x4x64xbf16>,
    %412 = vector.extract_strided_slice %384 {offsets = [36, 0], sizes = [4, 64], strides = [1, 1]} : vector<64x64xbf16> to vector<4x64xbf16>
    %c0_426 = arith.constant 0 : index
    %c4_427 = arith.constant 4 : index
    %c192_428 = arith.constant 192 : index
    %413 = vector.load %arg12[%c0_426, %c4_427, %c192_428] : memref<2x12x384xbf16, #tpu.memory_space<vmem>>, vector<1x4x64xbf16>
    %414 = vector.shape_cast %413 : vector<1x4x64xbf16> to vector<4x64xbf16>
    %415 = vector.shape_cast %412 : vector<4x64xbf16> to vector<1x4x64xbf16>
    tpu.vector_store %arg12[%c0_426, %c4_427, %c192_428], %415 {strides = array<i32>} : memref<2x12x384xbf16, #tpu.memory_space<vmem>>, vector<1x4x64xbf16>,
    %416 = vector.extract_strided_slice %384 {offsets = [52, 0], sizes = [4, 64], strides = [1, 1]} : vector<64x64xbf16> to vector<4x64xbf16>
    %c0_429 = arith.constant 0 : index
    %c4_430 = arith.constant 4 : index
    %c256_431 = arith.constant 256 : index
    %417 = vector.load %arg12[%c0_429, %c4_430, %c256_431] : memref<2x12x384xbf16, #tpu.memory_space<vmem>>, vector<1x4x64xbf16>
    %418 = vector.shape_cast %417 : vector<1x4x64xbf16> to vector<4x64xbf16>
    %419 = vector.shape_cast %416 : vector<4x64xbf16> to vector<1x4x64xbf16>
    tpu.vector_store %arg12[%c0_429, %c4_430, %c256_431], %419 {strides = array<i32>} : memref<2x12x384xbf16, #tpu.memory_space<vmem>>, vector<1x4x64xbf16>,
    %420 = vector.extract_strided_slice %384 {offsets = [8, 0], sizes = [4, 64], strides = [1, 1]} : vector<64x64xbf16> to vector<4x64xbf16>
    %c1_432 = arith.constant 1 : index
    %c4_433 = arith.constant 4 : index
    %c64_434 = arith.constant 64 : index
    %421 = vector.load %arg12[%c1_432, %c4_433, %c64_434] : memref<2x12x384xbf16, #tpu.memory_space<vmem>>, vector<1x4x64xbf16>
    %422 = vector.shape_cast %421 : vector<1x4x64xbf16> to vector<4x64xbf16>
    %423 = vector.shape_cast %420 : vector<4x64xbf16> to vector<1x4x64xbf16>
    tpu.vector_store %arg12[%c1_432, %c4_433, %c64_434], %423 {strides = array<i32>} : memref<2x12x384xbf16, #tpu.memory_space<vmem>>, vector<1x4x64xbf16>,
    %424 = vector.extract_strided_slice %384 {offsets = [24, 0], sizes = [4, 64], strides = [1, 1]} : vector<64x64xbf16> to vector<4x64xbf16>
    %c1_435 = arith.constant 1 : index
    %c4_436 = arith.constant 4 : index
    %c128_437 = arith.constant 128 : index
    %425 = vector.load %arg12[%c1_435, %c4_436, %c128_437] : memref<2x12x384xbf16, #tpu.memory_space<vmem>>, vector<1x4x64xbf16>
    %426 = vector.shape_cast %425 : vector<1x4x64xbf16> to vector<4x64xbf16>
    %427 = vector.shape_cast %424 : vector<4x64xbf16> to vector<1x4x64xbf16>
    tpu.vector_store %arg12[%c1_435, %c4_436, %c128_437], %427 {strides = array<i32>} : memref<2x12x384xbf16, #tpu.memory_space<vmem>>, vector<1x4x64xbf16>,
    %428 = vector.extract_strided_slice %384 {offsets = [40, 0], sizes = [4, 64], strides = [1, 1]} : vector<64x64xbf16> to vector<4x64xbf16>
    %c1_438 = arith.constant 1 : index
    %c4_439 = arith.constant 4 : index
    %c192_440 = arith.constant 192 : index
    %429 = vector.load %arg12[%c1_438, %c4_439, %c192_440] : memref<2x12x384xbf16, #tpu.memory_space<vmem>>, vector<1x4x64xbf16>
    %430 = vector.shape_cast %429 : vector<1x4x64xbf16> to vector<4x64xbf16>
    %431 = vector.shape_cast %428 : vector<4x64xbf16> to vector<1x4x64xbf16>
    tpu.vector_store %arg12[%c1_438, %c4_439, %c192_440], %431 {strides = array<i32>} : memref<2x12x384xbf16, #tpu.memory_space<vmem>>, vector<1x4x64xbf16>,
    %432 = vector.extract_strided_slice %384 {offsets = [56, 0], sizes = [4, 64], strides = [1, 1]} : vector<64x64xbf16> to vector<4x64xbf16>
    %c1_441 = arith.constant 1 : index
    %c4_442 = arith.constant 4 : index
    %c256_443 = arith.constant 256 : index
    %433 = vector.load %arg12[%c1_441, %c4_442, %c256_443] : memref<2x12x384xbf16, #tpu.memory_space<vmem>>, vector<1x4x64xbf16>
    %434 = vector.shape_cast %433 : vector<1x4x64xbf16> to vector<4x64xbf16>
    %435 = vector.shape_cast %432 : vector<4x64xbf16> to vector<1x4x64xbf16>
    tpu.vector_store %arg12[%c1_441, %c4_442, %c256_443], %435 {strides = array<i32>} : memref<2x12x384xbf16, #tpu.memory_space<vmem>>, vector<1x4x64xbf16>,
    %436 = vector.extract_strided_slice %384 {offsets = [12, 0], sizes = [4, 64], strides = [1, 1]} : vector<64x64xbf16> to vector<4x64xbf16>
    %c0_444 = arith.constant 0 : index
    %c8_445 = arith.constant 8 : index
    %c64_446 = arith.constant 64 : index
    %437 = vector.load %arg12[%c0_444, %c8_445, %c64_446] : memref<2x12x384xbf16, #tpu.memory_space<vmem>>, vector<1x4x64xbf16>
    %438 = vector.shape_cast %437 : vector<1x4x64xbf16> to vector<4x64xbf16>
    %439 = vector.shape_cast %436 : vector<4x64xbf16> to vector<1x4x64xbf16>
    tpu.vector_store %arg12[%c0_444, %c8_445, %c64_446], %439 {strides = array<i32>} : memref<2x12x384xbf16, #tpu.memory_space<vmem>>, vector<1x4x64xbf16>,
    %440 = vector.extract_strided_slice %384 {offsets = [28, 0], sizes = [4, 64], strides = [1, 1]} : vector<64x64xbf16> to vector<4x64xbf16>
    %c0_447 = arith.constant 0 : index
    %c8_448 = arith.constant 8 : index
    %c128_449 = arith.constant 128 : index
    %441 = vector.load %arg12[%c0_447, %c8_448, %c128_449] : memref<2x12x384xbf16, #tpu.memory_space<vmem>>, vector<1x4x64xbf16>
    %442 = vector.shape_cast %441 : vector<1x4x64xbf16> to vector<4x64xbf16>
    %443 = vector.shape_cast %440 : vector<4x64xbf16> to vector<1x4x64xbf16>
    tpu.vector_store %arg12[%c0_447, %c8_448, %c128_449], %443 {strides = array<i32>} : memref<2x12x384xbf16, #tpu.memory_space<vmem>>, vector<1x4x64xbf16>,
    %444 = vector.extract_strided_slice %384 {offsets = [44, 0], sizes = [4, 64], strides = [1, 1]} : vector<64x64xbf16> to vector<4x64xbf16>
    %c0_450 = arith.constant 0 : index
    %c8_451 = arith.constant 8 : index
    %c192_452 = arith.constant 192 : index
    %445 = vector.load %arg12[%c0_450, %c8_451, %c192_452] : memref<2x12x384xbf16, #tpu.memory_space<vmem>>, vector<1x4x64xbf16>
    %446 = vector.shape_cast %445 : vector<1x4x64xbf16> to vector<4x64xbf16>
    %447 = vector.shape_cast %444 : vector<4x64xbf16> to vector<1x4x64xbf16>
    tpu.vector_store %arg12[%c0_450, %c8_451, %c192_452], %447 {strides = array<i32>} : memref<2x12x384xbf16, #tpu.memory_space<vmem>>, vector<1x4x64xbf16>,
    %448 = vector.extract_strided_slice %384 {offsets = [60, 0], sizes = [4, 64], strides = [1, 1]} : vector<64x64xbf16> to vector<4x64xbf16>
    %c0_453 = arith.constant 0 : index
    %c8_454 = arith.constant 8 : index
    %c256_455 = arith.constant 256 : index
    %449 = vector.load %arg12[%c0_453, %c8_454, %c256_455] : memref<2x12x384xbf16, #tpu.memory_space<vmem>>, vector<1x4x64xbf16>
    %450 = vector.shape_cast %449 : vector<1x4x64xbf16> to vector<4x64xbf16>
    %451 = vector.shape_cast %448 : vector<4x64xbf16> to vector<1x4x64xbf16>
    tpu.vector_store %arg12[%c0_453, %c8_454, %c256_455], %451 {strides = array<i32>} : memref<2x12x384xbf16, #tpu.memory_space<vmem>>, vector<1x4x64xbf16>,
    %c0_456 = arith.constant 0 : index
    %c0_457 = arith.constant 0 : index
    %c0_458 = arith.constant 0 : index
    %452 = vector.load %arg12[%c0_456, %c0_457, %c0_458] : memref<2x12x384xbf16, #tpu.memory_space<vmem>>, vector<1x8x192xbf16>
    %453 = vector.shape_cast %452 : vector<1x8x192xbf16> to vector<8x192xbf16>
    %c0_459 = arith.constant 0 : index
    %c0_460 = arith.constant 0 : index
    %454 = vector.load %arg15[%c0_459, %c0_460] : memref<16x576xbf16, #tpu.memory_space<vmem>>, vector<8x192xbf16>
    tpu.vector_store %arg15[%c0_459, %c0_460], %453 {strides = array<i32>} : memref<16x576xbf16, #tpu.memory_space<vmem>>, vector<8x192xbf16>,
    %c0_461 = arith.constant 0 : index
    %c0_462 = arith.constant 0 : index
    %c128_463 = arith.constant 128 : index
    %455 = vector.load %arg12[%c0_461, %c0_462, %c128_463] : memref<2x12x384xbf16, #tpu.memory_space<vmem>>, vector<1x8x192xbf16>
    %456 = vector.shape_cast %455 : vector<1x8x192xbf16> to vector<8x192xbf16>
    %c8_464 = arith.constant 8 : index
    %c0_465 = arith.constant 0 : index
    %457 = vector.load %arg15[%c8_464, %c0_465] : memref<16x576xbf16, #tpu.memory_space<vmem>>, vector<8x192xbf16>
    tpu.vector_store %arg15[%c8_464, %c0_465], %456 {strides = array<i32>} : memref<16x576xbf16, #tpu.memory_space<vmem>>, vector<8x192xbf16>,
    %c1_466 = arith.constant 1 : index
    %c0_467 = arith.constant 0 : index
    %c0_468 = arith.constant 0 : index
    %458 = vector.load %arg12[%c1_466, %c0_467, %c0_468] : memref<2x12x384xbf16, #tpu.memory_space<vmem>>, vector<1x8x192xbf16>
    %459 = vector.shape_cast %458 : vector<1x8x192xbf16> to vector<8x192xbf16>
    %c0_469 = arith.constant 0 : index
    %c192_470 = arith.constant 192 : index
    %460 = vector.load %arg15[%c0_469, %c192_470] : memref<16x576xbf16, #tpu.memory_space<vmem>>, vector<8x192xbf16>
    tpu.vector_store %arg15[%c0_469, %c192_470], %459 {strides = array<i32>} : memref<16x576xbf16, #tpu.memory_space<vmem>>, vector<8x192xbf16>,
    %c1_471 = arith.constant 1 : index
    %c0_472 = arith.constant 0 : index
    %c128_473 = arith.constant 128 : index
    %461 = vector.load %arg12[%c1_471, %c0_472, %c128_473] : memref<2x12x384xbf16, #tpu.memory_space<vmem>>, vector<1x8x192xbf16>
    %462 = vector.shape_cast %461 : vector<1x8x192xbf16> to vector<8x192xbf16>
    %c8_474 = arith.constant 8 : index
    %c192_475 = arith.constant 192 : index
    %463 = vector.load %arg15[%c8_474, %c192_475] : memref<16x576xbf16, #tpu.memory_space<vmem>>, vector<8x192xbf16>
    tpu.vector_store %arg15[%c8_474, %c192_475], %462 {strides = array<i32>} : memref<16x576xbf16, #tpu.memory_space<vmem>>, vector<8x192xbf16>,
    %c0_476 = arith.constant 0 : index
    %c4_477 = arith.constant 4 : index
    %c0_478 = arith.constant 0 : index
    %464 = vector.load %arg12[%c0_476, %c4_477, %c0_478] : memref<2x12x384xbf16, #tpu.memory_space<vmem>>, vector<1x8x192xbf16>
    %465 = vector.shape_cast %464 : vector<1x8x192xbf16> to vector<8x192xbf16>
    %c0_479 = arith.constant 0 : index
    %c384 = arith.constant 384 : index
    %466 = vector.load %arg15[%c0_479, %c384] : memref<16x576xbf16, #tpu.memory_space<vmem>>, vector<8x192xbf16>
    tpu.vector_store %arg15[%c0_479, %c384], %465 {strides = array<i32>} : memref<16x576xbf16, #tpu.memory_space<vmem>>, vector<8x192xbf16>,
    %c0_480 = arith.constant 0 : index
    %c4_481 = arith.constant 4 : index
    %c128_482 = arith.constant 128 : index
    %467 = vector.load %arg12[%c0_480, %c4_481, %c128_482] : memref<2x12x384xbf16, #tpu.memory_space<vmem>>, vector<1x8x192xbf16>
    %468 = vector.shape_cast %467 : vector<1x8x192xbf16> to vector<8x192xbf16>
    %c8_483 = arith.constant 8 : index
    %c384_484 = arith.constant 384 : index
    %469 = vector.load %arg15[%c8_483, %c384_484] : memref<16x576xbf16, #tpu.memory_space<vmem>>, vector<8x192xbf16>
    tpu.vector_store %arg15[%c8_483, %c384_484], %468 {strides = array<i32>} : memref<16x576xbf16, #tpu.memory_space<vmem>>, vector<8x192xbf16>,
    %c0_485 = arith.constant 0 : index
    %c0_486 = arith.constant 0 : index
    %470 = vector.load %arg15[%c0_485, %c0_486] : memref<16x576xbf16, #tpu.memory_space<vmem>>, vector<16x576xbf16>
    %c0_487 = arith.constant 0 : index
    %c0_488 = arith.constant 0 : index
    %471 = vector.load %arg6[%c0_487, %c0_488] : memref<576x128xbf16, #tpu.memory_space<vmem>>, vector<576x128xbf16>
    %cst_489 = arith.constant dense<0.000000e+00> : vector<16x128xf32>
    %472 = tpu.matmul %470, %471, %cst_489 {dimension_numbers = #tpu.dot_dimension_numbers<[1], [0], [0], [1], [0, 0, 1, 1], [], []>} : vector<16x576xbf16>, vector<576x128xbf16>, vector<16x128xf32> -> vector<16x128xf32>
    %c0_490 = arith.constant 0 : index
    %c0_491 = arith.constant 0 : index
    %473 = vector.load %arg7[%c0_490, %c0_491] : memref<1x128xf32, #tpu.memory_space<vmem>>, vector<1x128xf32>
    %474 = vector.broadcast %473 : vector<1x128xf32> to vector<16x128xf32>
    %475 = arith.addf %472, %474 : vector<16x128xf32>
    %476 = arith.truncf %475 : vector<16x128xf32> to vector<16x128xbf16>
    %c0_492 = arith.constant 0 : index
    %c0_493 = arith.constant 0 : index
    %c0_494 = arith.constant 0 : index
    %477 = vector.load %arg10[%c0_492, %c0_493, %c0_494] : memref<1x16x128xbf16, #tpu.memory_space<vmem>>, vector<1x16x128xbf16>
    %478 = vector.shape_cast %477 : vector<1x16x128xbf16> to vector<16x128xbf16>
    %479 = vector.shape_cast %476 : vector<16x128xbf16> to vector<1x16x128xbf16>
    tpu.vector_store %arg10[%c0_492, %c0_493, %c0_494], %479 {strides = array<i32>} : memref<1x16x128xbf16, #tpu.memory_space<vmem>>, vector<1x16x128xbf16>,
    return
  }
  func.func @transform_0(%arg0: i32) -> (i32, i32, i32, i32) {
    %c0_i32 = arith.constant 0 : i32
    %c0_i32_0 = arith.constant 0 : i32
    %c0_i32_1 = arith.constant 0 : i32
    %c0_i32_2 = arith.constant 0 : i32
    return %c0_i32, %arg0, %c0_i32_0, %c0_i32_1 : i32, i32, i32, i32
  }
  func.func @transform_1(%arg0: i32) -> (i32, i32) {
    %c0_i32 = arith.constant 0 : i32
    %c0_i32_0 = arith.constant 0 : i32
    %c0_i32_1 = arith.constant 0 : i32
    return %c0_i32, %c0_i32_0 : i32, i32
  }
  func.func @transform_2(%arg0: i32) -> (i32, i32) {
    %c0_i32 = arith.constant 0 : i32
    %c0_i32_0 = arith.constant 0 : i32
    %c0_i32_1 = arith.constant 0 : i32
    return %c0_i32, %c0_i32_0 : i32, i32
  }
  func.func @transform_3(%arg0: i32) -> (i32, i32) {
    %c0_i32 = arith.constant 0 : i32
    %c0_i32_0 = arith.constant 0 : i32
    %c0_i32_1 = arith.constant 0 : i32
    return %c0_i32, %c0_i32_0 : i32, i32
  }
  func.func @transform_4(%arg0: i32) -> (i32, i32) {
    %c0_i32 = arith.constant 0 : i32
    %c0_i32_0 = arith.constant 0 : i32
    %c0_i32_1 = arith.constant 0 : i32
    return %c0_i32, %c0_i32_0 : i32, i32
  }
  func.func @transform_5(%arg0: i32) -> (i32, i32) {
    %c0_i32 = arith.constant 0 : i32
    %c0_i32_0 = arith.constant 0 : i32
    %c0_i32_1 = arith.constant 0 : i32
    return %c0_i32, %c0_i32_0 : i32, i32
  }
  func.func @transform_6(%arg0: i32) -> (i32, i32) {
    %c0_i32 = arith.constant 0 : i32
    %c0_i32_0 = arith.constant 0 : i32
    %c0_i32_1 = arith.constant 0 : i32
    return %c0_i32, %c0_i32_0 : i32, i32
  }
  func.func @transform_7(%arg0: i32) -> (i32, i32, i32) {
    %c0_i32 = arith.constant 0 : i32
    %c0_i32_0 = arith.constant 0 : i32
    %c0_i32_1 = arith.constant 0 : i32
    return %arg0, %c0_i32, %c0_i32_0 : i32, i32, i32
  }
  func.func @transform_8(%arg0: i32) -> (i32, i32, i32) {
    %c0_i32 = arith.constant 0 : i32
    %c0_i32_0 = arith.constant 0 : i32
    %c0_i32_1 = arith.constant 0 : i32
    return %arg0, %c0_i32, %c0_i32_0 : i32, i32, i32
  }
  func.func @transform_9(%arg0: i32) -> (i32, i32, i32) {
    %c0_i32 = arith.constant 0 : i32
    %c0_i32_0 = arith.constant 0 : i32
    %c0_i32_1 = arith.constant 0 : i32
    return %arg0, %c0_i32, %c0_i32_0 : i32, i32, i32
  }
}

</mosaic_0001>

<bundles_post_ra>
// kernel: encoder_forward.1
= control target key start
LH: loop header
LB: loop body
LE: loop exit
PB: predicated region body
PF: predicated region fallthrough
CT: control target
= control target key end

     0   :  { %s3948_s30 = smov 0   ;;  %s3950_s10 = smov 0   ;;  %s5232_s0 = inlined_call_operand.vmem [shape: bf16[2,2,36,288], index: 0, kind: input, shape index: {}]   ;;  %s5233_s1 = inlined_call_operand.vmem [shape: bf16[144,32], index: 1, kind: input, shape index: {}]   ;;  %s5234_s2 = inlined_call_operand.vmem [shape: f32[1,32], index: 2, kind: input, shape index: {}]   ;;  %s5235_s3 = inlined_call_operand.vmem [shape: bf16[288,64], index: 3, kind: input, shape index: {}]   ;;  %s5236_s4 = inlined_call_operand.vmem [shape: f32[1,64], index: 4, kind: input, shape index: {}]   ;;  %s5237_s5 = inlined_call_operand.vmem [shape: bf16[576,128], index: 5, kind: input, shape index: {}]   ;;  %s5238_s6 = inlined_call_operand.vmem [shape: f32[1,128], index: 6, kind: input, shape index: {}]   ;;  %s5239_s7 = inlined_call_operand.vmem [shape: bf16[2,256,32], index: 7, kind: output, shape index: {0}]   ;;  %s5240_s8 = inlined_call_operand.vmem [shape: bf16[2,64,64], index: 8, kind: output, shape index: {1}]   ;;  %s5241_s9 = inlined_call_operand.vmem [shape: bf16[2,16,128], index: 9, kind: output, shape index: {2}]  }
   0x1   :  { %s3952_s11 = smov 0  }
   0x2 LB: > { %s3149_s12 = sadd.s32 4294967295, %s3888_s11   ;;  %s3965_s13 = sadd.s32 1, %s3888_s11   ;;  %s3888_s11 = sphi %s3952_s11, %s5265_s11   ;;  %s3884_s10 = sphi %s3950_s10, %s5264_s10   ;;  %s3880_s30 = sphi %s3948_s30, %s5263_s30  }
   0x3   : > { %s24_s14 = ssub.s32 %s3888_s11, %s3965_s13  ;;  %s27_s15 = sadd.s32 1, %s3884_s10 }
   0x4   : > { %p25_p0 = scmp.eq.s32.totalorder %s24_s14, 0  ;;  %p34_p1 = scmp.ne.s32.totalorder %s3884_s10, %s3880_s30 }
   0x5   : > { %p35_p2 = scmp.eq.s32.totalorder %s3888_s11, 0  ;;  %p3152_p4 = scmp.ge.s32.totalorder %s3888_s11, 2 }
   0x6   : > { %s3974_s16 = scalar_select %p25_p0, %s3884_s10, %s27_s15  }
   0x7   : > { %p36_p3 = por %p35_p2, %p34_p1  ;;  %282 = sbr.rel (%p3152_p4) target bundleno = 37 (0x25), region = 40 }
   0xc   : > { %285 = sbr.rel (!%p36_p3) target bundleno = 37 (0x25), region = 44  ;;  %s287_s17 = sand.u32 (%p36_p3), 1, %s3884_s10  }
   0xd   : > { %s3828_s18 = smul.u32 (%p36_p3), 60, %s3888_s11 }
   0xe   : > { %s3827_s19 = smul.u32 (%p36_p3), 120, %s287_s17 }
   0xf   : > { %s3982_s22 = scalar_lea.vmem (%p36_p3), %s5232_s0, %s3828_s18 }
  0x10   : > { %v307_v0 = vld [vmem:[%s3982_s22] sm:$0xff] (%p36_p3)  ;;  %v309_v1 = vld [vmem:[%s3982_s22 + $0xc] sm:$0xff] (%p36_p3)  ;;  %v311_v2 = vld [vmem:[%s3982_s22 + $0x18] sm:$0xff] (%p36_p3)  ;;  %s3987_s23 = scalar_lea.vmem (%p36_p3), [#allocation7], %s3827_s19 }
  0x11   : > { %308 = vst [vmem:[%s3987_s23] sm:$0xff] %v307_v0  ;;  %v313_v3 = vld [vmem:[%s3982_s22 + $0x24] sm:$0xff]  ;;  %v315_v4 = vld [vmem:[%s3982_s22 + $0x30] sm:$0xff]  ;;  %v317_v5 = vld [vmem:[%s3982_s22 + $0x78] sm:$0xff] }
  0x12   : > { %310 = vst [vmem:[%s3987_s23 + $0xc] sm:$0xff] %v309_v1  ;;  %v319_v6 = vld [vmem:[%s3982_s22 + $0x84] sm:$0xff]  ;;  %v321_v7 = vld [vmem:[%s3982_s22 + $0x90] sm:$0xff]  ;;  %v323_v8 = vld [vmem:[%s3982_s22 + $0x9c] sm:$0xff] }
  0x13   : > { %312 = vst [vmem:[%s3987_s23 + $0x18] sm:$0xff] %v311_v2  ;;  %v325_v9 = vld [vmem:[%s3982_s22 + $0xa8] sm:$0xff]  ;;  %v3156_v11 = vld [vmem:[%s3982_s22 + $0x14] sm:$0xf]  ;;  %v3158_v12 = vld [vmem:[%s3982_s22 + $0x20] sm:$0xf] }
  0x14   : > { %314 = vst [vmem:[%s3987_s23 + $0x24] sm:$0xff] %v313_v3  ;;  %v3154_v10 = vld [vmem:[%s3982_s22 + $0x8] sm:$0xf]  ;;  %v3160_v13 = vld [vmem:[%s3982_s22 + $0x2c] sm:$0xf] }
  0x15   : > { %316 = vst [vmem:[%s3987_s23 + $0x30] sm:$0xff] %v315_v4  ;;  %v3162_v14 = vld [vmem:[%s3982_s22 + $0x38] sm:$0xf]  ;;  %v3164_v15 = vld [vmem:[%s3982_s22 + $0x80] sm:$0xf] }
  0x16   : > { %318 = vst [vmem:[%s3987_s23 + $0x3c] sm:$0xff] %v317_v5  ;;  %v3166_v16 = vld [vmem:[%s3982_s22 + $0x8c] sm:$0xf]  ;;  %v3168_v17 = vld [vmem:[%s3982_s22 + $0x98] sm:$0xf] }
  0x17   : > { %320 = vst [vmem:[%s3987_s23 + $0x48] sm:$0xff] %v319_v6  ;;  %v3170_v18 = vld [vmem:[%s3982_s22 + $0xa4] sm:$0xf]  ;;  %v3172_v19 = vld [vmem:[%s3982_s22 + $0xb0] sm:$0xf] }
  0x18   : > { %322 = vst [vmem:[%s3987_s23 + $0x54] sm:$0xff] %v321_v7 }
  0x19   : > { %324 = vst [vmem:[%s3987_s23 + $0x60] sm:$0xff] %v323_v8 }
  0x1a   : > { %326 = vst [vmem:[%s3987_s23 + $0x6c] sm:$0xff] %v325_v9 }
  0x1b   : > { %3155 = vst [vmem:[%s3987_s23 + $0x8] sm:$0xf] %v3154_v10 }
  0x1c   : > { %3157 = vst [vmem:[%s3987_s23 + $0x14] sm:$0xf] %v3156_v11 }
  0x1d   : > { %3159 = vst [vmem:[%s3987_s23 + $0x20] sm:$0xf] %v3158_v12 }
  0x1e   : > { %3161 = vst [vmem:[%s3987_s23 + $0x2c] sm:$0xf] %v3160_v13 }
  0x1f   : > { %3163 = vst [vmem:[%s3987_s23 + $0x38] sm:$0xf] %v3162_v14 }
  0x20   : > { %3165 = vst [vmem:[%s3987_s23 + $0x44] sm:$0xf] %v3164_v15 }
  0x21   : > { %3167 = vst [vmem:[%s3987_s23 + $0x50] sm:$0xf] %v3166_v16 }
  0x22   : > { %3169 = vst [vmem:[%s3987_s23 + $0x5c] sm:$0xf] %v3168_v17 }
  0x23   : > { %3171 = vst [vmem:[%s3987_s23 + $0x68] sm:$0xf] %v3170_v18 }
  0x24   : > { %3173 = vst [vmem:[%s3987_s23 + $0x74] sm:$0xf] %v3172_v19 }
  0x25 PF: > { %p3174_p5 = scmp.ge.s32.totalorder %s3888_s11, 1  ;;  %p359_p6 = scmp.lt.s32.totalorder %s3888_s11, 3 }
  0x27   : > { %p360_p7 = pnand %p3174_p5, %p359_p6 }
  0x28   : > { %s366_s24 = sand.u32 (!%p360_p7), 1, %s3880_s30   ;;  %s3890_s27 = smov (!%p360_p7), 48  }
  0x29   : > { %363 = sbr.rel (%p360_p7) target bundleno = 1466 (0x5ba), region = 70  ;;  %s3891_s28 = smov (!%p360_p7), 96  }
  0x2a   : > { %s3829_s25 = smul.u32 (!%p360_p7), 120, %s366_s24  ;;  %s3892_s29 = smov (!%p360_p7), 64  }
  0x2b   : > { %s3893_s30 = smov (!%p360_p7), 16   ;;  %s3894_s14 = smov (!%p360_p7), 32  }
  0x2c   : > { %s4033_s26 = scalar_lea.vmem (!%p360_p7), [#allocation7], %s3829_s25  ;;  %s3895_s18 = smov (!%p360_p7), 112  }
  0x2d   : > { %s3896_s25 = smov (!%p360_p7), 80   ;;  %p411_p8 = scmp.lt.s32.totalorder (!%p360_p7), %s3149_s12, 1 }
  0x2e   : > { %vm848_vm0 = vcmask 1041408   ;;  %vm849_vm1 = vcmask 1045508   ;;  %v838_v21 = vld [vmem:[%s4033_s26] sm:$0xc]  ;;  %v839_v22 = vld [vmem:[%s4033_s26 + $0xc] sm:$0xf] }
  0x2f   : > { %vm4029_vm2 = vmor %vm848_vm0, %vm849_vm1  ;;  %v3181_v23 = vld [vmem:[%s4033_s26 + $0x3c] sm:$0xf]  ;;  %v3213_v24 = vrot.slane %v838_v21, 10  ;;  %v853_v25 = vrot.slane %v839_v22, 6  ;;  %v840_v26 = vld [vmem:[%s4033_s26 + $0x18] sm:$0xf] }
  0x30   : > { %636 = vrot.lane.b32.xlu1 %v3181_v23, %s3890_s27  ;;  %v856_v28 = vrot.slane %v840_v26, 6  ;;  %v841_v29 = vld [vmem:[%s4033_s26 + $0x24] sm:$0xf]  ;;  %v3182_v33 = vld [vmem:[%s4033_s26 + $0x48] sm:$0xf]  ;;  %v3739_v22 = vld [vmem:[%s5233_s1 + $0x30] sm:$0xff] }
  0x31   : > { %v854_v27 = vsel %vm4029_vm2, %v3213_v24, %v853_v25  ;;  %v855_v30 = vrot.slane %v853_v25, 4  ;;  %v859_v32 = vrot.slane %v841_v29, 6  ;;  %v842_v34 = vld [vmem:[%s4033_s26 + $0x30] sm:$0x3]  ;;  %v3184_v40 = vld [vmem:[%s4033_s26 + $0x60] sm:$0xf] }
  0x32   : > { %864 = vrot.lane.b32.xlu0 %v854_v27, %s3891_s28  ;;  %v858_v31 = vrot.slane %v856_v28, 4  ;;  %v862_v38 = vrot.slane %v842_v34, 6  ;;  %v893_v41 = vld [vmem:[%s4033_s26 + $0xc] sm:$0xf]  ;;  %v892_v42 = vld [vmem:[%s4033_s26] sm:$0xc] }
  0x33   : > { %v857_v36 = vsel %vm4029_vm2, %v855_v30, %v856_v28  ;;  %v861_v37 = vrot.slane %v859_v32, 4  ;;  %v3183_v43 = vld [vmem:[%s4033_s26 + $0x54] sm:$0xf]  ;;  %v904_v44 = vrot.slane %v893_v41, 6  ;;  %v3214_v45 = vrot.slane %v892_v42, 10  ;;  %v3740_v13 = vld [vmem:[%s5233_s1 + $0x38] sm:$0xff] }
  0x34   : > { %v860_v35 = vsel %vm4029_vm2, %v858_v31, %v859_v32  ;;  %v894_v46 = vld [vmem:[%s4033_s26 + $0x18] sm:$0xf]  ;;  %v458_v50 = vld [vmem:[%s4033_s26] sm:$0xf]  ;;  %v459_v52 = vld [vmem:[%s4033_s26 + $0xc] sm:$0xf]  ;;  %1491 = vmatpush.bf16.msra.mxu0 %v3740_v13  ;;  %3818 = vmatpush.bf16.msra.mxu3 %v3740_v13 }
  0x35   : > { %868 = vrot.lane.b32.xlu2 %v860_v35, %s3891_s28  ;;  %v863_v39 = vsel %vm4029_vm2, %v861_v37, %v862_v38  ;;  %v906_v47 = vrot.slane %v904_v44, 4  ;;  %v907_v48 = vrot.slane %v894_v46, 6  ;;  %v905_v49 = vsel %vm4029_vm2, %v3214_v45, %v904_v44  ;;  %v3186_v53 = vld [vmem:[%s4033_s26 + $0x48] sm:$0xf]  ;;  %v895_v54 = vld [vmem:[%s4033_s26 + $0x24] sm:$0xf] }
  0x36   : > { %v3185_v55 = vld [vmem:[%s4033_s26 + $0x3c] sm:$0xf]  ;;  %v910_v56 = vrot.slane %v895_v54, 6  ;;  %v896_v58 = vld [vmem:[%s4033_s26 + $0x30] sm:$0x3]  ;;  %vm453_vm3 = vcmask 388096  }
  0x37   : > { %v908_v51 = vsel %vm4029_vm2, %v906_v47, %v907_v48  ;;  %v909_v57 = vrot.slane %v907_v48, 4  ;;  %v913_v60 = vrot.slane %v896_v58, 6  ;;  %v460_v62 = vld [vmem:[%s4033_s26 + $0x18] sm:$0xf]  ;;  %v461_v0 = vld [vmem:[%s4033_s26 + $0x24] sm:$0xf] }
  0x38   : > { %638 = vrot.lane.b32.xlu1 %v3182_v33, %s3890_s27  ;;  %v912_v59 = vrot.slane %v910_v56, 4  ;;  %v3188_v1 = vld [vmem:[%s4033_s26 + $0x60] sm:$0xf]  ;;  %v941_v2 = vld [vmem:[%s4033_s26 + $0xc] sm:$0xf]  ;;  %1492 = vmatpush.bf16.msra.mxu0 %v3739_v22  ;;  %v4153_v38 = vld [vmem:[%s4033_s26 + $0x24] sm:$0xff] }
  0x39   : > { %v911_v61 = vsel %vm4029_vm2, %v909_v57, %v910_v56  ;;  %v940_v3 = vld [vmem:[%s4033_s26] sm:$0xc]  ;;  %v3187_v4 = vld [vmem:[%s4033_s26 + $0x54] sm:$0xf]  ;;  %v952_v5 = vrot.slane %v941_v2, 6  ;;  %3819 = vmatpush.bf16.msra.mxu3 %v3739_v22  ;;  %v4165_v44 = vld [vmem:[%s4033_s26 + $0x18] sm:$0xff] }
  0x3a   : > { %866 = vrot.lane.b32.xlu0 %v857_v36, %s3891_s28  ;;  %v914_v63 = vsel %vm4029_vm2, %v912_v59, %v913_v60  ;;  %v3215_v6 = vrot.slane %v940_v3, 10  ;;  %v942_v7 = vld [vmem:[%s4033_s26 + $0x18] sm:$0xf]  ;;  %v482_v11 = vld [vmem:[%s4033_s26] sm:$0xf]  ;;  %v3738_v27 = vld [vmem:[%s5233_s1 + $0x28] sm:$0xff] }
  0x3b   : > { %v954_v8 = vrot.slane %v952_v5, 4  ;;  %v955_v9 = vrot.slane %v942_v7, 6  ;;  %v483_v14 = vld [vmem:[%s4033_s26 + $0xc] sm:$0xf]  ;;  %v3190_v15 = vld [vmem:[%s4033_s26 + $0x48] sm:$0xf] }
  0x3c   : > { %v953_v10 = vsel %vm4029_vm2, %v3215_v6, %v952_v5  ;;  %v943_v16 = vld [vmem:[%s4033_s26 + $0x24] sm:$0xf]  ;;  %v3189_v17 = vld [vmem:[%s4033_s26 + $0x3c] sm:$0xf]  ;;  %v944_v21 = vld [vmem:[%s4033_s26 + $0x30] sm:$0x3]  ;;  %1493 = vmatpush.bf16.msra.mxu0 %v3738_v27 }
  0x3d   : > { %870 = vrot.lane.b32.xlu2 %v863_v39, %s3891_s28  ;;  %v956_v12 = vsel %vm4029_vm2, %v954_v8, %v955_v9  ;;  %v958_v18 = vrot.slane %v943_v16, 6  ;;  %v957_v19 = vrot.slane %v955_v9, 4  ;;  %v961_v24 = vrot.slane %v944_v21, 6  ;;  %v484_v26 = vld [vmem:[%s4033_s26 + $0x18] sm:$0xf]  ;;  %3820 = vmatpush.bf16.msra.mxu3 %v3738_v27  ;;  %v3193_v32 = vld [vmem:[%s4033_s26 + $0x3c] sm:$0xff] }
  0x3e   : > { %v485_v29 = vld [vmem:[%s4033_s26 + $0x24] sm:$0xf]  ;;  %v3192_v30 = vld [vmem:[%s4033_s26 + $0x60] sm:$0xf]  ;;  %v3191_v31 = vld [vmem:[%s4033_s26 + $0x54] sm:$0xf] }
  0x3f   : > { %v960_v23 = vrot.slane %v958_v18, 4  ;;  %v959_v25 = vsel %vm4029_vm2, %v957_v19, %v958_v18  ;;  %v506_v33 = vld [vmem:[%s4033_s26] sm:$0xff]  ;;  %v4144_v36 = vld [vmem:[%s4033_s26 + $0xc] sm:$0xff]  ;;  %v1020_v57 = vld [vmem:[%s4033_s26 + $0x1c] sm:$0xf]  ;;  %vm648_vm4 = vcmask 781696  }
  0x40   : > { %642 = vrot.lane.b32.xlu1 %v3184_v40, %s3890_s27  ;;  %v449_v34 = vld [vmem:[%s4033_s26] sm:$0xf]  ;;  %v1018_v39 = vld [vmem:[%s4033_s26 + $0x4] sm:$0xc]  ;;  %v3194_v40 = vld [vmem:[%s4033_s26 + $0x48] sm:$0xff]  ;;  %v1033_v59 = vrot.slane %v1020_v57, 6 }
  0x41   : > { %v962_v28 = vsel %vm4029_vm2, %v960_v23, %v961_v24  ;;  %v3737_v35 = vld [vmem:[%s5233_s1 + $0x20] sm:$0xff]  ;;  %454 = vst.msk [vmem:[#allocation4] sm:$0xf] %vm453_vm3, %v449_v34  ;;  %v3736_v37 = vld [vmem:[%s5233_s1 + $0x18] sm:$0xff]  ;;  %v1019_v41 = vld [vmem:[%s4033_s26 + $0x10] sm:$0xf] }
  0x42   : > { %640 = vrot.lane.b32.xlu0 %v3183_v43, %s3890_s27  ;;  %1494 = vmatpush.bf16.msra.mxu0 %v3737_v35  ;;  %v450_v42 = vld [vmem:[%s4033_s26 + $0xc] sm:$0xf]  ;;  %v3735_v43 = vld [vmem:[%s5233_s1 + $0x10] sm:$0xff]  ;;  %v3217_v45 = vrot.slane %v1018_v39, 10  ;;  %v1030_v46 = vrot.slane %v1019_v41, 6  ;;  %vm885_vm5 = vcmask 1044224  }
  0x43   : > { %3821 = vmatpush.bf16.msra.mxu3 %v3737_v35  ;;  %455 = vst.msk [vmem:[#allocation4 + $0x8] sm:$0xf] %vm453_vm3, %v450_v42  ;;  %v3734_v48 = vld [vmem:[%s5233_s1 + $0x8] sm:$0xff]  ;;  %v3741_v54 = vld [vmem:[%s5233_s1 + $0x40] sm:$0xff]  ;;  %vm886_vm6 = vcmask 130052   ;;  %v1035_v5 = vrot.slane %v1033_v59, 4 }
  0x44   : > { %1587 = vmatpush.bf16.msra.mxu1 %v3741_v54  ;;  %3826 = vmatpush.bf16.msra.mxu2 %v3741_v54  ;;  %v1032_v58 = vrot.slane %v1030_v46, 4  ;;  %v3198_v60 = vld [vmem:[%s4033_s26 + $0x4c] sm:$0xf]  ;;  %vm876_vm7 = vcmask 785408   ;;  %v3199_v9 = vld [vmem:[%s4033_s26 + $0x58] sm:$0xf]  ;;  %vm4211_vm8 = vmor %vm886_vm6, %vm885_vm5 }
  0x45   : > { %915 = vrot.lane.b32.xlu2 %v905_v49, %s3892_s29  ;;  %v451_v49 = vld [vmem:[%s4033_s26 + $0x18] sm:$0xf]  ;;  %v3200_v27 = vld [vmem:[%s4033_s26 + $0x64] sm:$0xf]  ;;  %v1068_v35 = vld [vmem:[%s4033_s26 + $0x28] sm:$0xf] }
  0x46   : > { %1495 = vmatpush.bf16.msra.mxu0 %v3736_v37  ;;  %456 = vst.msk [vmem:[#allocation4 + $0x10] sm:$0xf] %vm453_vm3, %v451_v49  ;;  %v1083_v41 = vrot.slane %v1068_v35, 6  ;;  %v547_v42 = vld [vmem:[%s4033_s26 + $0x4] sm:$0xf]  ;;  %vm1442_vm9 = vcmask 130048  }
  0x47   : > { %3822 = vmatpush.bf16.msra.mxu3 %v3736_v37  ;;  %vm927_vm10 = vcmask 523264   ;;  %vm526_vm11 = vcmask 261120   ;;  %vm721_vm12 = vcmask 654336   ;;  %s5267_s12 = smov (!%p411_p8, %s3149_s12), 1  ;;  %vm1701_vm13 = vcmask 257024  }
  0x48   : > { %466 = vrot.lane.b32.xlu1 %v458_v50, %s3891_s28  ;;  %v452_v50 = vld [vmem:[%s4033_s26 + $0x24] sm:$0xf]  ;;  %vm1739_vm14 = vcmask 517376   ;;  %vm1771_vm15 = vcmask 519426   ;;  %vm1753_vm0 = vcmask 254976   ;;  %vm1777_vm1 = vcmask 257026  }
  0x49   : > { %457 = vst.msk [vmem:[#allocation4 + $0x18] sm:$0xf] %vm453_vm3, %v452_v50  ;;  %vm1775_vm6 = vcmask 1044226  }
  0x4a   : > { %917 = vrot.lane.b32.xlu0 %v908_v51, %s3892_s29  ;;  %1496 = vmatpush.bf16.msra.mxu0 %v3735_v43  ;;  %v1031_v51 = vsel %vm4029_vm2, %v3217_v45, %v1030_v46 }
  0x4b   : > { %3823 = vmatpush.bf16.msra.mxu3 %v3735_v43  ;;  %v1069_v43 = vld [vmem:[%s4033_s26 + $0x34] sm:$0x3] }
  0x4d   : > { %468 = vrot.lane.b32.xlu2 %v459_v52, %s3891_s28  ;;  %v3195_v52 = vld [vmem:[%s4033_s26 + $0x54] sm:$0xff] }
  0x4e   : > { %1497 = vmatpush.bf16.msra.mxu0 %v3734_v48 }
  0x4f   : > { %3824 = vmatpush.bf16.msra.mxu3 %v3734_v48 }
  0x50   : > { %663 = vrot.lane.b32.xlu1 %v3186_v53, %s3893_s30  ;;  %v3733_v53 = vld [vmem:[%s5233_s1] sm:$0xff] }
  0x52   : > { %661 = vrot.lane.b32.xlu0 %v3185_v55, %s3893_s30  ;;  %v3196_v55 = vld [vmem:[%s4033_s26 + $0x60] sm:$0xff]  ;;  %1498 = vmatpush.bf16.msra.mxu0 %v3733_v53 }
  0x53   : > { %3825 = vmatpush.bf16.msra.mxu3 %v3733_v53  ;;  %v1086_v53 = vrot.slane %v1069_v43, 6 }
  0x55   : > { %919 = vrot.lane.b32.xlu2 %v911_v61, %s3892_s29  ;;  %v1021_v61 = vld [vmem:[%s4033_s26 + $0x28] sm:$0xf] }
  0x58   : > { %470 = vrot.lane.b32.xlu1 %v460_v62, %s3891_s28  ;;  %v1034_v62 = vsel %vm4029_vm2, %v1032_v58, %v1033_v59  ;;  %v3202_v59 = vld [vmem:[%s4033_s26 + $0x4c] sm:$0xf] }
  0x5a   : > { %921 = vrot.lane.b32.xlu0 %v914_v63, %s3892_s29  ;;  %v3197_v63 = vld [vmem:[%s4033_s26 + $0x40] sm:$0xf] }
  0x5d   : > { %472 = vrot.lane.b32.xlu2 %v461_v0, %s3891_s28  ;;  %v1036_v0 = vrot.slane %v1021_v61, 6 }
  0x5f   : > { %v1038_v6 = vrot.slane %v1036_v0, 4 }
  0x60   : > { %667 = vrot.lane.b32.xlu1 %v3188_v1, %s3893_s30  ;;  %v1022_v1 = vld [vmem:[%s4033_s26 + $0x34] sm:$0x3] }
  0x61   : > { %v1039_v7 = vrot.slane %v1022_v1, 6  ;;  %v1113_v1 = vld [vmem:[%s4033_s26 + $0x10] sm:$0xf] }
  0x62   : > { %665 = vrot.lane.b32.xlu0 %v3187_v4, %s3893_s30  ;;  %v1066_v4 = vld [vmem:[%s4033_s26 + $0x10] sm:$0xf] }
  0x63   : > { %v1040_v16 = vsel %vm4029_vm2, %v1038_v6, %v1039_v7  ;;  %v1124_v6 = vrot.slane %v1113_v1, 6  ;;  %v4281_v7 = vld [vmem:[%s4033_s26 + $0x1c] sm:$0xf] }
  0x65   : > { %963 = vrot.lane.b32.xlu2 %v953_v10, %s3894_s14  ;;  %v1077_v10 = vrot.slane %v1066_v4, 6 }
  0x67   : > { %v1079_v18 = vrot.slane %v1077_v10, 4 }
  0x68   : > { %490 = vrot.lane.b32.xlu1 %v482_v11, %s3892_s29  ;;  %v1037_v11 = vsel %vm4029_vm2, %v1035_v5, %v1036_v0  ;;  %v3203_v5 = vld [vmem:[%s4033_s26 + $0x58] sm:$0xf] }
  0x6a   : > { %965 = vrot.lane.b32.xlu0 %v956_v12, %s3894_s14 }
  0x6d   : > { %492 = vrot.lane.b32.xlu2 %v483_v14, %s3892_s29  ;;  %v1067_v14 = vld [vmem:[%s4033_s26 + $0x1c] sm:$0xf] }
  0x6e   : > { %v1080_v19 = vrot.slane %v1067_v14, 6 }
  0x70   : > { %687 = vrot.lane.b32.xlu1 %v3190_v15, %s3895_s18  ;;  %v1082_v57 = vrot.slane %v1080_v19, 4 }
  0x72   : > { %685 = vrot.lane.b32.xlu0 %v3189_v17, %s3895_s18  ;;  %v1065_v17 = vld [vmem:[%s4033_s26 + $0x4] sm:$0xc] }
  0x73   : > { %v3218_v23 = vrot.slane %v1065_v17, 10  ;;  %v1126_v17 = vrot.slane %v1124_v6, 4 }
  0x75   : > { %967 = vrot.lane.b32.xlu2 %v959_v25, %s3894_s14 }
  0x78   : > { %494 = vrot.lane.b32.xlu1 %v484_v26, %s3892_s29  ;;  %v1081_v26 = vsel %vm4029_vm2, %v1079_v18, %v1080_v19  ;;  %v1127_v18 = vrot.slane %v4281_v7, 6 }
  0x7a   : > { %969 = vrot.lane.b32.xlu0 %v962_v28, %s3894_s14 }
  0x7d   : > { %496 = vrot.lane.b32.xlu2 %v485_v29, %s3892_s29 }
  0x80   : > { %691 = vrot.lane.b32.xlu1 %v3192_v30, %s3895_s18 }
  0x82   : > { %689 = vrot.lane.b32.xlu0 %v3191_v31, %s3895_s18  ;;  %v1078_v31 = vsel %vm4029_vm2, %v3218_v23, %v1077_v10 }
  0x85   : > { %514 = vrot.lane.b32.xlu2 %v506_v33, %s3894_s14 }
  0x88   : > { %709 = vrot.lane.b32.xlu1 %v3193_v32, %s3896_s25 }
  0x8a   : > { %516 = vrot.lane.b32.xlu0 %v4144_v36, %s3894_s14 }
  0x8d   : > { %711 = vrot.lane.b32.xlu2 %v3194_v40, %s3896_s25  ;;  %v3201_v40 = vld [vmem:[%s4033_s26 + $0x40] sm:$0xf] }
  0x8f   : > { %v4169_v47 = vpop.permute.xlu2 %868 }
  0x90   : > { %520 = vrot.lane.b32.xlu1 %v4153_v38, %s3894_s14  ;;  %v874_v29 = vrot.slane %v4169_v47, 4 }
  0x92   : > { %518 = vrot.lane.b32.xlu0 %v4165_v44, %s3894_s14  ;;  %v879_v37 = vsel %vm876_vm7, %v874_v29, %v4169_v47 }
  0x95   : > { %713 = vrot.lane.b32.xlu2 %v3195_v52, %s3896_s25  ;;  %v1085_v52 = vrot.slane %v1083_v41, 4 }
  0x97   : > { %v871_v56 = vpop.permute.xlu2 %870  ;;  %v1087_v58 = vsel %vm4029_vm2, %v1085_v52, %v1086_v53 }
  0x98   : > { %1041 = vrot.lane.b32.xlu1 %v1031_v51, %s3891_s28  ;;  %v875_v25 = vrot.slane %v871_v56, 4  ;;  %v548_v51 = vld [vmem:[%s4033_s26 + $0x10] sm:$0xf] }
  0x9a   : > { %715 = vrot.lane.b32.xlu0 %v3196_v55, %s3896_s25  ;;  %v880_v32 = vsel %vm876_vm7, %v875_v25, %v871_v56  ;;  %v1128_v25 = vsel %vm4029_vm2, %v1126_v17, %v1127_v18 }
  0x9d   : > { %1043 = vrot.lane.b32.xlu2 %v1034_v62, %s3891_s28 }
  0x9f   : > { %v4202_v2 = vpop.permute.xlu2 %915 }
  0xa0   : > { %744 = vrot.lane.b32.xlu1 %v3198_v60, %s3890_s27  ;;  %v923_v61 = vrot.slane %v4202_v2, 4 }
  0xa2   : > { %v637_v3 = vpop.permute.xlu1 %636  ;;  %742 = vrot.lane.b32.xlu0 %v3197_v63, %s3890_s27  ;;  %v1084_v63 = vsel %vm4029_vm2, %v1082_v57, %v1083_v41  ;;  %v928_v4 = vsel %vm927_vm10, %v923_v61, %v4202_v2 }
  0xa3   : > { %649 = vst.msk [vmem:[#allocation4] sm:$0xf] %vm648_vm4, %v637_v3 }
  0xa4   : > { %v865_v8 = vpop.permute.xlu0 %864 }
  0xa5   : > { %v872_v12 = vrot.slane %v865_v8, 4  ;;  %1045 = vrot.lane.b32.xlu2 %v1037_v11, %s3891_s28  ;;  %v549_v11 = vld [vmem:[%s4033_s26 + $0x1c] sm:$0xf] }
  0xa7   : > { %v877_v15 = vsel %vm876_vm7, %v872_v12, %v865_v8  ;;  %v469_v21 = vpop.permute.xlu2 %468 }
  0xa8   : > { %746 = vrot.lane.b32.xlu1 %v3199_v9, %s3890_s27  ;;  %888 = vst.msk [vmem:[#allocation4] sm:$0xff] %vm4211_vm8, %v877_v15 }
  0xa9   : > { %479 = vst.msk [vmem:[#allocation4 + $0x28] sm:$0xf] %vm453_vm3, %v469_v21 }
  0xaa   : > { %v639_v22 = vpop.permute.xlu1 %638  ;;  %1047 = vrot.lane.b32.xlu0 %v1040_v16, %s3891_s28  ;;  %v550_v16 = vld [vmem:[%s4033_s26 + $0x28] sm:$0xf] }
  0xab   : > { %650 = vst.msk [vmem:[#allocation4 + $0x8] sm:$0xf] %vm648_vm4, %v639_v22  ;;  %v1112_v22 = vld [vmem:[%s4033_s26 + $0x4] sm:$0xc] }
  0xac   : > { %v867_v24 = vpop.permute.xlu0 %866 }
  0xad   : > { %v873_v28 = vrot.slane %v867_v24, 4  ;;  %748 = vrot.lane.b32.xlu2 %v3200_v27, %s3890_s27  ;;  %s3699_s27 = sshll.u32 %s5267_s12, 5 }
  0xae   : > { %s5020_s11 = scalar_lea.vmem %s5240_s8, %s3699_s27 }
  0xaf   : > { %v878_v30 = vsel %vm876_vm7, %v873_v28, %v867_v24  ;;  %v4239_v33 = vpop.permute.xlu2 %919  ;;  %v3223_v45 = vld [vmem:[#allocation4] sm:$0xf]  ;;  %v3701_v47 = vld [vmem:[#allocation4 + $0x4] sm:$0xf]  ;;  %v3219_v24 = vrot.slane %v1112_v22, 10 }
  0xb0   : > { %1090 = vrot.lane.b32.xlu1 %v1081_v26, %s3892_s29  ;;  %889 = vst.msk [vmem:[#allocation4 + $0x8] sm:$0xff] %vm4211_vm8, %v878_v30  ;;  %v3204_v26 = vld [vmem:[%s4033_s26 + $0x64] sm:$0xf]  ;;  %v925_v28 = vrot.slane %v4239_v33, 4 }
  0xb1   : > { %v1125_v30 = vsel %vm4029_vm2, %v3219_v24, %v1124_v6  ;;  %v573_v6 = vld [vmem:[%s4033_s26 + $0x1c] sm:$0xf] }
  0xb2   : > { %v643_v34 = vpop.permute.xlu1 %642  ;;  %1088 = vrot.lane.b32.xlu0 %v1078_v31, %s3892_s29  ;;  %v930_v35 = vsel %vm927_vm10, %v925_v28, %v4239_v33  ;;  %v987_v28 = vld [vmem:[%s4033_s26] sm:$0xcc] }
  0xb3   : > { %652 = vst.msk [vmem:[#allocation4 + $0x18] sm:$0xf] %vm648_vm4, %v643_v34 }
  0xb4   : > { %891 = vst.msk [vmem:[#allocation4 + $0x18] sm:$0xff] %vm4211_vm8, %v880_v32  ;;  %v641_v39 = vpop.permute.xlu0 %640  ;;  %v1115_v32 = vld [vmem:[%s4033_s26 + $0x28] sm:$0xf] }
  0xb5   : > { %651 = vst.msk [vmem:[#allocation4 + $0x10] sm:$0xf] %vm648_vm4, %v641_v39  ;;  %555 = vrot.lane.b32.xlu2 %v547_v42, %s3891_s28  ;;  %v1130_v39 = vrot.slane %v1115_v32, 6  ;;  %v999_v32 = vrot.slane %v4144_v36, 6 }
  0xb6   : > { %890 = vst.msk [vmem:[#allocation4 + $0x10] sm:$0xff] %vm4211_vm8, %v879_v37  ;;  %v3205_v37 = vld [vmem:[%s4033_s26 + $0x40] sm:$0xf] }
  0xb7   : > { %v3702_v46 = vld [vmem:[#allocation4 + $0x4] sm:$0xf0]  ;;  %v3225_v48 = vld [vmem:[#allocation4 + $0x8] sm:$0xf0]  ;;  %v473_v54 = vpop.permute.xlu2 %472 }
  0xb8   : > { %766 = vrot.lane.b32.xlu1 %v3201_v40, %s3893_s30  ;;  %v3224_v49 = vor.u32 %v3702_v46, %v3223_v45  ;;  %v3228_v50 = vor.u32 %v3701_v47, %v3225_v48  ;;  %481 = vst.msk [vmem:[#allocation4 + $0x38] sm:$0xf] %vm453_vm3, %v473_v54  ;;  %v1116_v40 = vld [vmem:[%s4033_s26 + $0x34] sm:$0x3]  ;;  %v571_v45 = vld [vmem:[%s4033_s26 + $0x4] sm:$0xf] }
  0xb9   : > { %v3206_v54 = vld [vmem:[%s4033_s26 + $0x4c] sm:$0xf] }
  0xba   : > { %v467_v55 = vpop.permute.xlu1 %466  ;;  %1499 = vmatmul.bf16.vlgmr.msra.gmra.mxu0 %v3224_v49  ;;  %3385 = vmatmul.msk.bf16.vlgmr.msra.gmra.mxu1 %vm1442_vm9, %v3228_v50  ;;  %v572_v49 = vld [vmem:[%s4033_s26 + $0x10] sm:$0xf]  ;;  %v1132_v50 = vrot.slane %v1130_v39, 4 }
  0xbb   : > { %478 = vst.msk [vmem:[#allocation4 + $0x20] sm:$0xf] %vm453_vm3, %v467_v55  ;;  %557 = vrot.lane.b32.xlu0 %v548_v51, %s3891_s28  ;;  %v3704_v9 = vld [vmem:[#allocation4 + $0x14] sm:$0xf0]  ;;  %v3233_v10 = vld [vmem:[#allocation4 + $0x18] sm:$0xf0] }
  0xbc   : > { %v918_v56 = vpop.permute.xlu0 %917  ;;  %v1133_v51 = vrot.slane %v1116_v40, 6 }
  0xbd   : > { %v924_v60 = vrot.slane %v918_v56, 4  ;;  %768 = vrot.lane.b32.xlu2 %v3202_v59, %s3893_s30  ;;  %v3231_v12 = vld [vmem:[#allocation4 + $0x10] sm:$0xf]  ;;  %v3703_v14 = vld [vmem:[#allocation4 + $0x14] sm:$0xf] }
  0xbe   : > { %v3232_v2 = vor.u32 %v3704_v9, %v3231_v12  ;;  %v3236_v15 = vor.u32 %v3703_v14, %v3233_v10  ;;  %v1134_v57 = vsel %vm4029_vm2, %v1132_v50, %v1133_v51  ;;  %v574_v14 = vld [vmem:[%s4033_s26 + $0x28] sm:$0xf] }
  0xbf   : > { %v929_v62 = vsel %vm927_vm10, %v924_v60, %v918_v56  ;;  %v4270_v0 = vpop.permute.xlu2 %963  ;;  %v1129_v56 = vrot.slane %v1127_v18, 4 }
  0xc0   : > { %1094 = vrot.lane.b32.xlu1 %v1087_v58, %s3892_s29  ;;  %v971_v59 = vrot.slane %v4270_v0, 4 }
  0xc1   : > { %v1131_v61 = vsel %vm4029_vm2, %v1129_v56, %v1130_v39 }
  0xc2   : > { %v664_v3 = vpop.permute.xlu1 %663 }
  0xc3   : > { %674 = vst.msk [vmem:[#allocation4 + $0x28] sm:$0xf] %vm648_vm4, %v664_v3  ;;  %1092 = vrot.lane.b32.xlu0 %v1084_v63, %s3892_s29  ;;  %v975_v3 = vsel %vm526_vm11, %v971_v59, %v4270_v0 }
  0xc4   : > { %937 = vst.msk [vmem:[#allocation4 + $0x28] sm:$0xff] %vm4211_vm8, %v929_v62  ;;  %v662_v8 = vpop.permute.xlu0 %661 }
  0xc5   : > { %673 = vst.msk [vmem:[#allocation4 + $0x20] sm:$0xf] %vm648_vm4, %v662_v8  ;;  %559 = vrot.lane.b32.xlu2 %v549_v11, %s3891_s28 }
  0xc6   : > { %936 = vst.msk [vmem:[#allocation4 + $0x20] sm:$0xff] %vm4211_vm8, %v928_v4  ;;  %v3207_v4 = vld [vmem:[%s4033_s26 + $0x58] sm:$0xf] }
  0xc7   : > { %v493_v19 = vpop.permute.xlu2 %492 }
  0xc8   : > { %770 = vrot.lane.b32.xlu1 %v3203_v5, %s3893_s30  ;;  %503 = vst.msk [vmem:[#allocation4 + $0x48] sm:$0xf] %vm453_vm3, %v493_v19 }
  0xca   : > { %v471_v21 = vpop.permute.xlu1 %470  ;;  %1504 = vmatmul.bf16.gmra.mxu0 %v3232_v2  ;;  %3386 = vmatmul.msk.bf16.gmra.mxu1 %vm1442_vm9, %v3236_v15 }
  0xcb   : > { %480 = vst.msk [vmem:[#allocation4 + $0x30] sm:$0xf] %vm453_vm3, %v471_v21  ;;  %561 = vrot.lane.b32.xlu0 %v550_v16, %s3891_s28  ;;  %v3706_v42 = vld [vmem:[#allocation4 + $0x24] sm:$0xf0]  ;;  %v3241_v43 = vld [vmem:[#allocation4 + $0x28] sm:$0xf0] }
  0xcc   : > { %v922_v23 = vpop.permute.xlu0 %921  ;;  %v3208_v16 = vld [vmem:[%s4033_s26 + $0x64] sm:$0xf] }
  0xcd   : > { %v926_v27 = vrot.slane %v922_v23, 4  ;;  %772 = vrot.lane.b32.xlu2 %v3204_v26, %s3893_s30  ;;  %v3239_v46 = vld [vmem:[#allocation4 + $0x20] sm:$0xf]  ;;  %v3705_v47 = vld [vmem:[#allocation4 + $0x24] sm:$0xf] }
  0xce   : > { %v3240_v33 = vor.u32 %v3706_v42, %v3239_v46  ;;  %v3244_v48 = vor.u32 %v3705_v47, %v3241_v43  ;;  %v1001_v42 = vrot.slane %v999_v32, 4  ;;  %v1002_v43 = vrot.slane %v4165_v44, 6 }
  0xcf   : > { %v931_v29 = vsel %vm927_vm10, %v926_v27, %v922_v23  ;;  %v4305_v31 = vpop.permute.xlu2 %967 }
  0xd0   : > { %1137 = vrot.lane.b32.xlu1 %v1128_v25, %s3894_s14  ;;  %v973_v19 = vrot.slane %v4305_v31, 4  ;;  %v1003_v50 = vsel %vm4029_vm2, %v1001_v42, %v1002_v43 }
  0xd2   : > { %v668_v34 = vpop.permute.xlu1 %667  ;;  %v977_v24 = vsel %vm526_vm11, %v973_v19, %v4305_v31 }
  0xd3   : > { %676 = vst.msk [vmem:[#allocation4 + $0x38] sm:$0xf] %vm648_vm4, %v668_v34  ;;  %1135 = vrot.lane.b32.xlu0 %v1125_v30, %s3894_s14  ;;  %v3216_v34 = vrot.slane %v987_v28, 10 }
  0xd4   : > { %939 = vst.msk [vmem:[#allocation4 + $0x38] sm:$0xff] %vm4211_vm8, %v931_v29  ;;  %v666_v41 = vpop.permute.xlu0 %665 }
  0xd5   : > { %675 = vst.msk [vmem:[#allocation4 + $0x30] sm:$0xf] %vm648_vm4, %v666_v41  ;;  %579 = vrot.lane.b32.xlu2 %v571_v45, %s3892_s29  ;;  %v1000_v36 = vsel %vm4029_vm2, %v3216_v34, %v999_v32  ;;  %v539_v45 = vld [vmem:[%s4033_s26 + $0x4] sm:$0xf] }
  0xd6   : > { %938 = vst.msk [vmem:[#allocation4 + $0x30] sm:$0xff] %vm4211_vm8, %v930_v35 }
  0xd7   : > { %v497_v52 = vpop.permute.xlu2 %496  ;;  %543 = vst.msk [vmem:[#allocation4 + $0x80] sm:$0xf] %vm453_vm3, %v539_v45 }
  0xd8   : > { %790 = vrot.lane.b32.xlu1 %v3205_v37, %s3895_s18  ;;  %505 = vst.msk [vmem:[#allocation4 + $0x58] sm:$0xf] %vm453_vm3, %v497_v52  ;;  %v542_v52 = vld [vmem:[%s4033_s26 + $0x28] sm:$0xf] }
  0xd9   : > { %546 = vst.msk [vmem:[#allocation4 + $0x98] sm:$0xf] %vm453_vm3, %v542_v52 }
  0xda   : > { %v491_v53 = vpop.permute.xlu1 %490  ;;  %1509 = vmatmul.bf16.gmra.mxu0 %v3240_v33  ;;  %3387 = vmatmul.msk.bf16.gmra.mxu1 %vm1442_vm9, %v3244_v48  ;;  %v540_v33 = vld [vmem:[%s4033_s26 + $0x10] sm:$0xf] }
  0xdb   : > { %502 = vst.msk [vmem:[#allocation4 + $0x40] sm:$0xf] %vm453_vm3, %v491_v53  ;;  %581 = vrot.lane.b32.xlu0 %v572_v49, %s3892_s29  ;;  %v3708_v8 = vld [vmem:[#allocation4 + $0x34] sm:$0xf0]  ;;  %v3249_v9 = vld [vmem:[#allocation4 + $0x38] sm:$0xf0] }
  0xdc   : > { %v966_v55 = vpop.permute.xlu0 %965  ;;  %544 = vst.msk [vmem:[#allocation4 + $0x88] sm:$0xf] %vm453_vm3, %v540_v33 }
  0xdd   : > { %v972_v58 = vrot.slane %v966_v55, 4  ;;  %792 = vrot.lane.b32.xlu2 %v3206_v54, %s3895_s18  ;;  %v3247_v10 = vld [vmem:[#allocation4 + $0x30] sm:$0xf]  ;;  %v3707_v0 = vld [vmem:[#allocation4 + $0x34] sm:$0xf] }
  0xde   : > { %v3248_v11 = vor.u32 %v3708_v8, %v3247_v10  ;;  %v3252_v12 = vor.u32 %v3707_v0, %v3249_v9  ;;  %v541_v54 = vld [vmem:[%s4033_s26 + $0x1c] sm:$0xf] }
  0xdf   : > { %v976_v60 = vsel %vm526_vm11, %v972_v58, %v966_v55  ;;  %v515_v62 = vpop.permute.xlu2 %514  ;;  %v1004_v58 = vrot.slane %v1002_v43, 4  ;;  %545 = vst.msk [vmem:[#allocation4 + $0x90] sm:$0xf] %vm453_vm3, %v541_v54 }
  0xe0   : > { %1141 = vrot.lane.b32.xlu1 %v1134_v57, %s3894_s14  ;;  %v522_v1 = vrot.slane %v515_v62, 4 }
  0xe2   : > { %v688_v63 = vpop.permute.xlu1 %687  ;;  %v527_v5 = vsel %vm526_vm11, %v515_v62, %v522_v1 }
  0xe3   : > { %698 = vst.msk [vmem:[#allocation4 + $0x48] sm:$0xf] %vm648_vm4, %v688_v63  ;;  %1139 = vrot.lane.b32.xlu0 %v1131_v61, %s3894_s14 }
  0xe4   : > { %984 = vst.msk [vmem:[#allocation4 + $0x48] sm:$0xff] %vm4211_vm8, %v976_v60  ;;  %v686_v7 = vpop.permute.xlu0 %685 }
  0xe5   : > { %535 = vst.msk [vmem:[#allocation4 + $0x60] sm:$0xf] %vm453_vm3, %v527_v5  ;;  %583 = vrot.lane.b32.xlu2 %v573_v6, %s3892_s29 }
  0xe6   : > { %697 = vst.msk [vmem:[#allocation4 + $0x40] sm:$0xf] %vm648_vm4, %v686_v7  ;;  %v991_v7 = vld [vmem:[%s4033_s26 + $0x30] sm:$0x33] }
  0xe7   : > { %983 = vst.msk [vmem:[#allocation4 + $0x40] sm:$0xff] %vm4211_vm8, %v975_v3  ;;  %v712_v2 = vpop.permute.xlu2 %711  ;;  %v1005_v3 = vrot.slane %v4153_v38, 6 }
  0xe8   : > { %794 = vrot.lane.b32.xlu1 %v3207_v4, %s3895_s18  ;;  %v718_v40 = vrot.slane %v712_v2, 4 }
  0xe9   : > { %v1006_v6 = vsel %vm4029_vm2, %v1004_v58, %v1005_v3  ;;  %v1007_v0 = vrot.slane %v1005_v3, 4 }
  0xea   : > { %v495_v15 = vpop.permute.xlu1 %494  ;;  %1514 = vmatmul.bf16.gmra.mxu0 %v3248_v11  ;;  %3388 = vmatmul.msk.bf16.gmra.mxu1 %vm1442_vm9, %v3252_v12  ;;  %v723_v49 = vsel %vm721_vm12, %v712_v2, %v718_v40  ;;  %v1008_v11 = vrot.slane %v991_v7, 6  ;;  %v3209_v12 = vld [vmem:[%s4033_s26 + $0x40] sm:$0xff]  ;;  %v3210_v40 = vld [vmem:[%s4033_s26 + $0x4c] sm:$0xff] }
  0xeb   : > { %504 = vst.msk [vmem:[#allocation4 + $0x50] sm:$0xf] %vm453_vm3, %v495_v15  ;;  %585 = vrot.lane.b32.xlu0 %v574_v14, %s3892_s29  ;;  %v3710_v26 = vld [vmem:[#allocation4 + $0x44] sm:$0xf0]  ;;  %v3257_v27 = vld [vmem:[#allocation4 + $0x48] sm:$0xf0] }
  0xec   : > { %v970_v17 = vpop.permute.xlu0 %969  ;;  %v595_v14 = vld [vmem:[%s4033_s26 + $0x4] sm:$0xff] }
  0xed   : > { %v974_v18 = vrot.slane %v970_v17, 4  ;;  %796 = vrot.lane.b32.xlu2 %v3208_v16, %s3895_s18  ;;  %s3698_s18 = sshll.u32 %s5267_s12, 7 }
  0xee   : > { %v3255_v29 = vld [vmem:[#allocation4 + $0x40] sm:$0xf]  ;;  %v3709_v30 = vld [vmem:[#allocation4 + $0x44] sm:$0xf]  ;;  %s4494_s19 = scalar_lea.vmem %s5239_s7, %s3698_s18 }
  0xef   : > { %v978_v21 = vsel %vm526_vm11, %v974_v18, %v970_v17  ;;  %v714_v22 = vpop.permute.xlu2 %713  ;;  %v3256_v35 = vor.u32 %v3710_v26, %v3255_v29  ;;  %v3260_v31 = vor.u32 %v3709_v30, %v3257_v27  ;;  %v1009_v17 = vsel %vm4029_vm2, %v1007_v0, %v1008_v11  ;;  %v4419_v18 = vld [vmem:[%s4033_s26 + $0x10] sm:$0xff] }
  0xf0   : > { %v719_v55 = vrot.slane %v714_v22, 4  ;;  %605 = vrot.lane.b32.xlu1 %v4419_v18, %s3894_s14 }
  0xf2   : > { %v692_v23 = vpop.permute.xlu1 %691  ;;  %v724_v4 = vsel %vm721_vm12, %v714_v22, %v719_v55  ;;  %v3212_v55 = vld [vmem:[%s4033_s26 + $0x64] sm:$0xff] }
  0xf3   : > { %700 = vst.msk [vmem:[#allocation4 + $0x58] sm:$0xf] %vm648_vm4, %v692_v23  ;;  %603 = vrot.lane.b32.xlu0 %v595_v14, %s3894_s14 }
  0xf4   : > { %986 = vst.msk [vmem:[#allocation4 + $0x58] sm:$0xff] %vm4211_vm8, %v978_v21  ;;  %v690_v25 = vpop.permute.xlu0 %689 }
  0xf5   : > { %699 = vst.msk [vmem:[#allocation4 + $0x50] sm:$0xf] %vm648_vm4, %v690_v25  ;;  %814 = vrot.lane.b32.xlu2 %v3209_v12, %s3896_s25 }
  0xf6   : > { %985 = vst.msk [vmem:[#allocation4 + $0x50] sm:$0xff] %vm4211_vm8, %v977_v24  ;;  %v4428_v24 = vld [vmem:[%s4033_s26 + $0x28] sm:$0xff] }
  0xf7   : > { %v4369_v37 = vpop.permute.xlu2 %1043 }
  0xf8   : > { %v1050_v15 = vrot.slane %v4369_v37, 4 }
  0xfa   : > { %v710_v39 = vpop.permute.xlu1 %709  ;;  %1519 = vmatmul.bf16.gmra.mxu0 %v3256_v35  ;;  %3389 = vmatmul.msk.bf16.gmra.mxu1 %vm1442_vm9, %v3260_v31  ;;  %v1054_v22 = vsel %vm876_vm7, %v1050_v15, %v4369_v37 }
  0xfb   : > { %v717_v41 = vrot.slane %v710_v39, 4  ;;  %v3712_v57 = vld [vmem:[#allocation4 + $0x54] sm:$0xf0]  ;;  %v3265_v60 = vld [vmem:[#allocation4 + $0x58] sm:$0xf0]  ;;  %816 = vrot.lane.b32.xlu0 %v3210_v40, %s3896_s25 }
  0xfc   : > { %v517_v46 = vpop.permute.xlu0 %516 }
  0xfd   : > { %v722_v47 = vsel %vm721_vm12, %v710_v39, %v717_v41  ;;  %v523_v48 = vrot.slane %v517_v46, 4  ;;  %v3263_v59 = vld [vmem:[#allocation4 + $0x50] sm:$0xf]  ;;  %v3711_v63 = vld [vmem:[#allocation4 + $0x54] sm:$0xf]  ;;  %609 = vrot.lane.b32.xlu2 %v4428_v24, %s3894_s14 }
  0xfe   : > { %730 = vst.msk [vmem:[#allocation4 + $0x60] sm:$0xf] %vm648_vm4, %v722_v47  ;;  %v3264_v8 = vor.u32 %v3712_v57, %v3263_v59  ;;  %v3268_v9 = vor.u32 %v3711_v63, %v3265_v60  ;;  %v3211_v47 = vld [vmem:[%s4033_s26 + $0x58] sm:$0xff] }
  0xff   : > { %1014 = vst.msk [vmem:[#allocation4 + $0x60] sm:$0xff] %vm4211_vm8, %v1000_v36  ;;  %v528_v44 = vsel %vm526_vm11, %v517_v46, %v523_v48  ;;  %v4388_v51 = vpop.permute.xlu2 %1045  ;;  %v4452_v36 = vld [vmem:[%s4033_s26 + $0x1c] sm:$0xff] }
 0x100   : > { %536 = vst.msk [vmem:[#allocation4 + $0x68] sm:$0xf] %vm453_vm3, %v528_v44  ;;  %v1051_v34 = vrot.slane %v4388_v51, 4  ;;  %607 = vrot.lane.b32.xlu1 %v4452_v36, %s3894_s14 }
 0x101   : > { %731 = vst.msk [vmem:[#allocation4 + $0x68] sm:$0xf] %vm648_vm4, %v723_v49 }
 0x102   : > { %v521_v53 = vpop.permute.xlu1 %520  ;;  %1015 = vst.msk [vmem:[#allocation4 + $0x68] sm:$0xff] %vm4211_vm8, %v1003_v50  ;;  %v1055_v37 = vsel %vm876_vm7, %v1051_v34, %v4388_v51 }
 0x103   : > { %v525_v56 = vrot.slane %v521_v53, 4  ;;  %818 = vrot.lane.b32.xlu0 %v3211_v47, %s3896_s25 }
 0x104   : > { %v519_v61 = vpop.permute.xlu0 %518 }
 0x105   : > { %v530_v62 = vsel %vm526_vm11, %v521_v53, %v525_v56  ;;  %v524_v1 = vrot.slane %v519_v61, 4 }
 0x106   : > { %538 = vst.msk [vmem:[#allocation4 + $0x78] sm:$0xf] %vm453_vm3, %v530_v62  ;;  %v3271_v26 = vld [vmem:[#allocation4 + $0x60] sm:$0xf]  ;;  %v3713_v27 = vld [vmem:[#allocation4 + $0x64] sm:$0xf] }
 0x107   : > { %v529_v5 = vsel %vm526_vm11, %v519_v61, %v524_v1  ;;  %v749_v10 = vpop.permute.xlu2 %748  ;;  %v4480_v1 = vld [vmem:[%s5234_s2] ss:$0 sm:$0xff] }
 0x108   : > { %537 = vst.msk [vmem:[#allocation4 + $0x70] sm:$0xf] %vm453_vm3, %v529_v5  ;;  %820 = vrot.lane.b32.xlu1 %v3212_v55, %s3896_s25 }
 0x109   : > { %732 = vst.msk [vmem:[#allocation4 + $0x70] sm:$0xf] %vm648_vm4, %v724_v4  ;;  %v3714_v29 = vld [vmem:[#allocation4 + $0x64] sm:$0xf0]  ;;  %v3273_v30 = vld [vmem:[#allocation4 + $0x68] sm:$0xf0] }
 0x10a   : > { %v1042_v38 = vpop.permute.xlu1 %1041  ;;  %1524 = vmatmul.bf16.gmra.mxu0 %v3264_v8  ;;  %3390 = vmatmul.msk.bf16.gmra.mxu1 %vm1442_vm9, %v3268_v9  ;;  %1016 = vst.msk [vmem:[#allocation4 + $0x70] sm:$0xff] %vm4211_vm8, %v1006_v6  ;;  %v3272_v35 = vor.u32 %v3714_v29, %v3271_v26  ;;  %v3276_v31 = vor.u32 %v3713_v27, %v3273_v30 }
 0x10b   : > { %757 = vst.msk [vmem:[#allocation4 + $0x98] sm:$0xf] %vm648_vm4, %v749_v10  ;;  %v1049_v21 = vrot.slane %v1042_v38, 4 }
 0x10c   : > { %v716_v2 = vpop.permute.xlu0 %715 }
 0x10d   : > { %v720_v16 = vrot.slane %v716_v2, 4  ;;  %v1053_v28 = vsel %vm876_vm7, %v1049_v21, %v1042_v38 }
 0x10f   : > { %v725_v19 = vsel %vm721_vm12, %v716_v2, %v720_v16  ;;  %v556_v23 = vpop.permute.xlu2 %555 }
 0x110   : > { %733 = vst.msk [vmem:[#allocation4 + $0x78] sm:$0xf] %vm648_vm4, %v725_v19 }
 0x111   : > { %1017 = vst.msk [vmem:[#allocation4 + $0x78] sm:$0xff] %vm4211_vm8, %v1009_v17  ;;  %v3279_v48 = vld [vmem:[#allocation4 + $0x70] sm:$0xf]  ;;  %v3715_v44 = vld [vmem:[#allocation4 + $0x74] sm:$0xf] }
 0x112   : > { %v745_v25 = vpop.permute.xlu1 %744  ;;  %567 = vst.msk [vmem:[#allocation4 + $0xa0] sm:$0xf] %vm453_vm3, %v556_v23 }
 0x113   : > { %755 = vst.msk [vmem:[#allocation4 + $0x88] sm:$0xf] %vm648_vm4, %v745_v25 }
 0x114   : > { %1062 = vst.msk [vmem:[#allocation4 + $0x88] sm:$0xff] %vm4211_vm8, %v1054_v22  ;;  %v743_v32 = vpop.permute.xlu0 %742 }
 0x115   : > { %754 = vst.msk [vmem:[#allocation4 + $0x80] sm:$0xf] %vm648_vm4, %v743_v32 }
 0x116   : > { %1061 = vst.msk [vmem:[#allocation4 + $0x80] sm:$0xff] %vm4211_vm8, %v1053_v28 }
 0x117   : > { %v769_v39 = vpop.permute.xlu2 %768 }
 0x118   : > { %v3716_v49 = vld [vmem:[#allocation4 + $0x74] sm:$0xf0]  ;;  %v3281_v50 = vld [vmem:[#allocation4 + $0x78] sm:$0xf0] }
 0x119   : > { %v3280_v53 = vor.u32 %v3716_v49, %v3279_v48  ;;  %v3284_v54 = vor.u32 %v3715_v44, %v3281_v50 }
 0x11a   : > { %v747_v41 = vpop.permute.xlu1 %746  ;;  %1529 = vmatmul.bf16.gmra.mxu0 %v3272_v35  ;;  %3391 = vmatmul.msk.bf16.gmra.mxu1 %vm1442_vm9, %v3276_v31 }
 0x11b   : > { %756 = vst.msk [vmem:[#allocation4 + $0x90] sm:$0xf] %vm648_vm4, %v747_v41  ;;  %v3718_v3 = vld [vmem:[#allocation4 + $0x84] sm:$0xf0]  ;;  %v3289_v6 = vld [vmem:[#allocation4 + $0x88] sm:$0xf0] }
 0x11c   : > { %1063 = vst.msk [vmem:[#allocation4 + $0x90] sm:$0xff] %vm4211_vm8, %v1055_v37  ;;  %v1048_v42 = vpop.permute.xlu0 %1047 }
 0x11d   : > { %v1052_v43 = vrot.slane %v1048_v42, 4  ;;  %v3287_v4 = vld [vmem:[#allocation4 + $0x80] sm:$0xf]  ;;  %v3717_v5 = vld [vmem:[#allocation4 + $0x84] sm:$0xf] }
 0x11e   : > { %v3288_v0 = vor.u32 %v3718_v3, %v3287_v4  ;;  %v3292_v11 = vor.u32 %v3717_v5, %v3289_v6 }
 0x11f   : > { %v1056_v45 = vsel %vm876_vm7, %v1052_v43, %v1048_v42  ;;  %v560_v46 = vpop.permute.xlu2 %559 }
 0x120   : > { %1064 = vst.msk [vmem:[#allocation4 + $0x98] sm:$0xff] %vm4211_vm8, %v1056_v45 }
 0x121   : > { %569 = vst.msk [vmem:[#allocation4 + $0xb0] sm:$0xf] %vm453_vm3, %v560_v46 }
 0x122   : > { %v1091_v33 = vpop.permute.xlu1 %1090 }
 0x123   : > { %v1097_v58 = vrot.slane %v1091_v33, 4  ;;  %v3295_v30 = vld [vmem:[#allocation4 + $0x90] sm:$0xf]  ;;  %v3719_v34 = vld [vmem:[#allocation4 + $0x94] sm:$0xf] }
 0x124   : > { %v1089_v51 = vpop.permute.xlu0 %1088 }
 0x125   : > { %v1096_v52 = vrot.slane %v1089_v51, 4  ;;  %v1101_v60 = vsel %vm927_vm10, %v1097_v58, %v1091_v33 }
 0x127   : > { %v1100_v56 = vsel %vm927_vm10, %v1096_v52, %v1089_v51  ;;  %v773_v57 = vpop.permute.xlu2 %772  ;;  %v3720_v32 = vld [vmem:[#allocation4 + $0x94] sm:$0xf0]  ;;  %v3297_v35 = vld [vmem:[#allocation4 + $0x98] sm:$0xf0] }
 0x128   : > { %v3296_v43 = vor.u32 %v3720_v32, %v3295_v30  ;;  %v3300_v45 = vor.u32 %v3719_v34, %v3297_v35 }
 0x12a   : > { %v767_v59 = vpop.permute.xlu1 %766  ;;  %1534 = vmatmul.bf16.gmra.mxu0 %v3280_v53  ;;  %3392 = vmatmul.msk.bf16.gmra.mxu1 %vm1442_vm9, %v3284_v54 }
 0x12b   : > { %778 = vst.msk [vmem:[#allocation4 + $0xa0] sm:$0xf] %vm648_vm4, %v767_v59 }
 0x12c   : > { %1108 = vst.msk [vmem:[#allocation4 + $0xa0] sm:$0xff] %vm4211_vm8, %v1100_v56 }
 0x12d   : > { %v558_v61 = vpop.permute.xlu0 %557 }
 0x12e   : > { %568 = vst.msk [vmem:[#allocation4 + $0xa8] sm:$0xf] %vm453_vm3, %v558_v61 }
 0x12f   : > { %779 = vst.msk [vmem:[#allocation4 + $0xa8] sm:$0xf] %vm648_vm4, %v769_v39  ;;  %v580_v62 = vpop.permute.xlu2 %579 }
 0x130   : > { %1109 = vst.msk [vmem:[#allocation4 + $0xa8] sm:$0xff] %vm4211_vm8, %v1101_v60 }
 0x131   : > { %591 = vst.msk [vmem:[#allocation4 + $0xc0] sm:$0xf] %vm453_vm3, %v580_v62 }
 0x132   : > { %v1095_v63 = vpop.permute.xlu1 %1094 }
 0x133   : > { %v1099_v16 = vrot.slane %v1095_v63, 4  ;;  %v3303_v58 = vld [vmem:[#allocation4 + $0xa0] sm:$0xf]  ;;  %v3721_v60 = vld [vmem:[#allocation4 + $0xa4] sm:$0xf] }
 0x135   : > { %v1093_v7 = vpop.permute.xlu0 %1092  ;;  %v1103_v21 = vsel %vm927_vm10, %v1099_v16, %v1095_v63 }
 0x136   : > { %v1098_v8 = vrot.slane %v1093_v7, 4 }
 0x137   : > { %v1500_v9 = vpop.f32.mrf.mxu0  ;;  %v1589_v10 = vpop.f32.mrf.mxu1  ;;  %v3722_v59 = vld [vmem:[#allocation4 + $0xa4] sm:$0xf0]  ;;  %v3305_v61 = vld [vmem:[#allocation4 + $0xa8] sm:$0xf0] }
 0x138   : > { %v1501_v38 = vadd.f32 %v4480_v1, %v1500_v9  ;;  %v1102_v12 = vsel %vm927_vm10, %v1098_v8, %v1093_v7  ;;  %v793_v14 = vpop.permute.xlu2 %792  ;;  %v3304_v7 = vor.u32 %v3722_v59, %v3303_v58  ;;  %v3308_v8 = vor.u32 %v3721_v60, %v3305_v61 }
 0x13a   : > { %v771_v2 = vpop.permute.xlu1 %770  ;;  %v1590_v15 = vadd.f32 %v1589_v10, %v1501_v38  ;;  %1539 = vmatmul.bf16.gmra.mxu0 %v3288_v0  ;;  %3393 = vmatmul.msk.bf16.gmra.mxu1 %vm1442_vm9, %v3292_v11 }
 0x13b   : > { %780 = vst.msk [vmem:[#allocation4 + $0xb0] sm:$0xf] %vm648_vm4, %v771_v2 }
 0x13c   : > { %1110 = vst.msk [vmem:[#allocation4 + $0xb0] sm:$0xff] %vm4211_vm8, %v1102_v12  ;;  %v1669_v17 = vpack.c.bf16 %v1590_v15, %v1590_v15 }
 0x13d   : > { %v562_v19 = vpop.permute.xlu0 %561 }
 0x13e   : > { %1702 = vst.msk [vmem:[%s4494_s19] sm:$0xf] %vm1701_vm13, %v1669_v17  ;;  %1735 = vrot.lane.b32.xlu2 %v1669_v17, %s3894_s14 }
 0x13f   : > { %v1502_v22 = vpop.f32.mrf.mxu0  ;;  %v1591_v23 = vpop.f32.mrf.mxu1  ;;  %570 = vst.msk [vmem:[#allocation4 + $0xb8] sm:$0xf] %vm453_vm3, %v562_v19 }
 0x140   : > { %v1503_v25 = vadd.f32 %v4480_v1, %v1502_v22  ;;  %781 = vst.msk [vmem:[#allocation4 + $0xb8] sm:$0xf] %vm648_vm4, %v773_v57  ;;  %v584_v27 = vpop.permute.xlu2 %583 }
 0x141   : > { %1111 = vst.msk [vmem:[#allocation4 + $0xb8] sm:$0xff] %vm4211_vm8, %v1103_v21 }
 0x142   : > { %v1138_v26 = vpop.permute.xlu1 %1137  ;;  %v1592_v28 = vadd.f32 %v1591_v23, %v1503_v25  ;;  %593 = vst.msk [vmem:[#allocation4 + $0xd0] sm:$0xf] %vm453_vm3, %v584_v27 }
 0x143   : > { %v1144_v48 = vrot.slane %v1138_v26, 4  ;;  %v3311_v22 = vld [vmem:[#allocation4 + $0xb0] sm:$0xf]  ;;  %v3723_v25 = vld [vmem:[#allocation4 + $0xb4] sm:$0xf] }
 0x144   : > { %v1670_v29 = vpack.c.bf16 %v1592_v28, %v1592_v28 }
 0x145   : > { %v1136_v31 = vpop.permute.xlu0 %1135  ;;  %v1148_v50 = vsel %vm526_vm11, %v1144_v48, %v1138_v26 }
 0x146   : > { %1703 = vst.msk [vmem:[%s4494_s19 + $0x4] sm:$0xf] %vm1701_vm13, %v1670_v29  ;;  %v1784_v37 = vrot.slane %v1670_v29, 6  ;;  %v1143_v39 = vrot.slane %v1136_v31, 4 }
 0x147   : > { %v1505_v40 = vpop.f32.mrf.mxu0  ;;  %v1594_v41 = vpop.f32.mrf.mxu1 }
 0x148   : > { %v1506_v42 = vadd.f32 %v4480_v1, %v1505_v40  ;;  %1785 = vrot.lane.b32.xlu0 %v1784_v37, %s3894_s14  ;;  %v1147_v46 = vsel %vm526_vm11, %v1143_v39, %v1136_v31  ;;  %v1827_v51 = vrot.slane %v1784_v37, 4  ;;  %v3724_v23 = vld [vmem:[#allocation4 + $0xb4] sm:$0xf0]  ;;  %v3313_v26 = vld [vmem:[#allocation4 + $0xb8] sm:$0xf0] }
 0x149   : > { %v3312_v34 = vor.u32 %v3724_v23, %v3311_v22  ;;  %v3316_v35 = vor.u32 %v3723_v25, %v3313_v26  ;;  %v1171_v25 = vrot.slane %v4419_v18, 6  ;;  %v1174_v18 = vrot.slane %v4452_v36, 6 }
 0x14a   : > { %v791_v47 = vpop.permute.xlu1 %790  ;;  %v1595_v33 = vadd.f32 %v1594_v41, %v1506_v42  ;;  %1544 = vmatmul.bf16.gmra.mxu0 %v3296_v43  ;;  %3394 = vmatmul.msk.bf16.gmra.mxu1 %vm1442_vm9, %v3300_v45 }
 0x14b   : > { %802 = vst.msk [vmem:[#allocation4 + $0xc0] sm:$0xf] %vm648_vm4, %v791_v47 }
 0x14c   : > { %1155 = vst.msk [vmem:[#allocation4 + $0xc0] sm:$0xff] %vm4211_vm8, %v1147_v46  ;;  %v1671_v49 = vpack.c.bf16 %v1595_v33, %v1595_v33 }
 0x14d   : > { %v582_v44 = vpop.permute.xlu0 %581 }
 0x14e   : > { %1704 = vst.msk [vmem:[%s4494_s19 + $0x8] sm:$0xf] %vm1701_vm13, %v1671_v49  ;;  %1864 = vrot.lane.b32.xlu1 %v1671_v49, %s3894_s14 }
 0x14f   : > { %v1507_v52 = vpop.f32.mrf.mxu0  ;;  %v1596_v53 = vpop.f32.mrf.mxu1  ;;  %592 = vst.msk [vmem:[#allocation4 + $0xc8] sm:$0xf] %vm453_vm3, %v582_v44 }
 0x150   : > { %v1508_v54 = vadd.f32 %v4480_v1, %v1507_v52  ;;  %1828 = vrot.lane.b32.xlu0 %v1827_v51, %s3894_s14  ;;  %803 = vst.msk [vmem:[#allocation4 + $0xc8] sm:$0xf] %vm648_vm4, %v793_v14  ;;  %v797_v14 = vpop.permute.xlu2 %796 }
 0x151   : > { %1156 = vst.msk [vmem:[#allocation4 + $0xc8] sm:$0xff] %vm4211_vm8, %v1148_v50 }
 0x152   : > { %v1142_v55 = vpop.permute.xlu1 %1141  ;;  %v1597_v56 = vadd.f32 %v1596_v53, %v1508_v54 }
 0x153   : > { %v1146_v0 = vrot.slane %v1142_v55, 4  ;;  %v3319_v48 = vld [vmem:[#allocation4 + $0xc0] sm:$0xf]  ;;  %v3725_v44 = vld [vmem:[#allocation4 + $0xc4] sm:$0xf] }
 0x154   : > { %v4527_v57 = vpack.c.bf16 %v1597_v56, %v1597_v56 }
 0x155   : > { %v1140_v62 = vpop.permute.xlu0 %1139  ;;  %v1150_v2 = vsel %vm526_vm11, %v1146_v0, %v1142_v55 }
 0x156   : > { %1705 = vst.msk [vmem:[%s4494_s19 + $0xc] sm:$0xf] %vm1701_vm13, %v4527_v57  ;;  %v1904_v63 = vrot.slane %v4527_v57, 6  ;;  %v1145_v3 = vrot.slane %v1140_v62, 4 }
 0x157   : > { %v1510_v4 = vpop.f32.mrf.mxu0  ;;  %v1599_v5 = vpop.f32.mrf.mxu1 }
 0x158   : > { %v1511_v6 = vadd.f32 %v4480_v1, %v1510_v4  ;;  %1905 = vrot.lane.b32.xlu2 %v1904_v63, %s3894_s14  ;;  %v1149_v9 = vsel %vm526_vm11, %v1145_v3, %v1140_v62  ;;  %v4557_v41 = vpop.permute.xlu2 %814  ;;  %v3726_v49 = vld [vmem:[#allocation4 + $0xc4] sm:$0xf0]  ;;  %v3321_v50 = vld [vmem:[#allocation4 + $0xc8] sm:$0xf0]  ;;  %v3897_v62 = vmov 0  }
 0x159   : > { %v3320_v56 = vor.u32 %v3726_v49, %v3319_v48  ;;  %v3324_v59 = vor.u32 %v3725_v44, %v3321_v50  ;;  %427 = vst [vmem:[#allocation2] sm:$0xff] %v3897_v62 }
 0x15a   : > { %v795_v10 = vpop.permute.xlu1 %794  ;;  %v1600_v38 = vadd.f32 %v1599_v5, %v1511_v6  ;;  %1549 = vmatmul.bf16.gmra.mxu0 %v3304_v7  ;;  %3395 = vmatmul.msk.bf16.gmra.mxu1 %vm1442_vm9, %v3308_v8  ;;  %435 = vst [vmem:[#allocation2 + $0x24] sm:$0xff] %v3897_v62 }
 0x15b   : > { %804 = vst.msk [vmem:[#allocation4 + $0xd0] sm:$0xf] %vm648_vm4, %v795_v10 }
 0x15c   : > { %1157 = vst.msk [vmem:[#allocation4 + $0xd0] sm:$0xff] %vm4211_vm8, %v1149_v9  ;;  %v1673_v11 = vpack.c.bf16 %v1600_v38, %v1600_v38 }
 0x15d   : > { %v586_v12 = vpop.permute.xlu0 %585  ;;  %430 = vst [vmem:[#allocation2 + $0xc] sm:$0xff] %v3897_v62 }
 0x15e   : > { %1706 = vst.msk [vmem:[%s4494_s19 + $0x10] sm:$0xf] %vm1701_vm13, %v1673_v11  ;;  %1742 = vrot.lane.b32.xlu0 %v1673_v11, %s3892_s29  ;;  %v822_v11 = vrot.slane %v4557_v41, 4 }
 0x15f   : > { %v1512_v15 = vpop.f32.mrf.mxu0  ;;  %v1601_v16 = vpop.f32.mrf.mxu1  ;;  %594 = vst.msk [vmem:[#allocation4 + $0xd8] sm:$0xf] %vm453_vm3, %v586_v12 }
 0x160   : > { %v1513_v17 = vadd.f32 %v4480_v1, %v1512_v15  ;;  %805 = vst.msk [vmem:[#allocation4 + $0xd8] sm:$0xf] %vm648_vm4, %v797_v14  ;;  %v610_v51 = vpop.permute.xlu2 %609  ;;  %v826_v23 = vsel %vm721_vm12, %v4557_v41, %v822_v11 }
 0x161   : > { %1158 = vst.msk [vmem:[#allocation4 + $0xd8] sm:$0xff] %vm4211_vm8, %v1150_v2  ;;  %v614_v53 = vrot.slane %v610_v51, 4 }
 0x162   : > { %v1602_v19 = vadd.f32 %v1601_v16, %v1513_v17  ;;  %432 = vst [vmem:[#allocation2 + $0x18] sm:$0x33] %v3897_v62  ;;  %v1159_v16 = vld [vmem:[%s4033_s26 + $0x4] sm:$0xcc] }
 0x163   : > { %v3327_v28 = vld [vmem:[#allocation4 + $0xd0] sm:$0xf]  ;;  %v618_v60 = vsel %vm526_vm11, %v610_v51, %v614_v53  ;;  %437 = vst [vmem:[#allocation2 + $0x30] sm:$0xff] %v3897_v62  ;;  %v3727_v10 = vld [vmem:[#allocation4 + $0xd4] sm:$0xf]  ;;  %v3220_v17 = vrot.slane %v1159_v16, 10 }
 0x164   : > { %v1674_v21 = vpack.c.bf16 %v1602_v19, %v1602_v19  ;;  %626 = vst.msk [vmem:[#allocation4 + $0xf8] sm:$0xf] %vm453_vm3, %v618_v60  ;;  %v1176_v51 = vrot.slane %v1174_v18, 4  ;;  %v1177_v53 = vrot.slane %v4428_v24, 6 }
 0x165   : > { %441 = vst [vmem:[#allocation3] sm:$0xff] %v3897_v62  ;;  %v604_v8 = vpop.permute.xlu0 %603 }
 0x166   : > { %1707 = vst.msk [vmem:[%s4494_s19 + $0x14] sm:$0xf] %vm1701_vm13, %v1674_v21  ;;  %v1790_v27 = vrot.slane %v1674_v21, 6  ;;  %v611_v19 = vrot.slane %v604_v8, 4  ;;  %v606_v21 = vpop.permute.xlu1 %605 }
 0x167   : > { %v1515_v29 = vpop.f32.mrf.mxu0  ;;  %v1604_v30 = vpop.f32.mrf.mxu1  ;;  %442 = vst [vmem:[#allocation3 + $0x8] sm:$0xf] %v3897_v62 }
 0x168   : > { %v1516_v32 = vadd.f32 %v4480_v1, %v1515_v29  ;;  %1791 = vrot.lane.b32.xlu1 %v1790_v27, %s3892_s29  ;;  %v1832_v31 = vrot.slane %v1790_v27, 4  ;;  %v3728_v37 = vld [vmem:[#allocation4 + $0xd4] sm:$0xf0]  ;;  %443 = vst [vmem:[#allocation3 + $0xc] sm:$0x33] %v3897_v62  ;;  %v615_v26 = vsel %vm526_vm11, %v604_v8, %v611_v19 }
 0x169   : > { %v3328_v39 = vor.u32 %v3728_v37, %v3327_v28  ;;  %444 = vst [vmem:[#allocation3 + $0x14] sm:$0x3] %v3897_v62  ;;  %v3329_v38 = vld [vmem:[#allocation4 + $0xd8] sm:$0xf0]  ;;  %v1172_v28 = vsel %vm4029_vm2, %v3220_v17, %v1171_v25 }
 0x16a   : > { %v1605_v40 = vadd.f32 %v1604_v30, %v1516_v32  ;;  %1554 = vmatmul.bf16.gmra.mxu0 %v3312_v34  ;;  %3396 = vmatmul.msk.bf16.gmra.mxu1 %vm1442_vm9, %v3316_v35  ;;  %445 = vst [vmem:[#allocation3 + $0x18] sm:$0xff] %v3897_v62  ;;  %v3332_v15 = vor.u32 %v3727_v10, %v3329_v38  ;;  %v612_v32 = vrot.slane %v606_v21, 4  ;;  %v1173_v34 = vrot.slane %v1171_v25, 4 }
 0x16b   : > { %1833 = vrot.lane.b32.xlu2 %v1832_v31, %s3892_s29  ;;  %1564 = vmatmul.bf16.vlgmr.msra.gmra.mxu3 %v3328_v39  ;;  %446 = vst [vmem:[#allocation3 + $0x20] sm:$0xf] %v3897_v62 }
 0x16c   : > { %v1675_v42 = vpack.c.bf16 %v1605_v40, %v1605_v40  ;;  %623 = vst.msk [vmem:[#allocation4 + $0xe0] sm:$0xf] %vm453_vm3, %v615_v26  ;;  %v616_v40 = vsel %vm526_vm11, %v606_v21, %v612_v32  ;;  %v1175_v41 = vsel %vm4029_vm2, %v1173_v34, %v1174_v18 }
 0x16d   : > { %834 = vst.msk [vmem:[#allocation4 + $0xe0] sm:$0xf] %vm648_vm4, %v826_v23  ;;  %v817_v30 = vpop.permute.xlu0 %816 }
 0x16e   : > { %1708 = vst.msk [vmem:[%s4494_s19 + $0x18] sm:$0xf] %vm1701_vm13, %v1675_v42  ;;  %v823_v35 = vrot.slane %v817_v30, 4 }
 0x16f   : > { %v1517_v43 = vpop.f32.mrf.mxu0  ;;  %v1606_v45 = vpop.f32.mrf.mxu1  ;;  %1186 = vst.msk [vmem:[#allocation4 + $0xe0] sm:$0xff] %vm4211_vm8, %v1172_v28 }
 0x170   : > { %v1518_v46 = vadd.f32 %v4480_v1, %v1517_v43  ;;  %624 = vst.msk [vmem:[#allocation4 + $0xe8] sm:$0xf] %vm453_vm3, %v616_v40 }
 0x172   : > { %v1607_v47 = vadd.f32 %v1606_v45, %v1518_v46  ;;  %v608_v43 = vpop.permute.xlu1 %607 }
 0x173   : > { %1869 = vrot.lane.b32.xlu2 %v1675_v42, %s3892_s29  ;;  %v827_v42 = vsel %vm721_vm12, %v817_v30, %v823_v35  ;;  %v613_v50 = vrot.slane %v608_v43, 4 }
 0x174   : > { %v4563_v33 = vpack.c.bf16 %v1607_v47, %v1607_v47  ;;  %835 = vst.msk [vmem:[#allocation4 + $0xe8] sm:$0xf] %vm648_vm4, %v827_v42 }
 0x175   : > { %1187 = vst.msk [vmem:[#allocation4 + $0xe8] sm:$0xff] %vm4211_vm8, %v1175_v41 }
 0x176   : > { %1709 = vst.msk [vmem:[%s4494_s19 + $0x1c] sm:$0xf] %vm1701_vm13, %v4563_v33  ;;  %v1910_v52 = vrot.slane %v4563_v33, 6 }
 0x177   : > { %v1520_v54 = vpop.f32.mrf.mxu0  ;;  %v1609_v55 = vpop.f32.mrf.mxu1 }
 0x178   : > { %v1521_v58 = vadd.f32 %v4480_v1, %v1520_v54  ;;  %1911 = vrot.lane.b32.xlu0 %v1910_v52, %s3892_s29  ;;  %v819_v54 = vpop.permute.xlu0 %818 }
 0x17a   : > { %v1610_v61 = vadd.f32 %v1609_v55, %v1521_v58  ;;  %1559 = vmatmul.bf16.gmra.mxu0 %v3320_v56  ;;  %3397 = vmatmul.msk.bf16.gmra.mxu1 %vm1442_vm9, %v3324_v59  ;;  %v824_v55 = vrot.slane %v819_v54, 4  ;;  %v617_v58 = vsel %vm526_vm11, %v608_v43, %v613_v50  ;;  %v1178_v59 = vsel %vm4029_vm2, %v1176_v51, %v1177_v53  ;;  %v821_v24 = vpop.permute.xlu1 %820 }
 0x17b   : > { %625 = vst.msk [vmem:[#allocation4 + $0xf0] sm:$0xf] %vm453_vm3, %v617_v58  ;;  %vm1745_vm3 = vcmask 779776  }
 0x17c   : > { %v1677_v3 = vpack.c.bf16 %v1610_v61, %v1610_v61  ;;  %v828_v60 = vsel %vm721_vm12, %v819_v54, %v824_v55  ;;  %v3337_v54 = vld [vmem:[#allocation4 + $0xe8] sm:$0xf0] }
 0x17d   : > { %836 = vst.msk [vmem:[#allocation4 + $0xf0] sm:$0xf] %vm648_vm4, %v828_v60 }
 0x17e   : > { %1710 = vst.msk [vmem:[%s4494_s19 + $0x20] sm:$0xf] %vm1701_vm13, %v1677_v3  ;;  %1748 = vrot.lane.b32.xlu1 %v1677_v3, %s3891_s28  ;;  %v1163_v3 = vld [vmem:[%s4033_s26 + $0x34] sm:$0x33] }
 0x17f   : > { %v1522_v4 = vpop.f32.mrf.mxu0  ;;  %v1611_v5 = vpop.f32.mrf.mxu1  ;;  %1188 = vst.msk [vmem:[#allocation4 + $0xf0] sm:$0xff] %vm4211_vm8, %v1178_v59  ;;  %v1180_v8 = vrot.slane %v1163_v3, 6 }
 0x180   : > { %v1523_v6 = vadd.f32 %v4480_v1, %v1522_v4  ;;  %v1179_v4 = vrot.slane %v1177_v53, 4  ;;  %v3729_v53 = vld [vmem:[#allocation4 + $0xe4] sm:$0xf] }
 0x182   : > { %v1612_v7 = vadd.f32 %v1611_v5, %v1523_v6  ;;  %v825_v5 = vrot.slane %v821_v24, 4  ;;  %v1181_v38 = vsel %vm4029_vm2, %v1179_v4, %v1180_v8 }
 0x184   : > { %v1678_v9 = vpack.c.bf16 %v1612_v7, %v1612_v7  ;;  %v829_v10 = vsel %vm721_vm12, %v821_v24, %v825_v5  ;;  %vm5242_vm12 = vcmask 519168  }
 0x185   : > { %837 = vst.msk [vmem:[#allocation4 + $0xf8] sm:$0xf] %vm648_vm4, %v829_v10  ;;  %vm1773_vm4 = vcmask 781826  }
 0x186   : > { %1711 = vst.msk [vmem:[%s4494_s19 + $0x24] sm:$0xf] %vm1701_vm13, %v1678_v9  ;;  %v1796_v0 = vrot.slane %v1678_v9, 6  ;;  %v3343_v8 = vld [vmem:[#allocation4 + $0xf0] sm:$0xf] }
 0x187   : > { %v1525_v12 = vpop.f32.mrf.mxu0  ;;  %v1614_v14 = vpop.f32.mrf.mxu1  ;;  %1189 = vst.msk [vmem:[#allocation4 + $0xf8] sm:$0xff] %vm4211_vm8, %v1181_v38  ;;  %vm1751_vm8 = vcmask 1042176  }
 0x188   : > { %v1526_v2 = vadd.f32 %v4480_v1, %v1525_v12  ;;  %1797 = vrot.lane.b32.xlu2 %v1796_v0, %s3891_s28  ;;  %v1837_v29 = vrot.slane %v1796_v0, 4  ;;  %429 = vst.msk [vmem:[#allocation2 + $0x8] sm:$0xf] %vm5242_vm12, %v3897_v62 }
 0x189   : > { %436 = vst.msk [vmem:[#allocation2 + $0x2c] sm:$0xf] %vm5242_vm12, %v3897_v62 }
 0x18a   : > { %v1615_v22 = vadd.f32 %v1614_v14, %v1526_v2  ;;  %3398 = vmatmul.msk.bf16.gmra.mxu1 %vm1442_vm9, %v3332_v15  ;;  %431 = vst.msk [vmem:[#allocation2 + $0x14] sm:$0xf] %vm5242_vm12, %v3897_v62 }
 0x18b   : > { %438 = vst.msk [vmem:[#allocation2 + $0x38] sm:$0xf] %vm5242_vm12, %v3897_v62 }
 0x18c   : > { %v1679_v27 = vpack.c.bf16 %v1615_v22, %v1615_v22 }
 0x18e   : > { %1712 = vst.msk [vmem:[%s4494_s19 + $0x28] sm:$0xf] %vm1701_vm13, %v1679_v27  ;;  %1874 = vrot.lane.b32.xlu0 %v1679_v27, %s3891_s28 }
 0x18f   : > { %v1527_v31 = vpop.f32.mrf.mxu0  ;;  %v1616_v37 = vpop.f32.mrf.mxu1 }
 0x190   : > { %v1528_v39 = vadd.f32 %v4480_v1, %v1527_v31  ;;  %1838 = vrot.lane.b32.xlu2 %v1837_v29, %s3891_s28 }
 0x192   : > { %v1617_v36 = vadd.f32 %v1616_v37, %v1528_v39 }
 0x194   : > { %v4622_v45 = vpack.c.bf16 %v1617_v36, %v1617_v36 }
 0x196   : > { %1713 = vst.msk [vmem:[%s4494_s19 + $0x2c] sm:$0xf] %vm1701_vm13, %v4622_v45  ;;  %v1916_v46 = vrot.slane %v4622_v45, 6 }
 0x197   : > { %v1530_v47 = vpop.f32.mrf.mxu0  ;;  %v1619_v48 = vpop.f32.mrf.mxu1 }
 0x198   : > { %v1531_v49 = vadd.f32 %v4480_v1, %v1530_v47  ;;  %1917 = vrot.lane.b32.xlu1 %v1916_v46, %s3891_s28  ;;  %v1736_v44 = vpop.permute.xlu2 %1735  ;;  %v3335_v47 = vld [vmem:[#allocation4 + $0xe0] sm:$0xf] }
 0x199   : > { %1740 = vst.msk [vmem:[#allocation2 + $0x24] sm:$0x3] %vm1739_vm14, %v1736_v44 }
 0x19a   : > { %v1620_v56 = vadd.f32 %v1619_v48, %v1531_v49  ;;  %1772 = vst.msk [vmem:[#allocation2] sm:$0xc] %vm1771_vm15, %v1736_v44  ;;  %v3730_v48 = vld [vmem:[#allocation4 + $0xe4] sm:$0xf0] }
 0x19b   : > { %v3336_v44 = vor.u32 %v3730_v48, %v3335_v47 }
 0x19c   : > { %v1681_v61 = vpack.c.bf16 %v1620_v56, %v1620_v56  ;;  %v3340_v56 = vor.u32 %v3729_v53, %v3337_v54 }
 0x19d   : > { %1569 = vmatmul.bf16.gmra.mxu3 %v3336_v44 }
 0x19e   : > { %1714 = vst.msk [vmem:[%s4494_s19 + $0x30] sm:$0xf] %vm1701_vm13, %v1681_v61  ;;  %3399 = vmatmul.msk.bf16.vlgmr.msra.gmra.mxu2 %vm1442_vm9, %v3340_v56 }
 0x19f   : > { %v1532_v6 = vpop.f32.mrf.mxu0  ;;  %v1621_v7 = vpop.f32.mrf.mxu1  ;;  %1754 = vst.msk [vmem:[#allocation2 + $0x28] sm:$0x3] %vm1753_vm0, %v1681_v61 }
 0x1a0   : > { %v1533_v9 = vadd.f32 %v4480_v1, %v1532_v6  ;;  %1778 = vst.msk [vmem:[#allocation2 + $0x4] sm:$0xc] %vm1777_vm1, %v1681_v61 }
 0x1a2   : > { %v1622_v0 = vadd.f32 %v1621_v7, %v1533_v9  ;;  %v3732_v9 = vld [vmem:[#allocation4 + $0xf4] sm:$0xf0] }
 0x1a3   : > { %v3344_v38 = vor.u32 %v3732_v9, %v3343_v8 }
 0x1a4   : > { %v1682_v11 = vpack.c.bf16 %v1622_v0, %v1622_v0 }
 0x1a6   : > { %1715 = vst.msk [vmem:[%s4494_s19 + $0x34] sm:$0xf] %vm1701_vm13, %v1682_v11  ;;  %v1802_v12 = vrot.slane %v1682_v11, 6 }
 0x1a7   : > { %v1535_v14 = vpop.f32.mrf.mxu0  ;;  %v1624_v2 = vpop.f32.mrf.mxu1 }
 0x1a8   : > { %v1842_v15 = vrot.slane %v1802_v12, 4  ;;  %v1536_v16 = vadd.f32 %v4480_v1, %v1535_v14  ;;  %1804 = vst.msk [vmem:[#allocation2 + $0x28] sm:$0xc] %vm1777_vm1, %v1802_v12  ;;  %v3731_v12 = vld [vmem:[#allocation4 + $0xf4] sm:$0xf] }
 0x1a9   : > { %v3345_v14 = vld [vmem:[#allocation4 + $0xf8] sm:$0xf0] }
 0x1aa   : > { %v1625_v17 = vadd.f32 %v1624_v2, %v1536_v16  ;;  %1844 = vst.msk [vmem:[#allocation2 + $0x10] sm:$0x3] %vm1753_vm0, %v1842_v15  ;;  %v3348_v15 = vor.u32 %v3731_v12, %v3345_v14 }
 0x1ac   : > { %v1683_v19 = vpack.c.bf16 %v1625_v17, %v1625_v17 }
 0x1ad   : > { %1574 = vmatmul.bf16.gmra.mxu3 %v3344_v38 }
 0x1ae   : > { %1716 = vst.msk [vmem:[%s4494_s19 + $0x38] sm:$0xf] %vm1701_vm13, %v1683_v19  ;;  %3400 = vmatmul.msk.bf16.gmra.mxu2 %vm1442_vm9, %v3348_v15  ;;  %vm1985_vm9 = vcmask 781312  }
 0x1af   : > { %v1537_v13 = vpop.f32.mrf.mxu0  ;;  %v1626_v21 = vpop.f32.mrf.mxu1  ;;  %1878 = vst.msk [vmem:[#allocation2 + $0x34] sm:$0x3] %vm1753_vm0, %v1683_v19 }
 0x1b0   : > { %v1538_v22 = vadd.f32 %v4480_v1, %v1537_v13  ;;  %1898 = vst.msk [vmem:[#allocation2 + $0x10] sm:$0xc] %vm1777_vm1, %v1683_v19 }
 0x1b2   : > { %v1627_v23 = vadd.f32 %v1626_v21, %v1538_v22  ;;  %v1906_v25 = vpop.permute.xlu2 %1905 }
 0x1b3   : > { %1908 = vst.msk [vmem:[#allocation2 + $0x30] sm:$0xc] %vm1771_vm15, %v1906_v25 }
 0x1b4   : > { %v1684_v26 = vpack.c.bf16 %v1627_v23, %v1627_v23 }
 0x1b6   : > { %1717 = vst.msk [vmem:[%s4494_s19 + $0x3c] sm:$0xf] %vm1701_vm13, %v1684_v26  ;;  %v1922_v27 = vrot.slane %v1684_v26, 6 }
 0x1b7   : > { %v1540_v28 = vpop.f32.mrf.mxu0  ;;  %v1629_v29 = vpop.f32.mrf.mxu1 }
 0x1b8   : > { %v1962_v30 = vrot.slane %v1922_v27, 4  ;;  %v1541_v32 = vadd.f32 %v4480_v1, %v1540_v28  ;;  %1924 = vst.msk [vmem:[#allocation2 + $0x34] sm:$0xc] %vm1777_vm1, %v1922_v27 }
 0x1ba   : > { %v1630_v34 = vadd.f32 %v1629_v29, %v1541_v32  ;;  %v1786_v18 = vpop.permute.xlu0 %1785  ;;  %1964 = vst.msk [vmem:[#allocation2 + $0x1c] sm:$0x3] %vm1753_vm0, %v1962_v30 }
 0x1bb   : > { %1788 = vst.msk [vmem:[#allocation2 + $0x24] sm:$0xc] %vm1771_vm15, %v1786_v18 }
 0x1bc   : > { %v1685_v35 = vpack.c.bf16 %v1630_v34, %v1630_v34 }
 0x1be   : > { %1718 = vst.msk [vmem:[%s4494_s19 + $0x40] sm:$0xf] %vm1701_vm13, %v1685_v35  ;;  %1756 = vrot.lane.b32.xlu2 %v1685_v35, %s3894_s14 }
 0x1bf   : > { %v1542_v31 = vpop.f32.mrf.mxu0  ;;  %v1631_v37 = vpop.f32.mrf.mxu1 }
 0x1c0   : > { %v1543_v39 = vadd.f32 %v4480_v1, %v1542_v31  ;;  %v1865_v40 = vpop.permute.xlu1 %1864 }
 0x1c1   : > { %1867 = vst.msk [vmem:[#allocation2 + $0x30] sm:$0x3] %vm1739_vm14, %v1865_v40 }
 0x1c2   : > { %v1632_v41 = vadd.f32 %v1631_v37, %v1543_v39  ;;  %1895 = vst.msk [vmem:[#allocation2 + $0xc] sm:$0xc] %vm1771_vm15, %v1865_v40  ;;  %v1829_v42 = vpop.permute.xlu0 %1828 }
 0x1c3   : > { %1831 = vst.msk [vmem:[#allocation2 + $0xc] sm:$0x3] %vm1739_vm14, %v1829_v42 }
 0x1c4   : > { %v1686_v36 = vpack.c.bf16 %v1632_v41, %v1632_v41 }
 0x1c5   : > { %v1834_v43 = vpop.permute.xlu2 %1833 }
 0x1c6   : > { %1719 = vst.msk [vmem:[%s4494_s19 + $0x44] sm:$0xf] %vm1701_vm13, %v1686_v36  ;;  %v1806_v49 = vrot.slane %v1686_v36, 6 }
 0x1c7   : > { %1836 = vst.msk [vmem:[#allocation2 + $0xc] sm:$0x3] %vm1745_vm3, %v1834_v43  ;;  %v1545_v50 = vpop.f32.mrf.mxu0  ;;  %v1634_v51 = vpop.f32.mrf.mxu1 }
 0x1c8   : > { %v1546_v55 = vadd.f32 %v4480_v1, %v1545_v50  ;;  %1807 = vrot.lane.b32.xlu1 %v1806_v49, %s3894_s14  ;;  %v1845_v61 = vrot.slane %v1806_v49, 4 }
 0x1ca   : > { %v1635_v58 = vadd.f32 %v1634_v51, %v1546_v55 }
 0x1cc   : > { %v1687_v59 = vpack.c.bf16 %v1635_v58, %v1635_v58 }
 0x1cd   : > { %v1870_v60 = vpop.permute.xlu2 %1869 }
 0x1ce   : > { %1720 = vst.msk [vmem:[%s4494_s19 + $0x48] sm:$0xf] %vm1701_vm13, %v1687_v59  ;;  %1880 = vrot.lane.b32.xlu2 %v1687_v59, %s3894_s14 }
 0x1cf   : > { %1872 = vst.msk [vmem:[#allocation2 + $0x30] sm:$0x3] %vm1745_vm3, %v1870_v60  ;;  %v1547_v24 = vpop.f32.mrf.mxu0  ;;  %v1636_v3 = vpop.f32.mrf.mxu1 }
 0x1d0   : > { %1896 = vst.msk [vmem:[#allocation2 + $0xc] sm:$0xc] %vm1773_vm4, %v1870_v60  ;;  %v1548_v4 = vadd.f32 %v4480_v1, %v1547_v24  ;;  %1846 = vrot.lane.b32.xlu1 %v1845_v61, %s3894_s14  ;;  %v1743_v5 = vpop.permute.xlu0 %1742 }
 0x1d1   : > { %1746 = vst.msk [vmem:[#allocation2 + $0x24] sm:$0x3] %vm1745_vm3, %v1743_v5 }
 0x1d2   : > { %v1637_v6 = vadd.f32 %v1636_v3, %v1548_v4  ;;  %1774 = vst.msk [vmem:[#allocation2] sm:$0xc] %vm1773_vm4, %v1743_v5  ;;  %v1952_v4 = vrot.slane %v1910_v52, 4 }
 0x1d4   : > { %v4694_v7 = vpack.c.bf16 %v1637_v6, %v1637_v6 }
 0x1d6   : > { %1721 = vst.msk [vmem:[%s4494_s19 + $0x4c] sm:$0xf] %vm1701_vm13, %v4694_v7  ;;  %v1926_v10 = vrot.slane %v4694_v7, 6 }
 0x1d7   : > { %v1550_v0 = vpop.f32.mrf.mxu0  ;;  %v1639_v11 = vpop.f32.mrf.mxu1 }
 0x1d8   : > { %v1551_v2 = vadd.f32 %v4480_v1, %v1550_v0  ;;  %1927 = vrot.lane.b32.xlu2 %v1926_v10, %s3894_s14 }
 0x1da   : > { %v1640_v16 = vadd.f32 %v1639_v11, %v1551_v2  ;;  %v1792_v17 = vpop.permute.xlu1 %1791 }
 0x1db   : > { %1794 = vst.msk [vmem:[#allocation2 + $0x24] sm:$0xc] %vm1773_vm4, %v1792_v17  ;;  %v1947_v17 = vrot.slane %v1904_v63, 4 }
 0x1dc   : > { %v1689_v19 = vpack.c.bf16 %v1640_v16, %v1640_v16 }
 0x1de   : > { %1722 = vst.msk [vmem:[%s4494_s19 + $0x50] sm:$0xf] %vm1701_vm13, %v1689_v19  ;;  %1761 = vrot.lane.b32.xlu0 %v1689_v19, %s3892_s29  ;;  %v1957_v19 = vrot.slane %v1916_v46, 4 }
 0x1df   : > { %v1552_v13 = vpop.f32.mrf.mxu0  ;;  %v1641_v21 = vpop.f32.mrf.mxu1 }
 0x1e0   : > { %v1553_v22 = vadd.f32 %v4480_v1, %v1552_v13 }
 0x1e2   : > { %v1642_v23 = vadd.f32 %v1641_v21, %v1553_v22  ;;  %v1798_v25 = vpop.permute.xlu2 %1797 }
 0x1e3   : > { %1800 = vst.msk [vmem:[#allocation2 + $0x24] sm:$0xc] %vm1775_vm6, %v1798_v25 }
 0x1e4   : > { %v1690_v26 = vpack.c.bf16 %v1642_v23, %v1642_v23 }
 0x1e6   : > { %1723 = vst.msk [vmem:[%s4494_s19 + $0x54] sm:$0xf] %vm1701_vm13, %v1690_v26  ;;  %v1812_v27 = vrot.slane %v1690_v26, 6 }
 0x1e7   : > { %v1555_v28 = vpop.f32.mrf.mxu0  ;;  %v1644_v29 = vpop.f32.mrf.mxu1 }
 0x1e8   : > { %v1556_v30 = vadd.f32 %v4480_v1, %v1555_v28  ;;  %1813 = vrot.lane.b32.xlu1 %v1812_v27, %s3892_s29  ;;  %v1850_v32 = vrot.slane %v1812_v27, 4 }
 0x1ea   : > { %v1645_v34 = vadd.f32 %v1644_v29, %v1556_v30  ;;  %1851 = vrot.lane.b32.xlu0 %v1850_v32, %s3892_s29  ;;  %v1912_v18 = vpop.permute.xlu0 %1911  ;;  %v1839_v35 = vpop.permute.xlu2 %1838 }
 0x1eb   : > { %1914 = vst.msk [vmem:[#allocation2 + $0x30] sm:$0xc] %vm1773_vm4, %v1912_v18 }
 0x1ec   : > { %v1691_v31 = vpack.c.bf16 %v1645_v34, %v1645_v34  ;;  %1841 = vst.msk [vmem:[#allocation2 + $0xc] sm:$0x3] %vm1751_vm8, %v1839_v35 }
 0x1ee   : > { %1724 = vst.msk [vmem:[%s4494_s19 + $0x58] sm:$0xf] %vm1701_vm13, %v1691_v31  ;;  %v1565_v59 = vpop.f32.mrf.mxu3 }
 0x1ef   : > { %v1557_v37 = vpop.f32.mrf.mxu0  ;;  %v1646_v39 = vpop.f32.mrf.mxu1  ;;  %v1566_v24 = vadd.f32 %v4480_v1, %v1565_v59 }
 0x1f0   : > { %v1558_v40 = vadd.f32 %v4480_v1, %v1557_v37  ;;  %1885 = vrot.lane.b32.xlu1 %v1691_v31, %s3892_s29  ;;  %v1749_v41 = vpop.permute.xlu1 %1748  ;;  %v3761_v37 = vld [vmem:[%s5235_s3 + $0x38] sm:$0xff] }
 0x1f1   : > { %1752 = vst.msk [vmem:[#allocation2 + $0x24] sm:$0x3] %vm1751_vm8, %v1749_v41  ;;  %2414 = vmatpush.bf16.msrb.mxu2 %v3761_v37 }
 0x1f2   : > { %v1647_v42 = vadd.f32 %v1646_v39, %v1558_v40  ;;  %1776 = vst.msk [vmem:[#allocation2] sm:$0xc] %vm1775_vm6, %v1749_v41 }
 0x1f4   : > { %v4724_v36 = vpack.c.bf16 %v1647_v42, %v1647_v42 }
 0x1f6   : > { %1725 = vst.msk [vmem:[%s4494_s19 + $0x5c] sm:$0xf] %vm1701_vm13, %v4724_v36  ;;  %v1932_v43 = vrot.slane %v4724_v36, 6  ;;  %v1567_v11 = vpop.f32.mrf.mxu3 }
 0x1f7   : > { %v1560_v47 = vpop.f32.mrf.mxu0  ;;  %v1649_v48 = vpop.f32.mrf.mxu1  ;;  %v1568_v33 = vadd.f32 %v4480_v1, %v1567_v11 }
 0x1f8   : > { %v1561_v49 = vadd.f32 %v4480_v1, %v1560_v47  ;;  %1933 = vrot.lane.b32.xlu2 %v1932_v43, %s3892_s29  ;;  %v2024_v55 = vld [vmem:[#allocation2 + $0x24] sm:$0xf] }
 0x1f9   : > { %v1983_v44 = vld [vmem:[#allocation2] sm:$0xf] }
 0x1fa   : > { %v1650_v50 = vadd.f32 %v1649_v48, %v1561_v49  ;;  %1986 = vst.msk [vmem:[#allocation5] sm:$0xf] %vm1985_vm9, %v1983_v44  ;;  %v2090_v36 = vld [vmem:[#allocation2] sm:$0xc] }
 0x1fc   : > { %v1693_v51 = vpack.c.bf16 %v1650_v50, %v1650_v50 }
 0x1fe   : > { %1726 = vst.msk [vmem:[%s4494_s19 + $0x60] sm:$0xf] %vm1701_vm13, %v1693_v51  ;;  %1766 = vrot.lane.b32.xlu0 %v1693_v51, %s3891_s28 }
 0x1ff   : > { %v1562_v53 = vpop.f32.mrf.mxu0  ;;  %v1651_v54 = vpop.f32.mrf.mxu1 }
 0x200   : > { %v1563_v56 = vadd.f32 %v4480_v1, %v1562_v53  ;;  %v1875_v58 = vpop.permute.xlu0 %1874  ;;  %2028 = vrot.lane.b32.xlu2 %v2024_v55, %s3891_s28  ;;  %v3760_v53 = vld [vmem:[%s5235_s3 + $0x30] sm:$0xff] }
 0x201   : > { %1877 = vst.msk [vmem:[#allocation2 + $0x30] sm:$0x3] %vm1751_vm8, %v1875_v58  ;;  %2415 = vmatpush.bf16.msrb.mxu2 %v3760_v53 }
 0x202   : > { %v1652_v60 = vadd.f32 %v1651_v54, %v1563_v56  ;;  %1897 = vst.msk [vmem:[#allocation2 + $0xc] sm:$0xc] %vm1775_vm6, %v1875_v58  ;;  %v3759_v54 = vld [vmem:[%s5235_s3 + $0x28] sm:$0xff]  ;;  %v3865_v56 = vld [vmem:[%s5234_s2] ss:$0 sm:$0xff] }
 0x204   : > { %v1694_v61 = vpack.c.bf16 %v1652_v60, %v1652_v60  ;;  %v3758_v60 = vld [vmem:[%s5235_s3 + $0x20] sm:$0xff] }
 0x205   : > { %2416 = vmatpush.bf16.msrb.mxu2 %v3759_v54 }
 0x206   : > { %1727 = vst.msk [vmem:[%s4494_s19 + $0x64] sm:$0xf] %vm1701_vm13, %v1694_v61  ;;  %v1818_v3 = vrot.slane %v1694_v61, 6 }
 0x207   : > { %v1654_v5 = vpop.f32.mrf.mxu1 }
 0x208   : > { %v1655_v6 = vadd.f32 %v1654_v5, %v1566_v24  ;;  %1953 = vrot.lane.b32.xlu2 %v1952_v4, %s3892_s29  ;;  %v1855_v8 = vrot.slane %v1818_v3, 4 }
 0x209   : > { %v1984_v9 = vld [vmem:[#allocation2 + $0xc] sm:$0xf]  ;;  %2417 = vmatpush.bf16.msrb.mxu2 %v3758_v60  ;;  %v3768_v60 = vld [vmem:[%s5235_s3 + $0x70] sm:$0xff] }
 0x20a   : > { %v1695_v38 = vpack.c.bf16 %v1655_v6, %v1655_v6  ;;  %v1918_v0 = vpop.permute.xlu1 %1917  ;;  %1856 = vrot.lane.b32.xlu0 %v1855_v8, %s3891_s28  ;;  %1987 = vst.msk [vmem:[#allocation5 + $0xc] sm:$0xf] %vm1985_vm9, %v1984_v9  ;;  %v3756_v6 = vld [vmem:[%s5235_s3 + $0x10] sm:$0xff]  ;;  %v3755_v8 = vld [vmem:[%s5235_s3 + $0x8] sm:$0xff]  ;;  %v3754_v9 = vld [vmem:[%s5235_s3] sm:$0xff] }
 0x20b   : > { %1920 = vst.msk [vmem:[#allocation2 + $0x30] sm:$0xc] %vm1775_vm6, %v1918_v0 }
 0x20c   : > { %1728 = vst.msk [vmem:[%s4494_s19 + $0x68] sm:$0xf] %vm1701_vm13, %v1695_v38  ;;  %1890 = vrot.lane.b32.xlu1 %v1695_v38, %s3891_s28 }
 0x20f   : > { %v1656_v52 = vpop.f32.mrf.mxu1 }
 0x210   : > { %v1657_v12 = vadd.f32 %v1656_v52, %v1568_v33 }
 0x212   : > { %v4755_v14 = vpack.c.bf16 %v1657_v12, %v1657_v12  ;;  %1819 = vrot.lane.b32.xlu0 %v1818_v3, %s3891_s28  ;;  %v2025_v16 = vld [vmem:[#allocation2 + $0x30] sm:$0xf]  ;;  %v3757_v3 = vld [vmem:[%s5235_s3 + $0x18] sm:$0xff] }
 0x213   : > { %2418 = vmatpush.bf16.msrb.mxu2 %v3757_v3 }
 0x214   : > { %1729 = vst.msk [vmem:[%s4494_s19 + $0x6c] sm:$0xf] %vm1701_vm13, %v4755_v14  ;;  %v1938_v2 = vrot.slane %v4755_v14, 6 }
 0x216   : > { %1939 = vrot.lane.b32.xlu1 %v1938_v2, %s3891_s28 }
 0x217   : > { %2419 = vmatpush.bf16.msrb.mxu2 %v3756_v6 }
 0x218   : > { %v1757_v15 = vpop.permute.xlu2 %1756 }
 0x219   : > { %1759 = vst.msk [vmem:[#allocation2 + $0x28] sm:$0x3] %vm1739_vm14, %v1757_v15 }
 0x21a   : > { %1779 = vst.msk [vmem:[#allocation2 + $0x4] sm:$0xc] %vm1771_vm15, %v1757_v15  ;;  %2030 = vrot.lane.b32.xlu0 %v2025_v16, %s3891_s28 }
 0x21b   : > { %2420 = vmatpush.bf16.msrb.mxu2 %v3755_v8 }
 0x21e   : > { %1948 = vrot.lane.b32.xlu1 %v1947_v17, %s3894_s14 }
 0x21f   : > { %2421 = vmatpush.bf16.msrb.mxu2 %v3754_v9 }
 0x220   : > { %v1570_v63 = vpop.f32.mrf.mxu3 }
 0x221   : > { %v1571_v45 = vadd.f32 %v4480_v1, %v1570_v63  ;;  %v1659_v46 = vpop.f32.mrf.mxu2 }
 0x222   : > { %1958 = vrot.lane.b32.xlu0 %v1957_v19, %s3891_s28 }
 0x223   : > { %v1660_v23 = vadd.f32 %v1659_v46, %v1571_v45 }
 0x225   : > { %v1697_v27 = vpack.c.bf16 %v1660_v23, %v1660_v23 }
 0x227   : > { %1730 = vst.msk [vmem:[%s4494_s19 + $0x70] sm:$0xf] %vm1701_vm13, %v1697_v27 }
 0x228   : > { %v1881_v13 = vpop.permute.xlu2 %1880  ;;  %v1572_v28 = vpop.f32.mrf.mxu3  ;;  %1770 = vst.msk [vmem:[#allocation2 + $0x2c] sm:$0x3] %vm1753_vm0, %v1697_v27 }
 0x229   : > { %1883 = vst.msk [vmem:[#allocation2 + $0x34] sm:$0x3] %vm1739_vm14, %v1881_v13  ;;  %v1573_v29 = vadd.f32 %v4480_v1, %v1572_v28  ;;  %v1661_v30 = vpop.f32.mrf.mxu2 }
 0x22a   : > { %1899 = vst.msk [vmem:[#allocation2 + $0x10] sm:$0xc] %vm1771_vm15, %v1881_v13 }
 0x22b   : > { %1782 = vst.msk [vmem:[#allocation2 + $0x8] sm:$0xc] %vm1777_vm1, %v1697_v27  ;;  %v1662_v32 = vadd.f32 %v1661_v30, %v1573_v29  ;;  %v1975_v30 = vrot.slane %v1938_v2, 4 }
 0x22d   : > { %v1698_v34 = vpack.c.bf16 %v1662_v32, %v1662_v32 }
 0x22f   : > { %1731 = vst.msk [vmem:[%s4494_s19 + $0x74] sm:$0xf] %vm1701_vm13, %v1698_v34  ;;  %v1824_v31 = vrot.slane %v1698_v34, 6 }
 0x230   : > { %v1575_v41 = vpop.f32.mrf.mxu3 }
 0x231   : > { %1826 = vst.msk [vmem:[#allocation2 + $0x2c] sm:$0xc] %vm1777_vm1, %v1824_v31  ;;  %v1860_v47 = vrot.slane %v1824_v31, 4  ;;  %v1576_v48 = vadd.f32 %v4480_v1, %v1575_v41  ;;  %v1664_v44 = vpop.f32.mrf.mxu2 }
 0x232   : > { %v1928_v21 = vpop.permute.xlu2 %1927 }
 0x233   : > { %1930 = vst.msk [vmem:[#allocation2 + $0x34] sm:$0xc] %vm1771_vm15, %v1928_v21  ;;  %v1665_v50 = vadd.f32 %v1664_v44, %v1576_v48 }
 0x234   : > { %1862 = vst.msk [vmem:[#allocation2 + $0x14] sm:$0x3] %vm1753_vm0, %v1860_v47 }
 0x235   : > { %v1699_v51 = vpack.c.bf16 %v1665_v50, %v1665_v50 }
 0x237   : > { %1732 = vst.msk [vmem:[%s4494_s19 + $0x78] sm:$0xf] %vm1701_vm13, %v1699_v51 }
 0x238   : > { %v1577_v55 = vpop.f32.mrf.mxu3  ;;  %1894 = vst.msk [vmem:[#allocation2 + $0x38] sm:$0x3] %vm1753_vm0, %v1699_v51 }
 0x239   : > { %v1578_v58 = vadd.f32 %v3865_v56, %v1577_v55  ;;  %1902 = vst.msk [vmem:[#allocation2 + $0x14] sm:$0xc] %vm1777_vm1, %v1699_v51 }
 0x23a   : > { %v1808_v22 = vpop.permute.xlu1 %1807 }
 0x23b   : > { %1810 = vst.msk [vmem:[#allocation2 + $0x28] sm:$0xc] %vm1771_vm15, %v1808_v22  ;;  %vm2038_vm15 = vcmask 523268  }
 0x23c   : > { %vm4804_vm12 = vmor %vm2038_vm15, %vm885_vm5  ;;  %vm433_vm5 = vcmask 517120  }
 0x23d   : > { %434 = vst.msk [vmem:[#allocation2 + $0x20] sm:$0x3] %vm433_vm5, %v3897_v62  ;;  %v1666_v62 = vpop.f32.mrf.mxu2 }
 0x23e   : > { %v1667_v59 = vadd.f32 %v1666_v62, %v1578_v58  ;;  %v3769_v58 = vld [vmem:[%s5235_s3 + $0x78] sm:$0xff] }
 0x23f   : > { %2443 = vmatpush.bf16.msrb.mxu3 %v3769_v58 }
 0x240   : > { %v1700_v61 = vpack.c.bf16 %v1667_v59, %v1667_v59 }
 0x242   : > { %v1847_v57 = vpop.permute.xlu1 %1846  ;;  %1733 = vst.msk [vmem:[%s4494_s19 + $0x7c] sm:$0xf] %vm1701_vm13, %v1700_v61  ;;  %v1944_v24 = vrot.slane %v1700_v61, 6  ;;  %v3767_v61 = vld [vmem:[%s5235_s3 + $0x68] sm:$0xff]  ;;  %vm2113_vm13 = vcmask 1043968  }
 0x243   : > { %1849 = vst.msk [vmem:[#allocation2 + $0x10] sm:$0x3] %vm1739_vm14, %v1847_v57  ;;  %2444 = vmatpush.bf16.msrb.mxu3 %v3768_v60 }
 0x244   : > { %1946 = vst.msk [vmem:[#allocation2 + $0x38] sm:$0xc] %vm1777_vm1, %v1944_v24  ;;  %v1980_v4 = vrot.slane %v1944_v24, 4 }
 0x246   : > { %1982 = vst.msk [vmem:[#allocation2 + $0x20] sm:$0x3] %vm1753_vm0, %v1980_v4  ;;  %v3766_v4 = vld [vmem:[%s5235_s3 + $0x60] sm:$0xff]  ;;  %vm2114_vm0 = vcmask 261124  }
 0x247   : > { %2445 = vmatpush.bf16.msrb.mxu3 %v3767_v61  ;;  %vm4931_vm1 = vmor %vm2114_vm0, %vm2113_vm13  ;;  %vm2531_vm0 = vcmask 1043970  }
 0x24b   : > { %2446 = vmatpush.bf16.msrb.mxu3 %v3766_v4 }
 0x250   : > { %v1762_v25 = vpop.permute.xlu0 %1761 }
 0x251   : > { %1764 = vst.msk [vmem:[#allocation2 + $0x28] sm:$0x3] %vm1745_vm3, %v1762_v25 }
 0x252   : > { %1780 = vst.msk [vmem:[#allocation2 + $0x4] sm:$0xc] %vm1773_vm4, %v1762_v25  ;;  %v1934_v26 = vpop.permute.xlu2 %1933  ;;  %v1970_v25 = vrot.slane %v1932_v43, 4 }
 0x253   : > { %1936 = vst.msk [vmem:[#allocation2 + $0x34] sm:$0xc] %vm1773_vm4, %v1934_v26  ;;  %v1965_v26 = vrot.slane %v1926_v10, 4  ;;  %v2091_v10 = vld [vmem:[#allocation2 + $0xc] sm:$0xf] }
 0x254   : > { %v2098_v43 = vrot.slane %v2091_v10, 6 }
 0x25a   : > { %v1814_v18 = vpop.permute.xlu1 %1813  ;;  %v2029_v35 = vpop.permute.xlu2 %2028 }
 0x25b   : > { %1816 = vst.msk [vmem:[#allocation2 + $0x28] sm:$0xc] %vm1773_vm4, %v1814_v18  ;;  %v2032_v40 = vrot.slane %v2029_v35, 4  ;;  %v3401_v18 = vrot.slane %v2090_v36, 10 }
 0x25c   : > { %v1852_v42 = vpop.permute.xlu0 %1851 }
 0x25d   : > { %v2034_v49 = vsel %vm876_vm7, %v2032_v40, %v2029_v35  ;;  %1854 = vst.msk [vmem:[#allocation2 + $0x10] sm:$0x3] %vm1745_vm3, %v1852_v42  ;;  %v2099_v14 = vsel %vm4029_vm2, %v3401_v18, %v2098_v43  ;;  %v2100_v40 = vrot.slane %v2098_v43, 4 }
 0x25e   : > { %2040 = vst.msk [vmem:[#allocation5] sm:$0xff] %vm4804_vm12, %v2034_v49 }
 0x262   : > { %v1886_v1 = vpop.permute.xlu1 %1885  ;;  %v1954_v45 = vpop.permute.xlu2 %1953 }
 0x263   : > { %1888 = vst.msk [vmem:[#allocation2 + $0x34] sm:$0x3] %vm1745_vm3, %v1886_v1 }
 0x264   : > { %1900 = vst.msk [vmem:[#allocation2 + $0x10] sm:$0xc] %vm1773_vm4, %v1886_v1 }
 0x265   : > { %v3407_v27 = vld [vmem:[#allocation5] sm:$0xf] }
 0x270   : > { %v1767_v5 = vpop.permute.xlu0 %1766 }
 0x271   : > { %1769 = vst.msk [vmem:[#allocation2 + $0x28] sm:$0x3] %vm1751_vm8, %v1767_v5 }
 0x272   : > { %1781 = vst.msk [vmem:[#allocation2 + $0x4] sm:$0xc] %vm1775_vm6, %v1767_v5 }
 0x279   : > { %v1988_v38 = vld [vmem:[#allocation2] sm:$0xff] }
 0x27a   : > { %1992 = vrot.lane.b32.xlu1 %v1988_v38, %s3892_s29  ;;  %v2004_v0 = vld [vmem:[#allocation2 + $0x4] sm:$0xf]  ;;  %v3765_v38 = vld [vmem:[%s5235_s3 + $0x58] sm:$0xff] }
 0x27b   : > { %2006 = vst.msk [vmem:[#allocation5 + $0x30] sm:$0xf] %vm1985_vm9, %v2004_v0  ;;  %v2008_v7 = vld [vmem:[#allocation2 + $0x4] sm:$0xff]  ;;  %2447 = vmatpush.bf16.msrb.mxu3 %v3765_v38 }
 0x27c   : > { %v1857_v11 = vpop.permute.xlu0 %1856  ;;  %v2135_v41 = vld [vmem:[#allocation2 + $0x4] sm:$0xc] }
 0x27d   : > { %1859 = vst.msk [vmem:[#allocation2 + $0x10] sm:$0x3] %vm1751_vm8, %v1857_v11  ;;  %v3403_v48 = vrot.slane %v2135_v41, 10  ;;  %v2118_v6 = vld [vmem:[#allocation2] sm:$0xcc] }
 0x27e   : > { %v1891_v33 = vpop.permute.xlu1 %1890  ;;  %v2160_v43 = vld [vmem:[#allocation2 + $0x4] sm:$0xcc] }
 0x27f   : > { %1893 = vst.msk [vmem:[#allocation2 + $0x34] sm:$0x3] %vm1751_vm8, %v1891_v33 }
 0x280   : > { %1901 = vst.msk [vmem:[#allocation2 + $0x10] sm:$0xc] %vm1775_vm6, %v1891_v33  ;;  %v3402_v33 = vrot.slane %v2118_v6, 10 }
 0x284   : > { %v1820_v52 = vpop.permute.xlu0 %1819 }
 0x285   : > { %1822 = vst.msk [vmem:[#allocation2 + $0x28] sm:$0xc] %vm1775_vm6, %v1820_v52 }
 0x287   : > { %v4859_v12 = vld [vmem:[#allocation2 + $0xc] sm:$0xff] }
 0x288   : > { %1994 = vrot.lane.b32.xlu2 %v4859_v12, %s3892_s29  ;;  %v1940_v15 = vpop.permute.xlu1 %1939  ;;  %v2005_v16 = vld [vmem:[#allocation2 + $0x10] sm:$0xf]  ;;  %v2126_v9 = vrot.slane %v4859_v12, 6 }
 0x289   : > { %1942 = vst.msk [vmem:[#allocation2 + $0x34] sm:$0xc] %vm1775_vm6, %v1940_v15  ;;  %v4884_v32 = vld [vmem:[#allocation2 + $0x10] sm:$0xff] }
 0x28a   : > { %2007 = vst.msk [vmem:[#allocation5 + $0x3c] sm:$0xf] %vm1985_vm9, %v2005_v16  ;;  %v4894_v37 = vld [vmem:[#allocation2 + $0x10] sm:$0xf]  ;;  %v2127_v12 = vsel %vm4029_vm2, %v3402_v33, %v2126_v9 }
 0x28b   : > { %v2143_v47 = vrot.slane %v4894_v37, 6 }
 0x28c   : > { %v2031_v17 = vpop.permute.xlu0 %2030  ;;  %v2042_v19 = vld [vmem:[#allocation2 + $0x24] sm:$0xff] }
 0x28d   : > { %v2033_v13 = vrot.slane %v2031_v17, 4  ;;  %2046 = vrot.lane.b32.xlu0 %v2042_v19, %s3894_s14  ;;  %v2058_v22 = vld [vmem:[#allocation2 + $0x28] sm:$0xf]  ;;  %v2144_v49 = vsel %vm4029_vm2, %v3403_v48, %v2143_v47  ;;  %v3764_v19 = vld [vmem:[%s5235_s3 + $0x50] sm:$0xff]  ;;  %v2145_v48 = vrot.slane %v2143_v47, 4 }
 0x28e   : > { %v2074_v34 = vld [vmem:[#allocation2 + $0x28] sm:$0xff]  ;;  %2448 = vmatpush.bf16.msrb.mxu3 %v3764_v19 }
 0x28f   : > { %v2035_v21 = vsel %vm876_vm7, %v2033_v13, %v2031_v17 }
 0x290   : > { %2041 = vst.msk [vmem:[#allocation5 + $0xc] sm:$0xff] %vm4804_vm12, %v2035_v21  ;;  %2062 = vrot.lane.b32.xlu2 %v2058_v22, %s3891_s28  ;;  %v1949_v57 = vpop.permute.xlu1 %1948  ;;  %v2043_v63 = vld [vmem:[#allocation2 + $0x30] sm:$0xff] }
 0x291   : > { %1951 = vst.msk [vmem:[#allocation2 + $0x18] sm:$0x3] %vm1739_vm14, %v1949_v57  ;;  %2048 = vrot.lane.b32.xlu1 %v2043_v63, %s3894_s14  ;;  %v2059_v23 = vld [vmem:[#allocation2 + $0x34] sm:$0xf]  ;;  %v3771_v63 = vld [vmem:[%s5235_s3 + $0x88] sm:$0xff] }
 0x292   : > { %1956 = vst.msk [vmem:[#allocation2 + $0x18] sm:$0x3] %vm1745_vm3, %v1954_v45  ;;  %v2075_v2 = vld [vmem:[#allocation2 + $0x34] sm:$0xff]  ;;  %v3763_v45 = vld [vmem:[%s5235_s3 + $0x48] sm:$0xff]  ;;  %2478 = vmatpush.bf16.msra.mxu2 %v3771_v63 }
 0x293   : > { %2449 = vmatpush.bf16.msrb.mxu3 %v3763_v45 }
 0x294   : > { %v1959_v46 = vpop.permute.xlu0 %1958 }
 0x295   : > { %1961 = vst.msk [vmem:[#allocation2 + $0x18] sm:$0x3] %vm1751_vm8, %v1959_v46  ;;  %2064 = vrot.lane.b32.xlu0 %v2059_v23, %s3891_s28  ;;  %v3762_v23 = vld [vmem:[%s5235_s3 + $0x40] sm:$0xff] }
 0x297   : > { %v3743_v28 = vld [vmem:[#allocation5 + $0x8] sm:$0xf0]  ;;  %2450 = vmatpush.bf16.msrb.mxu3 %v3762_v23 }
 0x298   : > { %1971 = vrot.lane.b32.xlu2 %v1970_v25, %s3892_s29  ;;  %v3408_v29 = vor.u32 %v3743_v28, %v3407_v27 }
 0x299   : > { %1966 = vrot.lane.b32.xlu1 %v1965_v26, %s3894_s14 }
 0x29a   : > { %2422 = vmatmul.bf16.vlgmr.msrb.gmra.mxu2 %v3408_v29 }
 0x29c   : > { %v2092_v35 = vld [vmem:[#allocation2 + $0x18] sm:$0x3] }
 0x29d   : > { %1976 = vrot.lane.b32.xlu0 %v1975_v30, %s3891_s28  ;;  %v2101_v31 = vrot.slane %v2092_v35, 6  ;;  %v2168_v35 = vrot.slane %v4884_v32, 6 }
 0x29f   : > { %v2102_v42 = vsel %vm4029_vm2, %v2100_v40, %v2101_v31 }
 0x2a0   : > { %2014 = vrot.lane.b32.xlu2 %v4884_v32, %s3892_s29 }
 0x2a1   : > { %2012 = vrot.lane.b32.xlu1 %v2008_v7, %s3892_s29 }
 0x2a5   : > { %2078 = vrot.lane.b32.xlu0 %v2074_v34, %s3894_s14  ;;  %v2128_v34 = vrot.slane %v2126_v9, 4 }
 0x2a8   : > { %2103 = vrot.lane.b32.xlu2 %v2099_v14, %s3892_s29 }
 0x2a9   : > { %2080 = vrot.lane.b32.xlu1 %v2075_v2, %s3894_s14  ;;  %s3700_s14 = sshll.u32 %s5267_s12, 3 }
 0x2aa   : > { %s425_s15 = scalar_lea.vmem %s5241_s9, %s3700_s14 }
 0x2ad   : > { %2105 = vrot.lane.b32.xlu0 %v2102_v42, %s3892_s29  ;;  %v3404_v42 = vrot.slane %v2160_v43, 10 }
 0x2b1   : > { %2148 = vrot.lane.b32.xlu1 %v2144_v49, %s3892_s29 }
 0x2e2   : > { %v1995_v44 = vpop.permute.xlu2 %1994 }
 0x2e3   : > { %v1997_v50 = vrot.slane %v1995_v44, 4 }
 0x2e5   : > { %v1999_v51 = vsel %vm927_vm10, %v1995_v44, %v1997_v50 }
 0x2e6   : > { %2003 = vst.msk [vmem:[#allocation5 + $0x24] sm:$0xf] %vm1985_vm9, %v1999_v51  ;;  %v2169_v51 = vsel %vm4029_vm2, %v3404_v42, %v2168_v35 }
 0x2ea   : > { %v2063_v53 = vpop.permute.xlu2 %2062 }
 0x2eb   : > { %v2066_v1 = vrot.slane %v2063_v53, 4 }
 0x2ec   : > { %v1993_v54 = vpop.permute.xlu1 %1992 }
 0x2ed   : > { %v2068_v55 = vsel %vm876_vm7, %v2066_v1, %v2063_v53  ;;  %v1996_v56 = vrot.slane %v1993_v54, 4 }
 0x2ee   : > { %2072 = vst.msk [vmem:[#allocation5 + $0x30] sm:$0xff] %vm4804_vm12, %v2068_v55  ;;  %v3770_v55 = vld [vmem:[%s5235_s3 + $0x80] sm:$0xff] }
 0x2ef   : > { %v1998_v62 = vsel %vm927_vm10, %v1993_v54, %v1996_v56  ;;  %v2170_v54 = vrot.slane %v2168_v35, 4  ;;  %2479 = vmatpush.bf16.msra.mxu2 %v3770_v55 }
 0x2f0   : > { %2002 = vst.msk [vmem:[#allocation5 + $0x18] sm:$0xf] %vm1985_vm9, %v1998_v62 }
 0x2f2   : > { %v1972_v59 = vpop.permute.xlu2 %1971 }
 0x2f5   : > { %v3431_v58 = vld [vmem:[#allocation5 + $0x30] sm:$0xf] }
 0x2fa   : > { %v2015_v24 = vpop.permute.xlu2 %2014 }
 0x2fb   : > { %v2017_v3 = vrot.slane %v2015_v24, 4 }
 0x2fd   : > { %v2019_v5 = vsel %vm927_vm10, %v2015_v24, %v2017_v3 }
 0x2fe   : > { %2023 = vst.msk [vmem:[#allocation5 + $0x54] sm:$0xf] %vm1985_vm9, %v2019_v5 }
 0x2ff   : > { %v2047_v8 = vpop.permute.xlu0 %2046 }
 0x300   : > { %v2050_v0 = vrot.slane %v2047_v8, 4 }
 0x302   : > { %v2052_v52 = vsel %vm526_vm11, %v2050_v0, %v2047_v8  ;;  %v2104_v15 = vpop.permute.xlu2 %2103 }
 0x303   : > { %2056 = vst.msk [vmem:[#allocation5 + $0x18] sm:$0xff] %vm4804_vm12, %v2052_v52  ;;  %v2107_v16 = vrot.slane %v2104_v15, 4  ;;  %v2049_v17 = vpop.permute.xlu1 %2048 }
 0x304   : > { %2133 = vst.msk [vmem:[#allocation5 + $0x1c] sm:$0xff] %vm4931_vm1, %v2127_v12  ;;  %v2051_v13 = vrot.slane %v2049_v17, 4 }
 0x305   : > { %v2109_v21 = vsel %vm927_vm10, %v2107_v16, %v2104_v15 }
 0x306   : > { %2116 = vst.msk [vmem:[#allocation5 + $0x4] sm:$0xff] %vm4931_vm1, %v2109_v21  ;;  %v2053_v22 = vsel %vm526_vm11, %v2051_v13, %v2049_v17 }
 0x307   : > { %2057 = vst.msk [vmem:[#allocation5 + $0x24] sm:$0xff] %vm4804_vm12, %v2053_v22  ;;  %v2065_v57 = vpop.permute.xlu0 %2064 }
 0x308   : > { %v2067_v46 = vrot.slane %v2065_v57, 4 }
 0x30a   : > { %v2069_v25 = vsel %vm876_vm7, %v2067_v46, %v2065_v57  ;;  %v3419_v27 = vld [vmem:[#allocation5 + $0x18] sm:$0xf]  ;;  %vm5251_vm7 = vcmask 519168  }
 0x30b   : > { %2073 = vst.msk [vmem:[#allocation5 + $0x3c] sm:$0xff] %vm4804_vm12, %v2069_v25  ;;  %v1967_v26 = vpop.permute.xlu1 %1966  ;;  %v3745_v52 = vld [vmem:[#allocation5 + $0x1c] sm:$0xf]  ;;  %v3427_v13 = vld [vmem:[#allocation5 + $0x20] sm:$0xf] }
 0x30c   : > { %1969 = vst.msk [vmem:[#allocation2 + $0x1c] sm:$0x3] %vm1739_vm14, %v1967_v26  ;;  %vm2533_vm14 = vcmask 519170  }
 0x30d   : > { %1974 = vst.msk [vmem:[#allocation2 + $0x1c] sm:$0x3] %vm1745_vm3, %v1972_v59  ;;  %v3742_v5 = vld [vmem:[#allocation5 + $0x4] sm:$0xf]  ;;  %v3415_v16 = vld [vmem:[#allocation5 + $0x8] sm:$0xf]  ;;  %vm5253_vm3 = vmmov %vm5251_vm7 }
 0x30e   : > { %v3746_v28 = vld [vmem:[#allocation5 + $0x20] sm:$0xf0]  ;;  %vm5254_vm4 = vmmov %vm5253_vm3 }
 0x30f   : > { %v1977_v29 = vpop.permute.xlu0 %1976  ;;  %v3420_v30 = vor.u32 %v3746_v28, %v3419_v27  ;;  %vm5255_vm6 = vmmov %vm5253_vm3 }
 0x310   : > { %1979 = vst.msk [vmem:[#allocation2 + $0x1c] sm:$0x3] %vm1751_vm8, %v1977_v29  ;;  %vm5256_vm8 = vmmov %vm5253_vm3 }
 0x311   : > { %2427 = vmatmul.bf16.gmra.mxu2 %v3420_v30 }
 0x312   : > { %v3749_v47 = vld [vmem:[#allocation5 + $0x38] sm:$0xf0] }
 0x313   : > { %v2013_v7 = vpop.permute.xlu1 %2012  ;;  %v3432_v60 = vor.u32 %v3749_v47, %v3431_v58 }
 0x314   : > { %v2016_v10 = vrot.slane %v2013_v7, 4 }
 0x316   : > { %v2018_v36 = vsel %vm927_vm10, %v2013_v7, %v2016_v10 }
 0x317   : > { %v2120_v18 = vld [vmem:[#allocation2 + $0x18] sm:$0x33]  ;;  %2022 = vst.msk [vmem:[#allocation5 + $0x48] sm:$0xf] %vm1985_vm9, %v2018_v36  ;;  %v2079_v14 = vpop.permute.xlu0 %2078  ;;  %vm5257_vm9 = vmmov %vm5253_vm3 }
 0x318   : > { %v2129_v2 = vrot.slane %v2120_v18, 6  ;;  %v2082_v31 = vrot.slane %v2079_v14, 4  ;;  %v2162_v40 = vld [vmem:[#allocation2 + $0x1c] sm:$0x33] }
 0x319   : > { %v2137_v41 = vld [vmem:[#allocation2 + $0x1c] sm:$0x3]  ;;  %v2171_v53 = vrot.slane %v2162_v40, 6 }
 0x31a   : > { %v2146_v49 = vrot.slane %v2137_v41, 6  ;;  %v2084_v44 = vsel %vm526_vm11, %v2082_v31, %v2079_v14  ;;  %v2130_v50 = vsel %vm4029_vm2, %v2128_v34, %v2129_v2  ;;  %v5013_v41 = vld [vmem:[%s5236_s4] ss:$0 sm:$0xff] }
 0x31b   : > { %2088 = vst.msk [vmem:[#allocation5 + $0x48] sm:$0xff] %vm4804_vm12, %v2084_v44  ;;  %v2081_v32 = vpop.permute.xlu1 %2080  ;;  %v2172_v62 = vsel %vm4029_vm2, %v2170_v54, %v2171_v53 }
 0x31c   : > { %v2147_v1 = vsel %vm4029_vm2, %v2145_v48, %v2146_v49  ;;  %2175 = vst.msk [vmem:[#allocation5 + $0x4c] sm:$0xff] %vm4931_vm1, %v2169_v51  ;;  %v2083_v37 = vrot.slane %v2081_v32, 4 }
 0x31d   : > { %2150 = vrot.lane.b32.xlu2 %v2147_v1, %s3892_s29  ;;  %2134 = vst.msk [vmem:[#allocation5 + $0x28] sm:$0xff] %vm4931_vm1, %v2130_v50  ;;  %v2423_v26 = vpop.f32.mrf.mxu2 }
 0x31e   : > { %v2085_v56 = vsel %vm526_vm11, %v2083_v37, %v2081_v32  ;;  %v2424_v42 = vadd.f32 %v5013_v41, %v2423_v26  ;;  %v3784_v26 = vld [vmem:[%s5237_s5 + $0x38] sm:$0xff] }
 0x31f   : > { %2089 = vst.msk [vmem:[#allocation5 + $0x54] sm:$0xff] %vm4804_vm12, %v2085_v56  ;;  %v2106_v59 = vpop.permute.xlu0 %2105  ;;  %2944 = vmatpush.bf16.msra.mxu3 %v3784_v26  ;;  %vm5258_vm12 = vmmov %vm5253_vm3 }
 0x320   : > { %2176 = vst.msk [vmem:[#allocation5 + $0x58] sm:$0xff] %vm4931_vm1, %v2172_v62  ;;  %v2108_v61 = vrot.slane %v2106_v59, 4 }
 0x321   : > { %2432 = vmatmul.bf16.gmra.mxu2 %v3432_v60 }
 0x322   : > { %v2110_v24 = vsel %vm927_vm10, %v2108_v61, %v2106_v59  ;;  %v3443_v38 = vld [vmem:[#allocation5 + $0x48] sm:$0xf] }
 0x323   : > { %2117 = vst.msk [vmem:[#allocation5 + $0x10] sm:$0xff] %vm4931_vm1, %v2110_v24  ;;  %v2149_v3 = vpop.permute.xlu1 %2148  ;;  %v3751_v10 = vld [vmem:[#allocation5 + $0x4c] sm:$0xf]  ;;  %v3451_v36 = vld [vmem:[#allocation5 + $0x50] sm:$0xf] }
 0x324   : > { %v2152_v4 = vrot.slane %v2149_v3, 4  ;;  %v3421_v33 = vld [vmem:[#allocation5 + $0x24] sm:$0xf0]  ;;  %v3747_v19 = vld [vmem:[#allocation5 + $0x28] sm:$0xf0] }
 0x325   : > { %v3424_v15 = vor.u32 %v3745_v52, %v3421_v33  ;;  %v3428_v21 = vor.u32 %v3747_v19, %v3427_v13  ;;  %v2425_v29 = vpop.f32.mrf.mxu2 }
 0x326   : > { %v2154_v39 = vsel %vm927_vm10, %v2152_v4, %v2149_v3  ;;  %v3752_v9 = vld [vmem:[#allocation5 + $0x50] sm:$0xf0]  ;;  %v2426_v32 = vadd.f32 %v5013_v41, %v2425_v29 }
 0x327   : > { %2158 = vst.msk [vmem:[#allocation5 + $0x34] sm:$0xff] %vm4931_vm1, %v2154_v39  ;;  %v3444_v0 = vor.u32 %v3752_v9, %v3443_v38  ;;  %v3445_v30 = vld [vmem:[#allocation5 + $0x54] sm:$0xf0]  ;;  %v3753_v7 = vld [vmem:[#allocation5 + $0x58] sm:$0xf0] }
 0x328   : > { %v3448_v43 = vor.u32 %v3751_v10, %v3445_v30  ;;  %v3452_v34 = vor.u32 %v3753_v7, %v3451_v36  ;;  %v3783_v30 = vld [vmem:[%s5237_s5 + $0x30] sm:$0xff] }
 0x329   : > { %2945 = vmatpush.bf16.msra.mxu3 %v3783_v30 }
 0x32a   : > { %v3409_v6 = vld [vmem:[#allocation5 + $0xc] sm:$0xf0]  ;;  %v3744_v12 = vld [vmem:[#allocation5 + $0x10] sm:$0xf0] }
 0x32b   : > { %v3412_v8 = vor.u32 %v3742_v5, %v3409_v6  ;;  %v3416_v17 = vor.u32 %v3744_v12, %v3415_v16 }
 0x32d   : > { %2451 = vmatmul.bf16.vlgmr.msrb.gmra.mxu3 %v3412_v8 }
 0x32e   : > { %v3748_v45 = vld [vmem:[#allocation5 + $0x34] sm:$0xf]  ;;  %v3439_v23 = vld [vmem:[#allocation5 + $0x38] sm:$0xf] }
 0x331   : > { %2437 = vmatmul.bf16.gmra.mxu2 %v3444_v0 }
 0x33d   : > { %2456 = vmatmul.bf16.gmra.mxu3 %v3424_v15 }
 0x341   : > { %3525 = vmatmul.msk.bf16.vlgmr.msra.gmra.mxu2 %vm526_vm11, %v3416_v17 }
 0x351   : > { %3526 = vmatmul.msk.bf16.gmra.mxu2 %vm526_vm11, %v3428_v21 }
 0x377   : > { %v2151_v22 = vpop.permute.xlu2 %2150 }
 0x378   : > { %v2153_v57 = vrot.slane %v2151_v22, 4 }
 0x37a   : > { %v2155_v63 = vsel %vm927_vm10, %v2153_v57, %v2151_v22 }
 0x37b   : > { %2159 = vst.msk [vmem:[#allocation5 + $0x40] sm:$0xff] %vm4931_vm1, %v2155_v63  ;;  %vm2522_vm1 = vcmask 1041920  }
 0x382   : > { %v3433_v46 = vld [vmem:[#allocation5 + $0x3c] sm:$0xf0]  ;;  %v3750_v25 = vld [vmem:[#allocation5 + $0x40] sm:$0xf0] }
 0x383   : > { %v3436_v27 = vor.u32 %v3748_v45, %v3433_v46  ;;  %v3440_v28 = vor.u32 %v3750_v25, %v3439_v23 }
 0x385   : > { %2461 = vmatmul.bf16.gmra.mxu3 %v3436_v27  ;;  %3527 = vmatmul.msk.bf16.gmra.mxu2 %vm526_vm11, %v3440_v28 }
 0x394   : > { %v2428_v11 = vpop.f32.mrf.mxu2 }
 0x395   : > { %2466 = vmatmul.bf16.gmra.mxu3 %v3448_v43  ;;  %3528 = vmatmul.msk.bf16.gmra.mxu2 %vm526_vm11, %v3452_v34  ;;  %v2429_v55 = vadd.f32 %v5013_v41, %v2428_v11  ;;  %vm5252_vm11 = vmmov %vm5251_vm7  ;;  %v3782_v43 = vld [vmem:[%s5237_s5 + $0x28] sm:$0xff] }
 0x396   : > { %2946 = vmatpush.bf16.msra.mxu3 %v3782_v43 }
 0x39c   : > { %v2430_v18 = vpop.f32.mrf.mxu2 }
 0x39d   : > { %v2431_v24 = vadd.f32 %v5013_v41, %v2430_v18  ;;  %v3781_v18 = vld [vmem:[%s5237_s5 + $0x20] sm:$0xff] }
 0x39e   : > { %2947 = vmatpush.bf16.msra.mxu3 %v3781_v18 }
 0x3a4   : > { %v2433_v35 = vpop.f32.mrf.mxu2 }
 0x3a5   : > { %v2434_v9 = vadd.f32 %v5013_v41, %v2433_v35 }
 0x3ac   : > { %v2435_v14 = vpop.f32.mrf.mxu2 }
 0x3ad   : > { %v2436_v12 = vadd.f32 %v5013_v41, %v2435_v14 }
 0x3b0   : > { %v2452_v31 = vpop.f32.mrf.mxu3 }
 0x3b1   : > { %v2453_v48 = vadd.f32 %v2452_v31, %v2424_v42  ;;  %v3780_v31 = vld [vmem:[%s5237_s5 + $0x18] sm:$0xff]  ;;  %v3777_v42 = vld [vmem:[%s5237_s5] sm:$0xff] }
 0x3b2   : > { %2948 = vmatpush.bf16.msra.mxu3 %v3780_v31 }
 0x3b4   : > { %v2438_v2 = vpop.f32.mrf.mxu2 }
 0x3b5   : > { %v2439_v22 = vadd.f32 %v5013_v41, %v2438_v2 }
 0x3b8   : > { %v2454_v49 = vpop.f32.mrf.mxu3 }
 0x3b9   : > { %v2455_v53 = vadd.f32 %v2454_v49, %v2426_v32  ;;  %v3792_v49 = vld [vmem:[%s5237_s5 + $0x78] sm:$0xff]  ;;  %v3798_v32 = vld [vmem:[%s5237_s5 + $0xa8] sm:$0xff] }
 0x3bc   : > { %v5008_v40 = vpop.f32.mrf.mxu2 }
 0x3bd   : > { %v2441_v27 = vadd.f32 %v5013_v41, %v5008_v40  ;;  %v3779_v40 = vld [vmem:[%s5237_s5 + $0x10] sm:$0xff]  ;;  %v3778_v41 = vld [vmem:[%s5237_s5 + $0x8] sm:$0xff] }
 0x3be   : > { %2949 = vmatpush.bf16.msra.mxu3 %v3779_v40 }
 0x3c0   : > { %v2457_v47 = vpop.f32.mrf.mxu3 }
 0x3c1   : > { %v2458_v58 = vadd.f32 %v2457_v47, %v2429_v55 }
 0x3c2   : > { %2950 = vmatpush.bf16.msra.mxu3 %v3778_v41 }
 0x3c4   : > { %v2481_v44 = vpop.f32.mrf.mxu2 }
 0x3c5   : > { %v2482_v50 = vadd.f32 %v2481_v44, %v2453_v48  ;;  %v3800_v48 = vld [vmem:[%s5237_s5 + $0xb8] sm:$0xff]  ;;  %v3799_v44 = vld [vmem:[%s5237_s5 + $0xb0] sm:$0xff] }
 0x3c6   : > { %2951 = vmatpush.bf16.msra.mxu3 %v3777_v42  ;;  %2972 = vmatpush.bf16.msrb.mxu2 %v3800_v48 }
 0x3c7   : > { %v2501_v51 = vpack.c.bf16 %v2482_v50, %v2482_v50  ;;  %v3791_v50 = vld [vmem:[%s5237_s5 + $0x70] sm:$0xff] }
 0x3c8   : > { %v2459_v61 = vpop.f32.mrf.mxu3 }
 0x3c9   : > { %2509 = vst.msk [vmem:[%s5020_s11] sm:$0xf] %vm5251_vm7, %v2501_v51  ;;  %2518 = vrot.lane.b32.xlu0 %v2501_v51, %s3892_s29  ;;  %v2460_v3 = vadd.f32 %v2459_v61, %v2431_v24  ;;  %v3790_v24 = vld [vmem:[%s5237_s5 + $0x68] sm:$0xff] }
 0x3ca   : > { %2958 = vmatpush.bf16.msrb.mxu3 %v3792_v49  ;;  %2973 = vmatpush.bf16.msrb.mxu2 %v3799_v44 }
 0x3cc   : > { %v2483_v1 = vpop.f32.mrf.mxu2 }
 0x3cd   : > { %v2484_v37 = vadd.f32 %v2483_v1, %v2455_v53  ;;  %v3797_v53 = vld [vmem:[%s5237_s5 + $0xa0] sm:$0xff] }
 0x3ce   : > { %2959 = vmatpush.bf16.msrb.mxu3 %v3791_v50  ;;  %2974 = vmatpush.bf16.msrb.mxu2 %v3798_v32  ;;  %v3864_v1 = vld [vmem:[%s5238_s6] ss:$0 sm:$0xff] }
 0x3cf   : > { %v2502_v54 = vpack.c.bf16 %v2484_v37, %v2484_v37 }
 0x3d1   : > { %2510 = vst.msk [vmem:[%s5020_s11 + $0x4] sm:$0xf] %vm5252_vm11, %v2502_v54  ;;  %v2538_v56 = vrot.slane %v2502_v54, 6 }
 0x3d2   : > { %2975 = vmatpush.bf16.msrb.mxu2 %v3797_v53  ;;  %2960 = vmatpush.bf16.msrb.mxu3 %v3790_v24 }
 0x3d3   : > { %2539 = vrot.lane.b32.xlu2 %v2538_v56, %s3892_s29  ;;  %v2557_v28 = vrot.slane %v2538_v56, 4 }
 0x3d4   : > { %v2486_v62 = vpop.f32.mrf.mxu2 }
 0x3d5   : > { %v2487_v59 = vadd.f32 %v2486_v62, %v2458_v58 }
 0x3d7   : > { %v2503_v60 = vpack.c.bf16 %v2487_v59, %v2487_v59 }
 0x3d9   : > { %2511 = vst.msk [vmem:[%s5020_s11 + $0x8] sm:$0xf] %vm5253_vm3, %v2503_v60 }
 0x3da   : > { %2524 = vst.msk [vmem:[#allocation3 + $0x1c] sm:$0x3] %vm433_vm5, %v2503_v60 }
 0x3db   : > { %2534 = vst.msk [vmem:[#allocation3 + $0x4] sm:$0xc] %vm2533_vm14, %v2503_v60 }
 0x3dc   : > { %v2488_v4 = vpop.f32.mrf.mxu2 }
 0x3dd   : > { %v2489_v39 = vadd.f32 %v2488_v4, %v2460_v3  ;;  %v3789_v3 = vld [vmem:[%s5237_s5 + $0x60] sm:$0xff]  ;;  %v3796_v4 = vld [vmem:[%s5237_s5 + $0x98] sm:$0xff] }
 0x3de   : > { %2976 = vmatpush.bf16.msrb.mxu2 %v3796_v4  ;;  %2961 = vmatpush.bf16.msrb.mxu3 %v3789_v3 }
 0x3df   : > { %v2504_v5 = vpack.c.bf16 %v2489_v39, %v2489_v39  ;;  %v3795_v39 = vld [vmem:[%s5237_s5 + $0x90] sm:$0xff] }
 0x3e1   : > { %2512 = vst.msk [vmem:[%s5020_s11 + $0xc] sm:$0xf] %vm5254_vm4, %v2504_v5  ;;  %v2544_v6 = vrot.slane %v2504_v5, 6  ;;  %v3788_v5 = vld [vmem:[%s5237_s5 + $0x58] sm:$0xff] }
 0x3e2   : > { %2977 = vmatpush.bf16.msrb.mxu2 %v3795_v39  ;;  %2962 = vmatpush.bf16.msrb.mxu3 %v3788_v5 }
 0x3e3   : > { %v2562_v8 = vrot.slane %v2544_v6, 4  ;;  %2546 = vst.msk [vmem:[#allocation3 + $0x1c] sm:$0xc] %vm2533_vm14, %v2544_v6  ;;  %v3794_v6 = vld [vmem:[%s5237_s5 + $0x88] sm:$0xff] }
 0x3e5   : > { %2564 = vst.msk [vmem:[#allocation3 + $0x10] sm:$0x3] %vm433_vm5, %v2562_v8  ;;  %v3787_v8 = vld [vmem:[%s5237_s5 + $0x50] sm:$0xff] }
 0x3e6   : > { %2978 = vmatpush.bf16.msrb.mxu2 %v3794_v6  ;;  %2963 = vmatpush.bf16.msrb.mxu3 %v3787_v8 }
 0x408   : > { %v2462_v38 = vpop.f32.mrf.mxu3  ;;  %v2491_v0 = vpop.f32.mrf.mxu2 }
 0x409   : > { %v2463_v33 = vadd.f32 %v2462_v38, %v2434_v9  ;;  %v3786_v9 = vld [vmem:[%s5237_s5 + $0x48] sm:$0xff]  ;;  %v3785_v38 = vld [vmem:[%s5237_s5 + $0x40] sm:$0xff] }
 0x40a   : > { %2964 = vmatpush.bf16.msrb.mxu3 %v3786_v9 }
 0x40b   : > { %v2492_v52 = vadd.f32 %v2491_v0, %v2463_v33  ;;  %v3808_v0 = vld [vmem:[%s5237_s5 + $0xf8] sm:$0xff]  ;;  %v3807_v33 = vld [vmem:[%s5237_s5 + $0xf0] sm:$0xff] }
 0x40d   : > { %v2505_v15 = vpack.c.bf16 %v2492_v52, %v2492_v52  ;;  %v3806_v52 = vld [vmem:[%s5237_s5 + $0xe8] sm:$0xff] }
 0x40e   : > { %2965 = vmatpush.bf16.msrb.mxu3 %v3785_v38 }
 0x40f   : > { %2513 = vst.msk [vmem:[%s5020_s11 + $0x10] sm:$0xf] %vm5255_vm6, %v2505_v15  ;;  %2526 = vrot.lane.b32.xlu1 %v2505_v15, %s3892_s29  ;;  %v3793_v15 = vld [vmem:[%s5237_s5 + $0x80] sm:$0xff] }
 0x410   : > { %v2464_v16 = vpop.f32.mrf.mxu3  ;;  %v2493_v17 = vpop.f32.mrf.mxu2  ;;  %2979 = vmatpush.bf16.msrb.mxu2 %v3793_v15 }
 0x411   : > { %v2465_v19 = vadd.f32 %v2464_v16, %v2436_v12 }
 0x413   : > { %v2494_v13 = vadd.f32 %v2493_v17, %v2465_v19  ;;  %v3805_v19 = vld [vmem:[%s5237_s5 + $0xe0] sm:$0xff] }
 0x415   : > { %v5044_v21 = vpack.c.bf16 %v2494_v13, %v2494_v13 }
 0x417   : > { %2514 = vst.msk [vmem:[%s5020_s11 + $0x14] sm:$0xf] %vm5256_vm8, %v5044_v21  ;;  %v2548_v57 = vrot.slane %v5044_v21, 6  ;;  %v3804_v21 = vld [vmem:[%s5237_s5 + $0xd8] sm:$0xff] }
 0x418   : > { %v2467_v63 = vpop.f32.mrf.mxu3  ;;  %v2496_v45 = vpop.f32.mrf.mxu2 }
 0x419   : > { %v2468_v46 = vadd.f32 %v2467_v63, %v2439_v22  ;;  %2549 = vrot.lane.b32.xlu0 %v2548_v57, %s3892_s29  ;;  %v2565_v61 = vrot.slane %v2548_v57, 4  ;;  %v3812_v22 = vld [vmem:[%s5237_s5 + $0x118] sm:$0xff]  ;;  %v3803_v57 = vld [vmem:[%s5237_s5 + $0xd0] sm:$0xff] }
 0x41a   : > { %3004 = vmatpush.bf16.msra.mxu2 %v3812_v22  ;;  %v3811_v63 = vld [vmem:[%s5237_s5 + $0x110] sm:$0xff] }
 0x41b   : > { %v2497_v23 = vadd.f32 %v2496_v45, %v2468_v46  ;;  %v3802_v45 = vld [vmem:[%s5237_s5 + $0xc8] sm:$0xff] }
 0x41c   : > { %v3810_v46 = vld [vmem:[%s5237_s5 + $0x108] sm:$0xff] }
 0x41d   : > { %v2507_v25 = vpack.c.bf16 %v2497_v23, %v2497_v23  ;;  %v3801_v23 = vld [vmem:[%s5237_s5 + $0xc0] sm:$0xff] }
 0x41e   : > { %3005 = vmatpush.bf16.msra.mxu2 %v3811_v63 }
 0x41f   : > { %2515 = vst.msk [vmem:[%s5020_s11 + $0x18] sm:$0xf] %vm5257_vm9, %v2507_v25 }
 0x420   : > { %2530 = vst.msk [vmem:[#allocation3 + $0x20] sm:$0x3] %vm433_vm5, %v2507_v25  ;;  %v2469_v29 = vpop.f32.mrf.mxu3  ;;  %v2498_v10 = vpop.f32.mrf.mxu2 }
 0x421   : > { %2536 = vst.msk [vmem:[#allocation3 + $0x8] sm:$0xc] %vm2533_vm14, %v2507_v25  ;;  %v2470_v7 = vadd.f32 %v2469_v29, %v2441_v27  ;;  %2558 = vrot.lane.b32.xlu0 %v2557_v28, %s3892_s29  ;;  %v3809_v25 = vld [vmem:[%s5237_s5 + $0x100] sm:$0xff] }
 0x422   : > { %3006 = vmatpush.bf16.msra.mxu2 %v3810_v46 }
 0x423   : > { %v2499_v36 = vadd.f32 %v2498_v10, %v2470_v7 }
 0x425   : > { %v2508_v34 = vpack.c.bf16 %v2499_v36, %v2499_v36 }
 0x426   : > { %3007 = vmatpush.bf16.msra.mxu2 %v3809_v25 }
 0x427   : > { %2516 = vst.msk [vmem:[%s5020_s11 + $0x1c] sm:$0xf] %vm5258_vm12, %v2508_v34  ;;  %v2554_v11 = vrot.slane %v2508_v34, 6 }
 0x429   : > { %2556 = vst.msk [vmem:[#allocation3 + $0x20] sm:$0xc] %vm2533_vm14, %v2554_v11  ;;  %v2570_v35 = vrot.slane %v2554_v11, 4 }
 0x42b   : > { %2572 = vst.msk [vmem:[#allocation3 + $0x14] sm:$0x3] %vm433_vm5, %v2570_v35  ;;  %vm2574_vm5 = vcmask 1043456  }
 0x42c   : > { %vm5113_vm7 = vmor %vm2038_vm15, %vm2574_vm5  ;;  %vm2586_vm15 = vcmask 1047556  }
 0x42d   : > { %v2540_v14 = vpop.permute.xlu2 %2539  ;;  %vm5168_vm11 = vmor %vm2586_vm15, %vm2113_vm13 }
 0x42e   : > { %2542 = vst.msk [vmem:[#allocation3 + $0x18] sm:$0xc] %vm2531_vm0, %v2540_v14 }
 0x43b   : > { %v2519_v2 = vpop.permute.xlu0 %2518 }
 0x43c   : > { %2523 = vst.msk [vmem:[#allocation3 + $0x18] sm:$0x3] %vm2522_vm1, %v2519_v2 }
 0x43d   : > { %2532 = vst.msk [vmem:[#allocation3] sm:$0xc] %vm2531_vm0, %v2519_v2 }
 0x481   : > { %v2527_v51 = vpop.permute.xlu1 %2526 }
 0x482   : > { %2529 = vst.msk [vmem:[#allocation3 + $0x1c] sm:$0x3] %vm2522_vm1, %v2527_v51 }
 0x483   : > { %2535 = vst.msk [vmem:[#allocation3 + $0x4] sm:$0xc] %vm2531_vm0, %v2527_v51 }
 0x48a   : > { %v2573_v37 = vld [vmem:[#allocation3] sm:$0xff] }
 0x48b   : > { %v2577_v47 = vld [vmem:[#allocation3 + $0x4] sm:$0xff]  ;;  %2576 = vst.msk [vmem:[#allocation6] sm:$0xff] %vm5113_vm7, %v2573_v37  ;;  %v2550_v54 = vpop.permute.xlu0 %2549 }
 0x48c   : > { %2578 = vst.msk [vmem:[#allocation6 + $0x14] sm:$0xff] %vm5113_vm7, %v2577_v47  ;;  %v2597_v11 = vld [vmem:[#allocation3] sm:$0xcc] }
 0x48d   : > { %2552 = vst.msk [vmem:[#allocation3 + $0x1c] sm:$0xc] %vm2531_vm0, %v2550_v54  ;;  %v2607_v18 = vld [vmem:[#allocation3 + $0x4] sm:$0xcc]  ;;  %v3529_v2 = vrot.slane %v2597_v11, 10 }
 0x48e   : > { %v3530_v31 = vrot.slane %v2607_v18, 10 }
 0x492   : > { %v3533_v55 = vld [vmem:[#allocation6] sm:$0xf] }
 0x493   : > { %v2559_v56 = vpop.permute.xlu0 %2558  ;;  %v3774_v58 = vld [vmem:[#allocation6 + $0x10] sm:$0xf0] }
 0x494   : > { %2561 = vst.msk [vmem:[#allocation3 + $0xc] sm:$0x3] %vm2522_vm1, %v2559_v56  ;;  %v3534_v62 = vor.u32 %v3774_v58, %v3533_v55  ;;  %v2589_v59 = vld [vmem:[#allocation3 + $0x1c] sm:$0xff] }
 0x495   : > { %v2579_v60 = vld [vmem:[#allocation3 + $0x18] sm:$0xff]  ;;  %2591 = vrot.lane.b32.xlu2 %v2589_v59, %s3892_s29 }
 0x496   : > { %2581 = vrot.lane.b32.xlu1 %v2579_v60, %s3892_s29  ;;  %2952 = vmatmul.bf16.vlgmr.msra.gmra.mxu3 %v3534_v62 }
 0x497   : > { %2986 = vmatpush.bf16.msra.mxu3 %v3808_v0 }
 0x49b   : > { %2987 = vmatpush.bf16.msra.mxu3 %v3807_v33 }
 0x49e   : > { %2566 = vrot.lane.b32.xlu1 %v2565_v61, %s3892_s29 }
 0x49f   : > { %2988 = vmatpush.bf16.msra.mxu3 %v3806_v52 }
 0x4a3   : > { %2989 = vmatpush.bf16.msra.mxu3 %v3805_v19 }
 0x4a7   : > { %2990 = vmatpush.bf16.msra.mxu3 %v3804_v21 }
 0x4ab   : > { %2991 = vmatpush.bf16.msra.mxu3 %v3803_v57 }
 0x4af   : > { %2992 = vmatpush.bf16.msra.mxu3 %v3802_v45 }
 0x4b3   : > { %2993 = vmatpush.bf16.msra.mxu3 %v3801_v23 }
 0x4ef   : > { %v2592_v12 = vpop.permute.xlu2 %2591 }
 0x4f0   : > { %v2593_v17 = vrot.slane %v2592_v12, 4 }
 0x4f2   : > { %v2594_v13 = vsel %vm927_vm10, %v2593_v17, %v2592_v12 }
 0x4f3   : > { %2596 = vst.msk [vmem:[#allocation6 + $0x18] sm:$0xff] %vm5168_vm11, %v2594_v13 }
 0x4fa   : > { %v3535_v30 = vld [vmem:[#allocation6 + $0x14] sm:$0xf0]  ;;  %v3775_v36 = vld [vmem:[#allocation6 + $0x18] sm:$0xf0] }
 0x508   : > { %v2582_v26 = vpop.permute.xlu1 %2581 }
 0x509   : > { %v2583_v27 = vrot.slane %v2582_v26, 4 }
 0x50b   : > { %v2584_v28 = vsel %vm927_vm10, %v2583_v27, %v2582_v26 }
 0x50c   : > { %2588 = vst.msk [vmem:[#allocation6 + $0x4] sm:$0xff] %vm5168_vm11, %v2584_v28 }
 0x510   : > { %v2567_v29 = vpop.permute.xlu1 %2566 }
 0x511   : > { %2569 = vst.msk [vmem:[#allocation3 + $0x10] sm:$0x3] %vm2522_vm1, %v2567_v29 }
 0x513   : > { %v3772_v7 = vld [vmem:[#allocation6 + $0x4] sm:$0xf]  ;;  %v3541_v10 = vld [vmem:[#allocation6 + $0x8] sm:$0xf] }
 0x514   : > { %v3538_v43 = vor.u32 %v3772_v7, %v3535_v30  ;;  %v3542_v34 = vor.u32 %v3775_v36, %v3541_v10 }
 0x516   : > { %2966 = vmatmul.bf16.vlgmr.msrb.gmra.mxu3 %v3538_v43  ;;  %2980 = vmatmul.bf16.vlgmr.msrb.gmra.mxu2 %v3542_v34 }
 0x518   : > { %v2598_v35 = vld [vmem:[#allocation3 + $0xc] sm:$0x33] }
 0x519   : > { %v2608_v14 = vld [vmem:[#allocation3 + $0x10] sm:$0x33]  ;;  %v2603_v40 = vrot.slane %v2598_v35, 6  ;;  %v2953_v37 = vpop.f32.mrf.mxu3 }
 0x51a   : > { %v2613_v41 = vrot.slane %v2608_v14, 6  ;;  %v2954_v58 = vadd.f32 %v3864_v1, %v2953_v37 }
 0x51b   : > { %v2604_v42 = vsel %vm4029_vm2, %v3529_v2, %v2603_v40 }
 0x51c   : > { %v2614_v48 = vsel %vm4029_vm2, %v3530_v31, %v2613_v41  ;;  %2606 = vst.msk [vmem:[#allocation6 + $0xc] sm:$0xff] %vm5113_vm7, %v2604_v42 }
 0x51d   : > { %2616 = vst.msk [vmem:[#allocation6 + $0x20] sm:$0xff] %vm5113_vm7, %v2614_v48 }
 0x521   : > { %v2955_v47 = vpop.f32.mrf.mxu3 }
 0x522   : > { %v2956_v60 = vadd.f32 %v3864_v1, %v2955_v47 }
 0x523   : > { %v3773_v49 = vld [vmem:[#allocation6 + $0xc] sm:$0xf]  ;;  %v3549_v44 = vld [vmem:[#allocation6 + $0x10] sm:$0xf] }
 0x524   : > { %v3543_v50 = vld [vmem:[#allocation6 + $0x1c] sm:$0xf0]  ;;  %v3776_v51 = vld [vmem:[#allocation6 + $0x20] sm:$0xf0] }
 0x525   : > { %v3546_v32 = vor.u32 %v3773_v49, %v3543_v50  ;;  %v3550_v53 = vor.u32 %v3776_v51, %v3549_v44 }
 0x527   : > { %2994 = vmatmul.bf16.vlgmr.msra.gmra.mxu3 %v3546_v32  ;;  %3695 = vmatmul.msk.bf16.vlgmr.msra.gmra.mxu2 %vm927_vm10, %v3550_v53 }
 0x599   : > { %v2967_v54 = vpop.f32.mrf.mxu3  ;;  %v2981_v20 = vpop.f32.mrf.mxu2 }
 0x59a   : > { %v2968_v61 = vadd.f32 %v2967_v54, %v2954_v58 }
 0x59c   : > { %v2982_v3 = vadd.f32 %v2981_v20, %v2968_v61 }
 0x5a1   : > { %v2969_v55 = vpop.f32.mrf.mxu3  ;;  %v2983_v56 = vpop.f32.mrf.mxu2 }
 0x5a2   : > { %v2970_v24 = vadd.f32 %v2969_v55, %v2956_v60 }
 0x5a4   : > { %v2984_v4 = vadd.f32 %v2983_v56, %v2970_v24 }
 0x5aa   : > { %v2995_v62 = vpop.f32.mrf.mxu3  ;;  %v3009_v59 = vpop.f32.mrf.mxu2 }
 0x5ab   : > { %v2996_v39 = vadd.f32 %v2995_v62, %v2982_v3 }
 0x5ad   : > { %v3010_v9 = vadd.f32 %v3009_v59, %v2996_v39 }
 0x5b2   : > { %v2997_v5 = vpop.f32.mrf.mxu3  ;;  %v3011_v8 = vpop.f32.mrf.mxu2 }
 0x5b3   : > { %v2998_v6 = vadd.f32 %v2997_v5, %v2984_v4 }
 0x5b5   : > { %v3012_v38 = vadd.f32 %v3011_v8, %v2998_v6 }
 0x5b7   : > { %v3816_v0 = vpack.c.bf16 %v3012_v38, %v3010_v9 }
 0x5b9   : > { %3817 = vst [vmem:[%s425_s15] sm:$0xff] %v3816_v0  }
 0x5ba PF: > { %p17_p9 = scmp.ge.s32.totalorder %s3965_s13, 4   ;;  %s5263_s30 = smov %s3884_s10 }
 0x5bb   : > { %s5264_s10 = smov %s3974_s16  ;;  %s5265_s11 = smov %s3965_s13 }
 0x5bc   :  { %19 = sbr.rel (!%p17_p9) target bundleno = 2 (0x2), region = 142 }

</bundles_post_ra>
